<compile_context>
chip_gen: v6e
topology: v6e:2x2x1
jax: 0.10.0
libtpu: 0.0.40
codegen_flags: <defaults>
</compile_context>

<pallas_src>
import jax
import jax.numpy as jnp
import numpy as np
from jax import lax
from jax.experimental import pallas as pl
from jax.experimental.pallas import tpu as pltpu


def _round_up(n: int, m: int) -> int:
    return ((n + m - 1) // m) * m


# ----------------------------------------------------------------------------
# Pallas kernel: layer-major LSTM (batched input projection + sequential
# recurrence per layer) + final FC on the last time step's hidden state.
# ----------------------------------------------------------------------------
def _make_lstm_kernel(seq_len: int, num_layers: int, in_dim: int,
                      batch_p: int, hid_p: int):
    S, L, Din, Bp, Hp = seq_len, num_layers, in_dim, batch_p, hid_p
    G = 4 * Hp

    def kernel(*refs):
        # refs = x_ref,
        #        (w_ih_l, w_hh_l, b_l) * L,
        #        fc_w, fc_b,
        #        out_ref,
        #        seq_scratch (S,Bp,Hp), proj_scratch (S,Bp,4Hp)
        x_ref = refs[0]
        layer_refs = refs[1:1 + 3 * L]
        fc_w_ref = refs[1 + 3 * L]
        fc_b_ref = refs[2 + 3 * L]
        out_ref = refs[3 + 3 * L]
        seq_ref = refs[4 + 3 * L]
        proj_ref = refs[5 + 3 * L]

        h_last = None
        for l in range(L):
            # Hoisted weight/bias loads (outside the time loop).
            w_ih = layer_refs[3 * l][...]       # (K_l, 4Hp)
            w_hh = layer_refs[3 * l + 1][...]   # (Hp, 4Hp)
            b = layer_refs[3 * l + 2][...]      # (1, 4Hp) = b_ih + b_hh (padded)

            # Batched input projection: one large MXU matmul per layer.
            if l == 0:
                inp_flat = x_ref[...].reshape(S * Bp, Din)
            else:
                inp_flat = seq_ref[...].reshape(S * Bp, Hp)
            proj = jnp.dot(inp_flat, w_ih,
                           preferred_element_type=jnp.float32) + b
            proj_ref[...] = proj.reshape(S, Bp, G)

            # Sequential recurrence: only h @ W_hh + elementwise per step.
            def step(t, carry, w_hh=w_hh):
                h, c = carry
                gates = proj_ref[t] + jnp.dot(
                    h, w_hh, preferred_element_type=jnp.float32)
                # Gate order follows PyTorch: i, f, g, o (lane-aligned: Hp%128==0).
                i_g = jax.nn.sigmoid(gates[:, 0:Hp])
                f_g = jax.nn.sigmoid(gates[:, Hp:2 * Hp])
                g_g = jnp.tanh(gates[:, 2 * Hp:3 * Hp])
                o_g = jax.nn.sigmoid(gates[:, 3 * Hp:4 * Hp])
                c_new = f_g * c + i_g * g_g
                h_new = o_g * jnp.tanh(c_new)
                seq_ref[t] = h_new
                return h_new, c_new

            h = jnp.zeros((Bp, Hp), jnp.float32)   # h0 = c0 = 0 (matches torch)
            c = jnp.zeros((Bp, Hp), jnp.float32)
            if S <= 32:
                # Full trace-time unroll for short static sequences.
                for t in range(S):
                    h, c = step(t, (h, c))
            else:
                h, c = lax.fori_loop(0, S, step, (h, c))
            h_last = h

        # fc(out[:, -1, :]) == fc(h of last layer at last time step).
        out_ref[...] = (
            jnp.dot(h_last, fc_w_ref[...], preferred_element_type=jnp.float32)
            + fc_b_ref[...]
        )

    return kernel


# ----------------------------------------------------------------------------
# One-time parameter preparation (transpose + gate/lane/sublane padding).
# ----------------------------------------------------------------------------
def _pad_gate_cols(w, H, Hp):
    """Pad each of the 4 gate blocks along the last axis from H to Hp columns."""
    if Hp == H:
        return w
    r = w.shape[0]
    w4 = w.reshape(r, 4, H)
    w4 = jnp.pad(w4, ((0, 0), (0, 0), (0, Hp - H)))
    return w4.reshape(r, 4 * Hp)


def prepare_params(params, input_dim, hidden_dim, layer_dim, output_dim):
    H = hidden_dim
    Hp = _round_up(H, 128)
    Op = _round_up(output_dim, 128)

    layers = []
    for l in range(layer_dim):
        w_ih, w_hh, b_ih, b_hh = params["lstm"][l]
        w_ih_t = jnp.transpose(w_ih)             # (Din_l, 4H)
        w_hh_t = jnp.transpose(w_hh)             # (H, 4H)
        b = (b_ih + b_hh)[None, :]               # (1, 4H)

        w_ih_p = _pad_gate_cols(w_ih_t, H, Hp)   # (Din_l, 4Hp)
        if l > 0:
            w_ih_p = jnp.pad(w_ih_p, ((0, Hp - H), (0, 0)))  # input rows H->Hp
        w_hh_p = _pad_gate_cols(w_hh_t, H, Hp)
        w_hh_p = jnp.pad(w_hh_p, ((0, Hp - H), (0, 0)))       # (Hp, 4Hp)
        b_p = _pad_gate_cols(b, H, Hp)                         # (1, 4Hp)
        layers.append((w_ih_p, w_hh_p, b_p))

    fc_w_p = jnp.pad(jnp.transpose(params["fc_w"]),
                     ((0, Hp - H), (0, Op - output_dim)))      # (Hp, Op)
    fc_b_p = jnp.pad(params["fc_b"][None, :],
                     ((0, 0), (0, Op - output_dim)))           # (1, Op)

    return {"layers": layers, "fc_w": fc_w_p, "fc_b": fc_b_p,
            "Hp": Hp, "Op": Op}


# ----------------------------------------------------------------------------
# Wrapper
# ----------------------------------------------------------------------------
def lstm_rnn_forward(x, prepped, hidden_dim, layer_dim, output_dim):
    """x: (B, S, input_dim) float32 (batch-first).  Returns (B, output_dim)."""
    B, S, Din = x.shape
    Hp, Op = prepped["Hp"], prepped["Op"]
    Bp = _round_up(B, 8)

    x_tm = jnp.transpose(x, (1, 0, 2))                 # time-major (S, B, Din)
    if Bp != B:
        x_tm = jnp.pad(x_tm, ((0, 0), (0, Bp - B), (0, 0)))

    kernel_inputs = [x_tm]
    for (w_ih, w_hh, b) in prepped["layers"]:
        kernel_inputs += [w_ih, w_hh, b]
    kernel_inputs += [prepped["fc_w"], prepped["fc_b"]]

    kernel = _make_lstm_kernel(S, layer_dim, Din, Bp, Hp)

    vmem_spec = pl.BlockSpec(memory_space=pltpu.MemorySpace.VMEM)
    out = pl.pallas_call(
        kernel,
        out_shape=jax.ShapeDtypeStruct((Bp, Op), jnp.float32),
        in_specs=[vmem_spec] * len(kernel_inputs),
        out_specs=vmem_spec,
        scratch_shapes=[
            pltpu.VMEM((S, Bp, Hp), jnp.float32),       # per-layer hidden seq
            pltpu.VMEM((S, Bp, 4 * Hp), jnp.float32),   # batched input proj
        ],
    )(*kernel_inputs)

    return out[:B, :output_dim]


# ----------------------------------------------------------------------------
# Pure-JAX reference (same math, unpadded) for verification
# ----------------------------------------------------------------------------
def lstm_rnn_reference(x, params, hidden_dim, layer_dim, output_dim):
    B, S, Din = x.shape
    H = hidden_dim
    h = [jnp.zeros((B, H), jnp.float32) for _ in range(layer_dim)]
    c = [jnp.zeros((B, H), jnp.float32) for _ in range(layer_dim)]
    for t in range(S):
        inp = x[:, t, :]
        for l in range(layer_dim):
            w_ih, w_hh, b_ih, b_hh = params["lstm"][l]
            gates = inp @ w_ih.T + h[l] @ w_hh.T + b_ih + b_hh
            i_g = jax.nn.sigmoid(gates[:, 0:H])
            f_g = jax.nn.sigmoid(gates[:, H:2 * H])
            g_g = jnp.tanh(gates[:, 2 * H:3 * H])
            o_g = jax.nn.sigmoid(gates[:, 3 * H:4 * H])
            c[l] = f_g * c[l] + i_g * g_g
            h[l] = o_g * jnp.tanh(c[l])
            inp = h[l]
    return h[layer_dim - 1] @ params["fc_w"].T + params["fc_b"]


# ----------------------------------------------------------------------------
# Deterministic parameter init (shapes match nn.LSTM / nn.Linear)
# ----------------------------------------------------------------------------
def init_params(key, input_dim, hidden_dim, layer_dim, output_dim):
    params = {"lstm": []}
    scale = 1.0 / np.sqrt(hidden_dim)
    for l in range(layer_dim):
        din_l = input_dim if l == 0 else hidden_dim
        key, k1, k2, k3, k4 = jax.random.split(key, 5)
        w_ih = jax.random.uniform(k1, (4 * hidden_dim, din_l), jnp.float32, -scale, scale)
        w_hh = jax.random.uniform(k2, (4 * hidden_dim, hidden_dim), jnp.float32, -scale, scale)
        b_ih = jax.random.uniform(k3, (4 * hidden_dim,), jnp.float32, -scale, scale)
        b_hh = jax.random.uniform(k4, (4 * hidden_dim,), jnp.float32, -scale, scale)
        params["lstm"].append((w_ih, w_hh, b_ih, b_hh))
    key, k5, k6 = jax.random.split(key, 3)
    fscale = 1.0 / np.sqrt(hidden_dim)
    params["fc_w"] = jax.random.uniform(k5, (output_dim, hidden_dim), jnp.float32, -fscale, fscale)
    params["fc_b"] = jax.random.uniform(k6, (output_dim,), jnp.float32, -fscale, fscale)
    return params


if __name__ == "__main__":
    input_dim, hidden_dim, layer_dim, output_dim = 16, 32, 2, 4
    batch, seq = 2, 8

    key = jax.random.PRNGKey(0)
    key, kx = jax.random.split(key)
    x = jax.random.normal(kx, (batch, seq, input_dim), jnp.float32)
    params = init_params(key, input_dim, hidden_dim, layer_dim, output_dim)

    # One-time weight prep (transpose + padding), done outside the hot path.
    prepped = prepare_params(params, input_dim, hidden_dim, layer_dim, output_dim)

    out = lstm_rnn_forward(x, prepped, hidden_dim, layer_dim, output_dim)
    out = jax.block_until_ready(out)

    ref = lstm_rnn_reference(x, params, hidden_dim, layer_dim, output_dim)
    # Kernel matmuls run at default single-pass MXU precision (bf16 operands,
    # f32 accumulation) per the perf review, so use a correspondingly relaxed
    # tolerance against the reference.
    np.testing.assert_allclose(np.asarray(out), np.asarray(ref), rtol=2e-2, atol=2e-2)

    print("KERNEL_OK")
</pallas_src>

<mosaic_0001>
module attributes {stable_mosaic.version = 11 : i64} {
  func.func @kernel(%arg0: memref<8x8x16xf32, #tpu.memory_space<vmem>>, %arg1: memref<16x512xf32, #tpu.memory_space<vmem>>, %arg2: memref<128x512xf32, #tpu.memory_space<vmem>>, %arg3: memref<1x512xf32, #tpu.memory_space<vmem>>, %arg4: memref<128x512xf32, #tpu.memory_space<vmem>>, %arg5: memref<128x512xf32, #tpu.memory_space<vmem>>, %arg6: memref<1x512xf32, #tpu.memory_space<vmem>>, %arg7: memref<128x128xf32, #tpu.memory_space<vmem>>, %arg8: memref<1x128xf32, #tpu.memory_space<vmem>>, %arg9: memref<8x128xf32, #tpu.memory_space<vmem>>, %arg10: memref<8x8x128xf32, #tpu.memory_space<vmem>>, %arg11: memref<8x8x512xf32, #tpu.memory_space<vmem>>) attributes {dimension_semantics = [], scalar_prefetch = 0 : i64, scratch_operands = 2 : i64, tpu.core_type = #tpu.core_type<tc>} {
    %c0 = arith.constant 0 : index
    %c0_0 = arith.constant 0 : index
    %0 = vector.load %arg1[%c0, %c0_0] : memref<16x512xf32, #tpu.memory_space<vmem>>, vector<16x512xf32>
    %c0_1 = arith.constant 0 : index
    %c0_2 = arith.constant 0 : index
    %1 = vector.load %arg2[%c0_1, %c0_2] : memref<128x512xf32, #tpu.memory_space<vmem>>, vector<128x512xf32>
    %c0_3 = arith.constant 0 : index
    %c0_4 = arith.constant 0 : index
    %2 = vector.load %arg3[%c0_3, %c0_4] : memref<1x512xf32, #tpu.memory_space<vmem>>, vector<1x512xf32>
    %c0_5 = arith.constant 0 : index
    %c0_6 = arith.constant 0 : index
    %c0_7 = arith.constant 0 : index
    %3 = vector.load %arg0[%c0_5, %c0_6, %c0_7] : memref<8x8x16xf32, #tpu.memory_space<vmem>>, vector<8x8x16xf32>
    %4 = vector.shape_cast %3 : vector<8x8x16xf32> to vector<64x16xf32>
    %cst = arith.constant dense<0.000000e+00> : vector<64x512xf32>
    %5 = tpu.matmul %4, %0, %cst {dimension_numbers = #tpu.dot_dimension_numbers<[1], [0], [0], [1], [0, 0, 1, 1], [], []>} : vector<64x16xf32>, vector<16x512xf32>, vector<64x512xf32> -> vector<64x512xf32>
    %6 = vector.broadcast %2 : vector<1x512xf32> to vector<64x512xf32>
    %7 = arith.addf %5, %6 : vector<64x512xf32>
    %8 = vector.shape_cast %7 : vector<64x512xf32> to vector<8x8x512xf32>
    %c0_8 = arith.constant 0 : index
    %c0_9 = arith.constant 0 : index
    %c0_10 = arith.constant 0 : index
    %9 = vector.load %arg11[%c0_8, %c0_9, %c0_10] : memref<8x8x512xf32, #tpu.memory_space<vmem>>, vector<8x8x512xf32>
    tpu.vector_store %arg11[%c0_8, %c0_9, %c0_10], %8 {strides = array<i32>} : memref<8x8x512xf32, #tpu.memory_space<vmem>>, vector<8x8x512xf32>,
    %cst_11 = arith.constant 0.000000e+00 : f32
    %10 = vector.broadcast %cst_11 : f32 to vector<8x128xf32>
    %cst_12 = arith.constant 0.000000e+00 : f32
    %11 = vector.broadcast %cst_12 : f32 to vector<8x128xf32>
    %c0_13 = arith.constant 0 : index
    %c0_14 = arith.constant 0 : index
    %c0_15 = arith.constant 0 : index
    %12 = vector.load %arg11[%c0_13, %c0_14, %c0_15] : memref<8x8x512xf32, #tpu.memory_space<vmem>>, vector<1x8x512xf32>
    %13 = vector.shape_cast %12 : vector<1x8x512xf32> to vector<8x512xf32>
    %cst_16 = arith.constant dense<0.000000e+00> : vector<8x512xf32>
    %14 = tpu.matmul %10, %1, %cst_16 {dimension_numbers = #tpu.dot_dimension_numbers<[1], [0], [0], [1], [0, 0, 1, 1], [], []>} : vector<8x128xf32>, vector<128x512xf32>, vector<8x512xf32> -> vector<8x512xf32>
    %15 = arith.addf %13, %14 : vector<8x512xf32>
    %16 = vector.extract_strided_slice %15 {offsets = [0, 0], sizes = [8, 128], strides = [1, 1]} : vector<8x512xf32> to vector<8x128xf32>
    %17 = arith.negf %16 : vector<8x128xf32>
    %18 = math.exp %17 : vector<8x128xf32>
    %cst_17 = arith.constant 1.000000e+00 : f32
    %19 = vector.broadcast %cst_17 : f32 to vector<8x128xf32>
    %20 = arith.addf %19, %18 : vector<8x128xf32>
    %21 = arith.divf %19, %20 : vector<8x128xf32>
    %22 = vector.extract_strided_slice %15 {offsets = [0, 128], sizes = [8, 128], strides = [1, 1]} : vector<8x512xf32> to vector<8x128xf32>
    %23 = arith.negf %22 : vector<8x128xf32>
    %24 = math.exp %23 : vector<8x128xf32>
    %cst_18 = arith.constant 1.000000e+00 : f32
    %25 = vector.broadcast %cst_18 : f32 to vector<8x128xf32>
    %26 = arith.addf %25, %24 : vector<8x128xf32>
    %27 = arith.divf %25, %26 : vector<8x128xf32>
    %28 = vector.extract_strided_slice %15 {offsets = [0, 256], sizes = [8, 128], strides = [1, 1]} : vector<8x512xf32> to vector<8x128xf32>
    %29 = math.tanh %28 : vector<8x128xf32>
    %30 = vector.extract_strided_slice %15 {offsets = [0, 384], sizes = [8, 128], strides = [1, 1]} : vector<8x512xf32> to vector<8x128xf32>
    %31 = arith.negf %30 : vector<8x128xf32>
    %32 = math.exp %31 : vector<8x128xf32>
    %cst_19 = arith.constant 1.000000e+00 : f32
    %33 = vector.broadcast %cst_19 : f32 to vector<8x128xf32>
    %34 = arith.addf %33, %32 : vector<8x128xf32>
    %35 = arith.divf %33, %34 : vector<8x128xf32>
    %36 = arith.mulf %27, %11 : vector<8x128xf32>
    %37 = arith.mulf %21, %29 : vector<8x128xf32>
    %38 = arith.addf %36, %37 : vector<8x128xf32>
    %39 = math.tanh %38 : vector<8x128xf32>
    %40 = arith.mulf %35, %39 : vector<8x128xf32>
    %c0_20 = arith.constant 0 : index
    %c0_21 = arith.constant 0 : index
    %c0_22 = arith.constant 0 : index
    %41 = vector.load %arg10[%c0_20, %c0_21, %c0_22] : memref<8x8x128xf32, #tpu.memory_space<vmem>>, vector<1x8x128xf32>
    %42 = vector.shape_cast %41 : vector<1x8x128xf32> to vector<8x128xf32>
    %43 = vector.shape_cast %40 : vector<8x128xf32> to vector<1x8x128xf32>
    tpu.vector_store %arg10[%c0_20, %c0_21, %c0_22], %43 {strides = array<i32>} : memref<8x8x128xf32, #tpu.memory_space<vmem>>, vector<1x8x128xf32>,
    %c1 = arith.constant 1 : index
    %c0_23 = arith.constant 0 : index
    %c0_24 = arith.constant 0 : index
    %44 = vector.load %arg11[%c1, %c0_23, %c0_24] : memref<8x8x512xf32, #tpu.memory_space<vmem>>, vector<1x8x512xf32>
    %45 = vector.shape_cast %44 : vector<1x8x512xf32> to vector<8x512xf32>
    %cst_25 = arith.constant dense<0.000000e+00> : vector<8x512xf32>
    %46 = tpu.matmul %40, %1, %cst_25 {dimension_numbers = #tpu.dot_dimension_numbers<[1], [0], [0], [1], [0, 0, 1, 1], [], []>} : vector<8x128xf32>, vector<128x512xf32>, vector<8x512xf32> -> vector<8x512xf32>
    %47 = arith.addf %45, %46 : vector<8x512xf32>
    %48 = vector.extract_strided_slice %47 {offsets = [0, 0], sizes = [8, 128], strides = [1, 1]} : vector<8x512xf32> to vector<8x128xf32>
    %49 = arith.negf %48 : vector<8x128xf32>
    %50 = math.exp %49 : vector<8x128xf32>
    %cst_26 = arith.constant 1.000000e+00 : f32
    %51 = vector.broadcast %cst_26 : f32 to vector<8x128xf32>
    %52 = arith.addf %51, %50 : vector<8x128xf32>
    %53 = arith.divf %51, %52 : vector<8x128xf32>
    %54 = vector.extract_strided_slice %47 {offsets = [0, 128], sizes = [8, 128], strides = [1, 1]} : vector<8x512xf32> to vector<8x128xf32>
    %55 = arith.negf %54 : vector<8x128xf32>
    %56 = math.exp %55 : vector<8x128xf32>
    %cst_27 = arith.constant 1.000000e+00 : f32
    %57 = vector.broadcast %cst_27 : f32 to vector<8x128xf32>
    %58 = arith.addf %57, %56 : vector<8x128xf32>
    %59 = arith.divf %57, %58 : vector<8x128xf32>
    %60 = vector.extract_strided_slice %47 {offsets = [0, 256], sizes = [8, 128], strides = [1, 1]} : vector<8x512xf32> to vector<8x128xf32>
    %61 = math.tanh %60 : vector<8x128xf32>
    %62 = vector.extract_strided_slice %47 {offsets = [0, 384], sizes = [8, 128], strides = [1, 1]} : vector<8x512xf32> to vector<8x128xf32>
    %63 = arith.negf %62 : vector<8x128xf32>
    %64 = math.exp %63 : vector<8x128xf32>
    %cst_28 = arith.constant 1.000000e+00 : f32
    %65 = vector.broadcast %cst_28 : f32 to vector<8x128xf32>
    %66 = arith.addf %65, %64 : vector<8x128xf32>
    %67 = arith.divf %65, %66 : vector<8x128xf32>
    %68 = arith.mulf %59, %38 : vector<8x128xf32>
    %69 = arith.mulf %53, %61 : vector<8x128xf32>
    %70 = arith.addf %68, %69 : vector<8x128xf32>
    %71 = math.tanh %70 : vector<8x128xf32>
    %72 = arith.mulf %67, %71 : vector<8x128xf32>
    %c1_29 = arith.constant 1 : index
    %c0_30 = arith.constant 0 : index
    %c0_31 = arith.constant 0 : index
    %73 = vector.load %arg10[%c1_29, %c0_30, %c0_31] : memref<8x8x128xf32, #tpu.memory_space<vmem>>, vector<1x8x128xf32>
    %74 = vector.shape_cast %73 : vector<1x8x128xf32> to vector<8x128xf32>
    %75 = vector.shape_cast %72 : vector<8x128xf32> to vector<1x8x128xf32>
    tpu.vector_store %arg10[%c1_29, %c0_30, %c0_31], %75 {strides = array<i32>} : memref<8x8x128xf32, #tpu.memory_space<vmem>>, vector<1x8x128xf32>,
    %c2 = arith.constant 2 : index
    %c0_32 = arith.constant 0 : index
    %c0_33 = arith.constant 0 : index
    %76 = vector.load %arg11[%c2, %c0_32, %c0_33] : memref<8x8x512xf32, #tpu.memory_space<vmem>>, vector<1x8x512xf32>
    %77 = vector.shape_cast %76 : vector<1x8x512xf32> to vector<8x512xf32>
    %cst_34 = arith.constant dense<0.000000e+00> : vector<8x512xf32>
    %78 = tpu.matmul %72, %1, %cst_34 {dimension_numbers = #tpu.dot_dimension_numbers<[1], [0], [0], [1], [0, 0, 1, 1], [], []>} : vector<8x128xf32>, vector<128x512xf32>, vector<8x512xf32> -> vector<8x512xf32>
    %79 = arith.addf %77, %78 : vector<8x512xf32>
    %80 = vector.extract_strided_slice %79 {offsets = [0, 0], sizes = [8, 128], strides = [1, 1]} : vector<8x512xf32> to vector<8x128xf32>
    %81 = arith.negf %80 : vector<8x128xf32>
    %82 = math.exp %81 : vector<8x128xf32>
    %cst_35 = arith.constant 1.000000e+00 : f32
    %83 = vector.broadcast %cst_35 : f32 to vector<8x128xf32>
    %84 = arith.addf %83, %82 : vector<8x128xf32>
    %85 = arith.divf %83, %84 : vector<8x128xf32>
    %86 = vector.extract_strided_slice %79 {offsets = [0, 128], sizes = [8, 128], strides = [1, 1]} : vector<8x512xf32> to vector<8x128xf32>
    %87 = arith.negf %86 : vector<8x128xf32>
    %88 = math.exp %87 : vector<8x128xf32>
    %cst_36 = arith.constant 1.000000e+00 : f32
    %89 = vector.broadcast %cst_36 : f32 to vector<8x128xf32>
    %90 = arith.addf %89, %88 : vector<8x128xf32>
    %91 = arith.divf %89, %90 : vector<8x128xf32>
    %92 = vector.extract_strided_slice %79 {offsets = [0, 256], sizes = [8, 128], strides = [1, 1]} : vector<8x512xf32> to vector<8x128xf32>
    %93 = math.tanh %92 : vector<8x128xf32>
    %94 = vector.extract_strided_slice %79 {offsets = [0, 384], sizes = [8, 128], strides = [1, 1]} : vector<8x512xf32> to vector<8x128xf32>
    %95 = arith.negf %94 : vector<8x128xf32>
    %96 = math.exp %95 : vector<8x128xf32>
    %cst_37 = arith.constant 1.000000e+00 : f32
    %97 = vector.broadcast %cst_37 : f32 to vector<8x128xf32>
    %98 = arith.addf %97, %96 : vector<8x128xf32>
    %99 = arith.divf %97, %98 : vector<8x128xf32>
    %100 = arith.mulf %91, %70 : vector<8x128xf32>
    %101 = arith.mulf %85, %93 : vector<8x128xf32>
    %102 = arith.addf %100, %101 : vector<8x128xf32>
    %103 = math.tanh %102 : vector<8x128xf32>
    %104 = arith.mulf %99, %103 : vector<8x128xf32>
    %c2_38 = arith.constant 2 : index
    %c0_39 = arith.constant 0 : index
    %c0_40 = arith.constant 0 : index
    %105 = vector.load %arg10[%c2_38, %c0_39, %c0_40] : memref<8x8x128xf32, #tpu.memory_space<vmem>>, vector<1x8x128xf32>
    %106 = vector.shape_cast %105 : vector<1x8x128xf32> to vector<8x128xf32>
    %107 = vector.shape_cast %104 : vector<8x128xf32> to vector<1x8x128xf32>
    tpu.vector_store %arg10[%c2_38, %c0_39, %c0_40], %107 {strides = array<i32>} : memref<8x8x128xf32, #tpu.memory_space<vmem>>, vector<1x8x128xf32>,
    %c3 = arith.constant 3 : index
    %c0_41 = arith.constant 0 : index
    %c0_42 = arith.constant 0 : index
    %108 = vector.load %arg11[%c3, %c0_41, %c0_42] : memref<8x8x512xf32, #tpu.memory_space<vmem>>, vector<1x8x512xf32>
    %109 = vector.shape_cast %108 : vector<1x8x512xf32> to vector<8x512xf32>
    %cst_43 = arith.constant dense<0.000000e+00> : vector<8x512xf32>
    %110 = tpu.matmul %104, %1, %cst_43 {dimension_numbers = #tpu.dot_dimension_numbers<[1], [0], [0], [1], [0, 0, 1, 1], [], []>} : vector<8x128xf32>, vector<128x512xf32>, vector<8x512xf32> -> vector<8x512xf32>
    %111 = arith.addf %109, %110 : vector<8x512xf32>
    %112 = vector.extract_strided_slice %111 {offsets = [0, 0], sizes = [8, 128], strides = [1, 1]} : vector<8x512xf32> to vector<8x128xf32>
    %113 = arith.negf %112 : vector<8x128xf32>
    %114 = math.exp %113 : vector<8x128xf32>
    %cst_44 = arith.constant 1.000000e+00 : f32
    %115 = vector.broadcast %cst_44 : f32 to vector<8x128xf32>
    %116 = arith.addf %115, %114 : vector<8x128xf32>
    %117 = arith.divf %115, %116 : vector<8x128xf32>
    %118 = vector.extract_strided_slice %111 {offsets = [0, 128], sizes = [8, 128], strides = [1, 1]} : vector<8x512xf32> to vector<8x128xf32>
    %119 = arith.negf %118 : vector<8x128xf32>
    %120 = math.exp %119 : vector<8x128xf32>
    %cst_45 = arith.constant 1.000000e+00 : f32
    %121 = vector.broadcast %cst_45 : f32 to vector<8x128xf32>
    %122 = arith.addf %121, %120 : vector<8x128xf32>
    %123 = arith.divf %121, %122 : vector<8x128xf32>
    %124 = vector.extract_strided_slice %111 {offsets = [0, 256], sizes = [8, 128], strides = [1, 1]} : vector<8x512xf32> to vector<8x128xf32>
    %125 = math.tanh %124 : vector<8x128xf32>
    %126 = vector.extract_strided_slice %111 {offsets = [0, 384], sizes = [8, 128], strides = [1, 1]} : vector<8x512xf32> to vector<8x128xf32>
    %127 = arith.negf %126 : vector<8x128xf32>
    %128 = math.exp %127 : vector<8x128xf32>
    %cst_46 = arith.constant 1.000000e+00 : f32
    %129 = vector.broadcast %cst_46 : f32 to vector<8x128xf32>
    %130 = arith.addf %129, %128 : vector<8x128xf32>
    %131 = arith.divf %129, %130 : vector<8x128xf32>
    %132 = arith.mulf %123, %102 : vector<8x128xf32>
    %133 = arith.mulf %117, %125 : vector<8x128xf32>
    %134 = arith.addf %132, %133 : vector<8x128xf32>
    %135 = math.tanh %134 : vector<8x128xf32>
    %136 = arith.mulf %131, %135 : vector<8x128xf32>
    %c3_47 = arith.constant 3 : index
    %c0_48 = arith.constant 0 : index
    %c0_49 = arith.constant 0 : index
    %137 = vector.load %arg10[%c3_47, %c0_48, %c0_49] : memref<8x8x128xf32, #tpu.memory_space<vmem>>, vector<1x8x128xf32>
    %138 = vector.shape_cast %137 : vector<1x8x128xf32> to vector<8x128xf32>
    %139 = vector.shape_cast %136 : vector<8x128xf32> to vector<1x8x128xf32>
    tpu.vector_store %arg10[%c3_47, %c0_48, %c0_49], %139 {strides = array<i32>} : memref<8x8x128xf32, #tpu.memory_space<vmem>>, vector<1x8x128xf32>,
    %c4 = arith.constant 4 : index
    %c0_50 = arith.constant 0 : index
    %c0_51 = arith.constant 0 : index
    %140 = vector.load %arg11[%c4, %c0_50, %c0_51] : memref<8x8x512xf32, #tpu.memory_space<vmem>>, vector<1x8x512xf32>
    %141 = vector.shape_cast %140 : vector<1x8x512xf32> to vector<8x512xf32>
    %cst_52 = arith.constant dense<0.000000e+00> : vector<8x512xf32>
    %142 = tpu.matmul %136, %1, %cst_52 {dimension_numbers = #tpu.dot_dimension_numbers<[1], [0], [0], [1], [0, 0, 1, 1], [], []>} : vector<8x128xf32>, vector<128x512xf32>, vector<8x512xf32> -> vector<8x512xf32>
    %143 = arith.addf %141, %142 : vector<8x512xf32>
    %144 = vector.extract_strided_slice %143 {offsets = [0, 0], sizes = [8, 128], strides = [1, 1]} : vector<8x512xf32> to vector<8x128xf32>
    %145 = arith.negf %144 : vector<8x128xf32>
    %146 = math.exp %145 : vector<8x128xf32>
    %cst_53 = arith.constant 1.000000e+00 : f32
    %147 = vector.broadcast %cst_53 : f32 to vector<8x128xf32>
    %148 = arith.addf %147, %146 : vector<8x128xf32>
    %149 = arith.divf %147, %148 : vector<8x128xf32>
    %150 = vector.extract_strided_slice %143 {offsets = [0, 128], sizes = [8, 128], strides = [1, 1]} : vector<8x512xf32> to vector<8x128xf32>
    %151 = arith.negf %150 : vector<8x128xf32>
    %152 = math.exp %151 : vector<8x128xf32>
    %cst_54 = arith.constant 1.000000e+00 : f32
    %153 = vector.broadcast %cst_54 : f32 to vector<8x128xf32>
    %154 = arith.addf %153, %152 : vector<8x128xf32>
    %155 = arith.divf %153, %154 : vector<8x128xf32>
    %156 = vector.extract_strided_slice %143 {offsets = [0, 256], sizes = [8, 128], strides = [1, 1]} : vector<8x512xf32> to vector<8x128xf32>
    %157 = math.tanh %156 : vector<8x128xf32>
    %158 = vector.extract_strided_slice %143 {offsets = [0, 384], sizes = [8, 128], strides = [1, 1]} : vector<8x512xf32> to vector<8x128xf32>
    %159 = arith.negf %158 : vector<8x128xf32>
    %160 = math.exp %159 : vector<8x128xf32>
    %cst_55 = arith.constant 1.000000e+00 : f32
    %161 = vector.broadcast %cst_55 : f32 to vector<8x128xf32>
    %162 = arith.addf %161, %160 : vector<8x128xf32>
    %163 = arith.divf %161, %162 : vector<8x128xf32>
    %164 = arith.mulf %155, %134 : vector<8x128xf32>
    %165 = arith.mulf %149, %157 : vector<8x128xf32>
    %166 = arith.addf %164, %165 : vector<8x128xf32>
    %167 = math.tanh %166 : vector<8x128xf32>
    %168 = arith.mulf %163, %167 : vector<8x128xf32>
    %c4_56 = arith.constant 4 : index
    %c0_57 = arith.constant 0 : index
    %c0_58 = arith.constant 0 : index
    %169 = vector.load %arg10[%c4_56, %c0_57, %c0_58] : memref<8x8x128xf32, #tpu.memory_space<vmem>>, vector<1x8x128xf32>
    %170 = vector.shape_cast %169 : vector<1x8x128xf32> to vector<8x128xf32>
    %171 = vector.shape_cast %168 : vector<8x128xf32> to vector<1x8x128xf32>
    tpu.vector_store %arg10[%c4_56, %c0_57, %c0_58], %171 {strides = array<i32>} : memref<8x8x128xf32, #tpu.memory_space<vmem>>, vector<1x8x128xf32>,
    %c5 = arith.constant 5 : index
    %c0_59 = arith.constant 0 : index
    %c0_60 = arith.constant 0 : index
    %172 = vector.load %arg11[%c5, %c0_59, %c0_60] : memref<8x8x512xf32, #tpu.memory_space<vmem>>, vector<1x8x512xf32>
    %173 = vector.shape_cast %172 : vector<1x8x512xf32> to vector<8x512xf32>
    %cst_61 = arith.constant dense<0.000000e+00> : vector<8x512xf32>
    %174 = tpu.matmul %168, %1, %cst_61 {dimension_numbers = #tpu.dot_dimension_numbers<[1], [0], [0], [1], [0, 0, 1, 1], [], []>} : vector<8x128xf32>, vector<128x512xf32>, vector<8x512xf32> -> vector<8x512xf32>
    %175 = arith.addf %173, %174 : vector<8x512xf32>
    %176 = vector.extract_strided_slice %175 {offsets = [0, 0], sizes = [8, 128], strides = [1, 1]} : vector<8x512xf32> to vector<8x128xf32>
    %177 = arith.negf %176 : vector<8x128xf32>
    %178 = math.exp %177 : vector<8x128xf32>
    %cst_62 = arith.constant 1.000000e+00 : f32
    %179 = vector.broadcast %cst_62 : f32 to vector<8x128xf32>
    %180 = arith.addf %179, %178 : vector<8x128xf32>
    %181 = arith.divf %179, %180 : vector<8x128xf32>
    %182 = vector.extract_strided_slice %175 {offsets = [0, 128], sizes = [8, 128], strides = [1, 1]} : vector<8x512xf32> to vector<8x128xf32>
    %183 = arith.negf %182 : vector<8x128xf32>
    %184 = math.exp %183 : vector<8x128xf32>
    %cst_63 = arith.constant 1.000000e+00 : f32
    %185 = vector.broadcast %cst_63 : f32 to vector<8x128xf32>
    %186 = arith.addf %185, %184 : vector<8x128xf32>
    %187 = arith.divf %185, %186 : vector<8x128xf32>
    %188 = vector.extract_strided_slice %175 {offsets = [0, 256], sizes = [8, 128], strides = [1, 1]} : vector<8x512xf32> to vector<8x128xf32>
    %189 = math.tanh %188 : vector<8x128xf32>
    %190 = vector.extract_strided_slice %175 {offsets = [0, 384], sizes = [8, 128], strides = [1, 1]} : vector<8x512xf32> to vector<8x128xf32>
    %191 = arith.negf %190 : vector<8x128xf32>
    %192 = math.exp %191 : vector<8x128xf32>
    %cst_64 = arith.constant 1.000000e+00 : f32
    %193 = vector.broadcast %cst_64 : f32 to vector<8x128xf32>
    %194 = arith.addf %193, %192 : vector<8x128xf32>
    %195 = arith.divf %193, %194 : vector<8x128xf32>
    %196 = arith.mulf %187, %166 : vector<8x128xf32>
    %197 = arith.mulf %181, %189 : vector<8x128xf32>
    %198 = arith.addf %196, %197 : vector<8x128xf32>
    %199 = math.tanh %198 : vector<8x128xf32>
    %200 = arith.mulf %195, %199 : vector<8x128xf32>
    %c5_65 = arith.constant 5 : index
    %c0_66 = arith.constant 0 : index
    %c0_67 = arith.constant 0 : index
    %201 = vector.load %arg10[%c5_65, %c0_66, %c0_67] : memref<8x8x128xf32, #tpu.memory_space<vmem>>, vector<1x8x128xf32>
    %202 = vector.shape_cast %201 : vector<1x8x128xf32> to vector<8x128xf32>
    %203 = vector.shape_cast %200 : vector<8x128xf32> to vector<1x8x128xf32>
    tpu.vector_store %arg10[%c5_65, %c0_66, %c0_67], %203 {strides = array<i32>} : memref<8x8x128xf32, #tpu.memory_space<vmem>>, vector<1x8x128xf32>,
    %c6 = arith.constant 6 : index
    %c0_68 = arith.constant 0 : index
    %c0_69 = arith.constant 0 : index
    %204 = vector.load %arg11[%c6, %c0_68, %c0_69] : memref<8x8x512xf32, #tpu.memory_space<vmem>>, vector<1x8x512xf32>
    %205 = vector.shape_cast %204 : vector<1x8x512xf32> to vector<8x512xf32>
    %cst_70 = arith.constant dense<0.000000e+00> : vector<8x512xf32>
    %206 = tpu.matmul %200, %1, %cst_70 {dimension_numbers = #tpu.dot_dimension_numbers<[1], [0], [0], [1], [0, 0, 1, 1], [], []>} : vector<8x128xf32>, vector<128x512xf32>, vector<8x512xf32> -> vector<8x512xf32>
    %207 = arith.addf %205, %206 : vector<8x512xf32>
    %208 = vector.extract_strided_slice %207 {offsets = [0, 0], sizes = [8, 128], strides = [1, 1]} : vector<8x512xf32> to vector<8x128xf32>
    %209 = arith.negf %208 : vector<8x128xf32>
    %210 = math.exp %209 : vector<8x128xf32>
    %cst_71 = arith.constant 1.000000e+00 : f32
    %211 = vector.broadcast %cst_71 : f32 to vector<8x128xf32>
    %212 = arith.addf %211, %210 : vector<8x128xf32>
    %213 = arith.divf %211, %212 : vector<8x128xf32>
    %214 = vector.extract_strided_slice %207 {offsets = [0, 128], sizes = [8, 128], strides = [1, 1]} : vector<8x512xf32> to vector<8x128xf32>
    %215 = arith.negf %214 : vector<8x128xf32>
    %216 = math.exp %215 : vector<8x128xf32>
    %cst_72 = arith.constant 1.000000e+00 : f32
    %217 = vector.broadcast %cst_72 : f32 to vector<8x128xf32>
    %218 = arith.addf %217, %216 : vector<8x128xf32>
    %219 = arith.divf %217, %218 : vector<8x128xf32>
    %220 = vector.extract_strided_slice %207 {offsets = [0, 256], sizes = [8, 128], strides = [1, 1]} : vector<8x512xf32> to vector<8x128xf32>
    %221 = math.tanh %220 : vector<8x128xf32>
    %222 = vector.extract_strided_slice %207 {offsets = [0, 384], sizes = [8, 128], strides = [1, 1]} : vector<8x512xf32> to vector<8x128xf32>
    %223 = arith.negf %222 : vector<8x128xf32>
    %224 = math.exp %223 : vector<8x128xf32>
    %cst_73 = arith.constant 1.000000e+00 : f32
    %225 = vector.broadcast %cst_73 : f32 to vector<8x128xf32>
    %226 = arith.addf %225, %224 : vector<8x128xf32>
    %227 = arith.divf %225, %226 : vector<8x128xf32>
    %228 = arith.mulf %219, %198 : vector<8x128xf32>
    %229 = arith.mulf %213, %221 : vector<8x128xf32>
    %230 = arith.addf %228, %229 : vector<8x128xf32>
    %231 = math.tanh %230 : vector<8x128xf32>
    %232 = arith.mulf %227, %231 : vector<8x128xf32>
    %c6_74 = arith.constant 6 : index
    %c0_75 = arith.constant 0 : index
    %c0_76 = arith.constant 0 : index
    %233 = vector.load %arg10[%c6_74, %c0_75, %c0_76] : memref<8x8x128xf32, #tpu.memory_space<vmem>>, vector<1x8x128xf32>
    %234 = vector.shape_cast %233 : vector<1x8x128xf32> to vector<8x128xf32>
    %235 = vector.shape_cast %232 : vector<8x128xf32> to vector<1x8x128xf32>
    tpu.vector_store %arg10[%c6_74, %c0_75, %c0_76], %235 {strides = array<i32>} : memref<8x8x128xf32, #tpu.memory_space<vmem>>, vector<1x8x128xf32>,
    %c7 = arith.constant 7 : index
    %c0_77 = arith.constant 0 : index
    %c0_78 = arith.constant 0 : index
    %236 = vector.load %arg11[%c7, %c0_77, %c0_78] : memref<8x8x512xf32, #tpu.memory_space<vmem>>, vector<1x8x512xf32>
    %237 = vector.shape_cast %236 : vector<1x8x512xf32> to vector<8x512xf32>
    %cst_79 = arith.constant dense<0.000000e+00> : vector<8x512xf32>
    %238 = tpu.matmul %232, %1, %cst_79 {dimension_numbers = #tpu.dot_dimension_numbers<[1], [0], [0], [1], [0, 0, 1, 1], [], []>} : vector<8x128xf32>, vector<128x512xf32>, vector<8x512xf32> -> vector<8x512xf32>
    %239 = arith.addf %237, %238 : vector<8x512xf32>
    %240 = vector.extract_strided_slice %239 {offsets = [0, 0], sizes = [8, 128], strides = [1, 1]} : vector<8x512xf32> to vector<8x128xf32>
    %241 = arith.negf %240 : vector<8x128xf32>
    %242 = math.exp %241 : vector<8x128xf32>
    %cst_80 = arith.constant 1.000000e+00 : f32
    %243 = vector.broadcast %cst_80 : f32 to vector<8x128xf32>
    %244 = arith.addf %243, %242 : vector<8x128xf32>
    %245 = arith.divf %243, %244 : vector<8x128xf32>
    %246 = vector.extract_strided_slice %239 {offsets = [0, 128], sizes = [8, 128], strides = [1, 1]} : vector<8x512xf32> to vector<8x128xf32>
    %247 = arith.negf %246 : vector<8x128xf32>
    %248 = math.exp %247 : vector<8x128xf32>
    %cst_81 = arith.constant 1.000000e+00 : f32
    %249 = vector.broadcast %cst_81 : f32 to vector<8x128xf32>
    %250 = arith.addf %249, %248 : vector<8x128xf32>
    %251 = arith.divf %249, %250 : vector<8x128xf32>
    %252 = vector.extract_strided_slice %239 {offsets = [0, 256], sizes = [8, 128], strides = [1, 1]} : vector<8x512xf32> to vector<8x128xf32>
    %253 = math.tanh %252 : vector<8x128xf32>
    %254 = vector.extract_strided_slice %239 {offsets = [0, 384], sizes = [8, 128], strides = [1, 1]} : vector<8x512xf32> to vector<8x128xf32>
    %255 = arith.negf %254 : vector<8x128xf32>
    %256 = math.exp %255 : vector<8x128xf32>
    %cst_82 = arith.constant 1.000000e+00 : f32
    %257 = vector.broadcast %cst_82 : f32 to vector<8x128xf32>
    %258 = arith.addf %257, %256 : vector<8x128xf32>
    %259 = arith.divf %257, %258 : vector<8x128xf32>
    %260 = arith.mulf %251, %230 : vector<8x128xf32>
    %261 = arith.mulf %245, %253 : vector<8x128xf32>
    %262 = arith.addf %260, %261 : vector<8x128xf32>
    %263 = math.tanh %262 : vector<8x128xf32>
    %264 = arith.mulf %259, %263 : vector<8x128xf32>
    %c7_83 = arith.constant 7 : index
    %c0_84 = arith.constant 0 : index
    %c0_85 = arith.constant 0 : index
    %265 = vector.load %arg10[%c7_83, %c0_84, %c0_85] : memref<8x8x128xf32, #tpu.memory_space<vmem>>, vector<1x8x128xf32>
    %266 = vector.shape_cast %265 : vector<1x8x128xf32> to vector<8x128xf32>
    %267 = vector.shape_cast %264 : vector<8x128xf32> to vector<1x8x128xf32>
    tpu.vector_store %arg10[%c7_83, %c0_84, %c0_85], %267 {strides = array<i32>} : memref<8x8x128xf32, #tpu.memory_space<vmem>>, vector<1x8x128xf32>,
    %c0_86 = arith.constant 0 : index
    %c0_87 = arith.constant 0 : index
    %268 = vector.load %arg4[%c0_86, %c0_87] : memref<128x512xf32, #tpu.memory_space<vmem>>, vector<128x512xf32>
    %c0_88 = arith.constant 0 : index
    %c0_89 = arith.constant 0 : index
    %269 = vector.load %arg5[%c0_88, %c0_89] : memref<128x512xf32, #tpu.memory_space<vmem>>, vector<128x512xf32>
    %c0_90 = arith.constant 0 : index
    %c0_91 = arith.constant 0 : index
    %270 = vector.load %arg6[%c0_90, %c0_91] : memref<1x512xf32, #tpu.memory_space<vmem>>, vector<1x512xf32>
    %c0_92 = arith.constant 0 : index
    %c0_93 = arith.constant 0 : index
    %c0_94 = arith.constant 0 : index
    %271 = vector.load %arg10[%c0_92, %c0_93, %c0_94] : memref<8x8x128xf32, #tpu.memory_space<vmem>>, vector<8x8x128xf32>
    %272 = vector.shape_cast %271 : vector<8x8x128xf32> to vector<64x128xf32>
    %cst_95 = arith.constant dense<0.000000e+00> : vector<64x512xf32>
    %273 = tpu.matmul %272, %268, %cst_95 {dimension_numbers = #tpu.dot_dimension_numbers<[1], [0], [0], [1], [0, 0, 1, 1], [], []>} : vector<64x128xf32>, vector<128x512xf32>, vector<64x512xf32> -> vector<64x512xf32>
    %274 = vector.broadcast %270 : vector<1x512xf32> to vector<64x512xf32>
    %275 = arith.addf %273, %274 : vector<64x512xf32>
    %276 = vector.shape_cast %275 : vector<64x512xf32> to vector<8x8x512xf32>
    %c0_96 = arith.constant 0 : index
    %c0_97 = arith.constant 0 : index
    %c0_98 = arith.constant 0 : index
    %277 = vector.load %arg11[%c0_96, %c0_97, %c0_98] : memref<8x8x512xf32, #tpu.memory_space<vmem>>, vector<8x8x512xf32>
    tpu.vector_store %arg11[%c0_96, %c0_97, %c0_98], %276 {strides = array<i32>} : memref<8x8x512xf32, #tpu.memory_space<vmem>>, vector<8x8x512xf32>,
    %cst_99 = arith.constant 0.000000e+00 : f32
    %278 = vector.broadcast %cst_99 : f32 to vector<8x128xf32>
    %cst_100 = arith.constant 0.000000e+00 : f32
    %279 = vector.broadcast %cst_100 : f32 to vector<8x128xf32>
    %c0_101 = arith.constant 0 : index
    %c0_102 = arith.constant 0 : index
    %c0_103 = arith.constant 0 : index
    %280 = vector.load %arg11[%c0_101, %c0_102, %c0_103] : memref<8x8x512xf32, #tpu.memory_space<vmem>>, vector<1x8x512xf32>
    %281 = vector.shape_cast %280 : vector<1x8x512xf32> to vector<8x512xf32>
    %cst_104 = arith.constant dense<0.000000e+00> : vector<8x512xf32>
    %282 = tpu.matmul %278, %269, %cst_104 {dimension_numbers = #tpu.dot_dimension_numbers<[1], [0], [0], [1], [0, 0, 1, 1], [], []>} : vector<8x128xf32>, vector<128x512xf32>, vector<8x512xf32> -> vector<8x512xf32>
    %283 = arith.addf %281, %282 : vector<8x512xf32>
    %284 = vector.extract_strided_slice %283 {offsets = [0, 0], sizes = [8, 128], strides = [1, 1]} : vector<8x512xf32> to vector<8x128xf32>
    %285 = arith.negf %284 : vector<8x128xf32>
    %286 = math.exp %285 : vector<8x128xf32>
    %cst_105 = arith.constant 1.000000e+00 : f32
    %287 = vector.broadcast %cst_105 : f32 to vector<8x128xf32>
    %288 = arith.addf %287, %286 : vector<8x128xf32>
    %289 = arith.divf %287, %288 : vector<8x128xf32>
    %290 = vector.extract_strided_slice %283 {offsets = [0, 128], sizes = [8, 128], strides = [1, 1]} : vector<8x512xf32> to vector<8x128xf32>
    %291 = arith.negf %290 : vector<8x128xf32>
    %292 = math.exp %291 : vector<8x128xf32>
    %cst_106 = arith.constant 1.000000e+00 : f32
    %293 = vector.broadcast %cst_106 : f32 to vector<8x128xf32>
    %294 = arith.addf %293, %292 : vector<8x128xf32>
    %295 = arith.divf %293, %294 : vector<8x128xf32>
    %296 = vector.extract_strided_slice %283 {offsets = [0, 256], sizes = [8, 128], strides = [1, 1]} : vector<8x512xf32> to vector<8x128xf32>
    %297 = math.tanh %296 : vector<8x128xf32>
    %298 = vector.extract_strided_slice %283 {offsets = [0, 384], sizes = [8, 128], strides = [1, 1]} : vector<8x512xf32> to vector<8x128xf32>
    %299 = arith.negf %298 : vector<8x128xf32>
    %300 = math.exp %299 : vector<8x128xf32>
    %cst_107 = arith.constant 1.000000e+00 : f32
    %301 = vector.broadcast %cst_107 : f32 to vector<8x128xf32>
    %302 = arith.addf %301, %300 : vector<8x128xf32>
    %303 = arith.divf %301, %302 : vector<8x128xf32>
    %304 = arith.mulf %295, %279 : vector<8x128xf32>
    %305 = arith.mulf %289, %297 : vector<8x128xf32>
    %306 = arith.addf %304, %305 : vector<8x128xf32>
    %307 = math.tanh %306 : vector<8x128xf32>
    %308 = arith.mulf %303, %307 : vector<8x128xf32>
    %c0_108 = arith.constant 0 : index
    %c0_109 = arith.constant 0 : index
    %c0_110 = arith.constant 0 : index
    %309 = vector.load %arg10[%c0_108, %c0_109, %c0_110] : memref<8x8x128xf32, #tpu.memory_space<vmem>>, vector<1x8x128xf32>
    %310 = vector.shape_cast %309 : vector<1x8x128xf32> to vector<8x128xf32>
    %311 = vector.shape_cast %308 : vector<8x128xf32> to vector<1x8x128xf32>
    tpu.vector_store %arg10[%c0_108, %c0_109, %c0_110], %311 {strides = array<i32>} : memref<8x8x128xf32, #tpu.memory_space<vmem>>, vector<1x8x128xf32>,
    %c1_111 = arith.constant 1 : index
    %c0_112 = arith.constant 0 : index
    %c0_113 = arith.constant 0 : index
    %312 = vector.load %arg11[%c1_111, %c0_112, %c0_113] : memref<8x8x512xf32, #tpu.memory_space<vmem>>, vector<1x8x512xf32>
    %313 = vector.shape_cast %312 : vector<1x8x512xf32> to vector<8x512xf32>
    %cst_114 = arith.constant dense<0.000000e+00> : vector<8x512xf32>
    %314 = tpu.matmul %308, %269, %cst_114 {dimension_numbers = #tpu.dot_dimension_numbers<[1], [0], [0], [1], [0, 0, 1, 1], [], []>} : vector<8x128xf32>, vector<128x512xf32>, vector<8x512xf32> -> vector<8x512xf32>
    %315 = arith.addf %313, %314 : vector<8x512xf32>
    %316 = vector.extract_strided_slice %315 {offsets = [0, 0], sizes = [8, 128], strides = [1, 1]} : vector<8x512xf32> to vector<8x128xf32>
    %317 = arith.negf %316 : vector<8x128xf32>
    %318 = math.exp %317 : vector<8x128xf32>
    %cst_115 = arith.constant 1.000000e+00 : f32
    %319 = vector.broadcast %cst_115 : f32 to vector<8x128xf32>
    %320 = arith.addf %319, %318 : vector<8x128xf32>
    %321 = arith.divf %319, %320 : vector<8x128xf32>
    %322 = vector.extract_strided_slice %315 {offsets = [0, 128], sizes = [8, 128], strides = [1, 1]} : vector<8x512xf32> to vector<8x128xf32>
    %323 = arith.negf %322 : vector<8x128xf32>
    %324 = math.exp %323 : vector<8x128xf32>
    %cst_116 = arith.constant 1.000000e+00 : f32
    %325 = vector.broadcast %cst_116 : f32 to vector<8x128xf32>
    %326 = arith.addf %325, %324 : vector<8x128xf32>
    %327 = arith.divf %325, %326 : vector<8x128xf32>
    %328 = vector.extract_strided_slice %315 {offsets = [0, 256], sizes = [8, 128], strides = [1, 1]} : vector<8x512xf32> to vector<8x128xf32>
    %329 = math.tanh %328 : vector<8x128xf32>
    %330 = vector.extract_strided_slice %315 {offsets = [0, 384], sizes = [8, 128], strides = [1, 1]} : vector<8x512xf32> to vector<8x128xf32>
    %331 = arith.negf %330 : vector<8x128xf32>
    %332 = math.exp %331 : vector<8x128xf32>
    %cst_117 = arith.constant 1.000000e+00 : f32
    %333 = vector.broadcast %cst_117 : f32 to vector<8x128xf32>
    %334 = arith.addf %333, %332 : vector<8x128xf32>
    %335 = arith.divf %333, %334 : vector<8x128xf32>
    %336 = arith.mulf %327, %306 : vector<8x128xf32>
    %337 = arith.mulf %321, %329 : vector<8x128xf32>
    %338 = arith.addf %336, %337 : vector<8x128xf32>
    %339 = math.tanh %338 : vector<8x128xf32>
    %340 = arith.mulf %335, %339 : vector<8x128xf32>
    %c1_118 = arith.constant 1 : index
    %c0_119 = arith.constant 0 : index
    %c0_120 = arith.constant 0 : index
    %341 = vector.load %arg10[%c1_118, %c0_119, %c0_120] : memref<8x8x128xf32, #tpu.memory_space<vmem>>, vector<1x8x128xf32>
    %342 = vector.shape_cast %341 : vector<1x8x128xf32> to vector<8x128xf32>
    %343 = vector.shape_cast %340 : vector<8x128xf32> to vector<1x8x128xf32>
    tpu.vector_store %arg10[%c1_118, %c0_119, %c0_120], %343 {strides = array<i32>} : memref<8x8x128xf32, #tpu.memory_space<vmem>>, vector<1x8x128xf32>,
    %c2_121 = arith.constant 2 : index
    %c0_122 = arith.constant 0 : index
    %c0_123 = arith.constant 0 : index
    %344 = vector.load %arg11[%c2_121, %c0_122, %c0_123] : memref<8x8x512xf32, #tpu.memory_space<vmem>>, vector<1x8x512xf32>
    %345 = vector.shape_cast %344 : vector<1x8x512xf32> to vector<8x512xf32>
    %cst_124 = arith.constant dense<0.000000e+00> : vector<8x512xf32>
    %346 = tpu.matmul %340, %269, %cst_124 {dimension_numbers = #tpu.dot_dimension_numbers<[1], [0], [0], [1], [0, 0, 1, 1], [], []>} : vector<8x128xf32>, vector<128x512xf32>, vector<8x512xf32> -> vector<8x512xf32>
    %347 = arith.addf %345, %346 : vector<8x512xf32>
    %348 = vector.extract_strided_slice %347 {offsets = [0, 0], sizes = [8, 128], strides = [1, 1]} : vector<8x512xf32> to vector<8x128xf32>
    %349 = arith.negf %348 : vector<8x128xf32>
    %350 = math.exp %349 : vector<8x128xf32>
    %cst_125 = arith.constant 1.000000e+00 : f32
    %351 = vector.broadcast %cst_125 : f32 to vector<8x128xf32>
    %352 = arith.addf %351, %350 : vector<8x128xf32>
    %353 = arith.divf %351, %352 : vector<8x128xf32>
    %354 = vector.extract_strided_slice %347 {offsets = [0, 128], sizes = [8, 128], strides = [1, 1]} : vector<8x512xf32> to vector<8x128xf32>
    %355 = arith.negf %354 : vector<8x128xf32>
    %356 = math.exp %355 : vector<8x128xf32>
    %cst_126 = arith.constant 1.000000e+00 : f32
    %357 = vector.broadcast %cst_126 : f32 to vector<8x128xf32>
    %358 = arith.addf %357, %356 : vector<8x128xf32>
    %359 = arith.divf %357, %358 : vector<8x128xf32>
    %360 = vector.extract_strided_slice %347 {offsets = [0, 256], sizes = [8, 128], strides = [1, 1]} : vector<8x512xf32> to vector<8x128xf32>
    %361 = math.tanh %360 : vector<8x128xf32>
    %362 = vector.extract_strided_slice %347 {offsets = [0, 384], sizes = [8, 128], strides = [1, 1]} : vector<8x512xf32> to vector<8x128xf32>
    %363 = arith.negf %362 : vector<8x128xf32>
    %364 = math.exp %363 : vector<8x128xf32>
    %cst_127 = arith.constant 1.000000e+00 : f32
    %365 = vector.broadcast %cst_127 : f32 to vector<8x128xf32>
    %366 = arith.addf %365, %364 : vector<8x128xf32>
    %367 = arith.divf %365, %366 : vector<8x128xf32>
    %368 = arith.mulf %359, %338 : vector<8x128xf32>
    %369 = arith.mulf %353, %361 : vector<8x128xf32>
    %370 = arith.addf %368, %369 : vector<8x128xf32>
    %371 = math.tanh %370 : vector<8x128xf32>
    %372 = arith.mulf %367, %371 : vector<8x128xf32>
    %c2_128 = arith.constant 2 : index
    %c0_129 = arith.constant 0 : index
    %c0_130 = arith.constant 0 : index
    %373 = vector.load %arg10[%c2_128, %c0_129, %c0_130] : memref<8x8x128xf32, #tpu.memory_space<vmem>>, vector<1x8x128xf32>
    %374 = vector.shape_cast %373 : vector<1x8x128xf32> to vector<8x128xf32>
    %375 = vector.shape_cast %372 : vector<8x128xf32> to vector<1x8x128xf32>
    tpu.vector_store %arg10[%c2_128, %c0_129, %c0_130], %375 {strides = array<i32>} : memref<8x8x128xf32, #tpu.memory_space<vmem>>, vector<1x8x128xf32>,
    %c3_131 = arith.constant 3 : index
    %c0_132 = arith.constant 0 : index
    %c0_133 = arith.constant 0 : index
    %376 = vector.load %arg11[%c3_131, %c0_132, %c0_133] : memref<8x8x512xf32, #tpu.memory_space<vmem>>, vector<1x8x512xf32>
    %377 = vector.shape_cast %376 : vector<1x8x512xf32> to vector<8x512xf32>
    %cst_134 = arith.constant dense<0.000000e+00> : vector<8x512xf32>
    %378 = tpu.matmul %372, %269, %cst_134 {dimension_numbers = #tpu.dot_dimension_numbers<[1], [0], [0], [1], [0, 0, 1, 1], [], []>} : vector<8x128xf32>, vector<128x512xf32>, vector<8x512xf32> -> vector<8x512xf32>
    %379 = arith.addf %377, %378 : vector<8x512xf32>
    %380 = vector.extract_strided_slice %379 {offsets = [0, 0], sizes = [8, 128], strides = [1, 1]} : vector<8x512xf32> to vector<8x128xf32>
    %381 = arith.negf %380 : vector<8x128xf32>
    %382 = math.exp %381 : vector<8x128xf32>
    %cst_135 = arith.constant 1.000000e+00 : f32
    %383 = vector.broadcast %cst_135 : f32 to vector<8x128xf32>
    %384 = arith.addf %383, %382 : vector<8x128xf32>
    %385 = arith.divf %383, %384 : vector<8x128xf32>
    %386 = vector.extract_strided_slice %379 {offsets = [0, 128], sizes = [8, 128], strides = [1, 1]} : vector<8x512xf32> to vector<8x128xf32>
    %387 = arith.negf %386 : vector<8x128xf32>
    %388 = math.exp %387 : vector<8x128xf32>
    %cst_136 = arith.constant 1.000000e+00 : f32
    %389 = vector.broadcast %cst_136 : f32 to vector<8x128xf32>
    %390 = arith.addf %389, %388 : vector<8x128xf32>
    %391 = arith.divf %389, %390 : vector<8x128xf32>
    %392 = vector.extract_strided_slice %379 {offsets = [0, 256], sizes = [8, 128], strides = [1, 1]} : vector<8x512xf32> to vector<8x128xf32>
    %393 = math.tanh %392 : vector<8x128xf32>
    %394 = vector.extract_strided_slice %379 {offsets = [0, 384], sizes = [8, 128], strides = [1, 1]} : vector<8x512xf32> to vector<8x128xf32>
    %395 = arith.negf %394 : vector<8x128xf32>
    %396 = math.exp %395 : vector<8x128xf32>
    %cst_137 = arith.constant 1.000000e+00 : f32
    %397 = vector.broadcast %cst_137 : f32 to vector<8x128xf32>
    %398 = arith.addf %397, %396 : vector<8x128xf32>
    %399 = arith.divf %397, %398 : vector<8x128xf32>
    %400 = arith.mulf %391, %370 : vector<8x128xf32>
    %401 = arith.mulf %385, %393 : vector<8x128xf32>
    %402 = arith.addf %400, %401 : vector<8x128xf32>
    %403 = math.tanh %402 : vector<8x128xf32>
    %404 = arith.mulf %399, %403 : vector<8x128xf32>
    %c3_138 = arith.constant 3 : index
    %c0_139 = arith.constant 0 : index
    %c0_140 = arith.constant 0 : index
    %405 = vector.load %arg10[%c3_138, %c0_139, %c0_140] : memref<8x8x128xf32, #tpu.memory_space<vmem>>, vector<1x8x128xf32>
    %406 = vector.shape_cast %405 : vector<1x8x128xf32> to vector<8x128xf32>
    %407 = vector.shape_cast %404 : vector<8x128xf32> to vector<1x8x128xf32>
    tpu.vector_store %arg10[%c3_138, %c0_139, %c0_140], %407 {strides = array<i32>} : memref<8x8x128xf32, #tpu.memory_space<vmem>>, vector<1x8x128xf32>,
    %c4_141 = arith.constant 4 : index
    %c0_142 = arith.constant 0 : index
    %c0_143 = arith.constant 0 : index
    %408 = vector.load %arg11[%c4_141, %c0_142, %c0_143] : memref<8x8x512xf32, #tpu.memory_space<vmem>>, vector<1x8x512xf32>
    %409 = vector.shape_cast %408 : vector<1x8x512xf32> to vector<8x512xf32>
    %cst_144 = arith.constant dense<0.000000e+00> : vector<8x512xf32>
    %410 = tpu.matmul %404, %269, %cst_144 {dimension_numbers = #tpu.dot_dimension_numbers<[1], [0], [0], [1], [0, 0, 1, 1], [], []>} : vector<8x128xf32>, vector<128x512xf32>, vector<8x512xf32> -> vector<8x512xf32>
    %411 = arith.addf %409, %410 : vector<8x512xf32>
    %412 = vector.extract_strided_slice %411 {offsets = [0, 0], sizes = [8, 128], strides = [1, 1]} : vector<8x512xf32> to vector<8x128xf32>
    %413 = arith.negf %412 : vector<8x128xf32>
    %414 = math.exp %413 : vector<8x128xf32>
    %cst_145 = arith.constant 1.000000e+00 : f32
    %415 = vector.broadcast %cst_145 : f32 to vector<8x128xf32>
    %416 = arith.addf %415, %414 : vector<8x128xf32>
    %417 = arith.divf %415, %416 : vector<8x128xf32>
    %418 = vector.extract_strided_slice %411 {offsets = [0, 128], sizes = [8, 128], strides = [1, 1]} : vector<8x512xf32> to vector<8x128xf32>
    %419 = arith.negf %418 : vector<8x128xf32>
    %420 = math.exp %419 : vector<8x128xf32>
    %cst_146 = arith.constant 1.000000e+00 : f32
    %421 = vector.broadcast %cst_146 : f32 to vector<8x128xf32>
    %422 = arith.addf %421, %420 : vector<8x128xf32>
    %423 = arith.divf %421, %422 : vector<8x128xf32>
    %424 = vector.extract_strided_slice %411 {offsets = [0, 256], sizes = [8, 128], strides = [1, 1]} : vector<8x512xf32> to vector<8x128xf32>
    %425 = math.tanh %424 : vector<8x128xf32>
    %426 = vector.extract_strided_slice %411 {offsets = [0, 384], sizes = [8, 128], strides = [1, 1]} : vector<8x512xf32> to vector<8x128xf32>
    %427 = arith.negf %426 : vector<8x128xf32>
    %428 = math.exp %427 : vector<8x128xf32>
    %cst_147 = arith.constant 1.000000e+00 : f32
    %429 = vector.broadcast %cst_147 : f32 to vector<8x128xf32>
    %430 = arith.addf %429, %428 : vector<8x128xf32>
    %431 = arith.divf %429, %430 : vector<8x128xf32>
    %432 = arith.mulf %423, %402 : vector<8x128xf32>
    %433 = arith.mulf %417, %425 : vector<8x128xf32>
    %434 = arith.addf %432, %433 : vector<8x128xf32>
    %435 = math.tanh %434 : vector<8x128xf32>
    %436 = arith.mulf %431, %435 : vector<8x128xf32>
    %c4_148 = arith.constant 4 : index
    %c0_149 = arith.constant 0 : index
    %c0_150 = arith.constant 0 : index
    %437 = vector.load %arg10[%c4_148, %c0_149, %c0_150] : memref<8x8x128xf32, #tpu.memory_space<vmem>>, vector<1x8x128xf32>
    %438 = vector.shape_cast %437 : vector<1x8x128xf32> to vector<8x128xf32>
    %439 = vector.shape_cast %436 : vector<8x128xf32> to vector<1x8x128xf32>
    tpu.vector_store %arg10[%c4_148, %c0_149, %c0_150], %439 {strides = array<i32>} : memref<8x8x128xf32, #tpu.memory_space<vmem>>, vector<1x8x128xf32>,
    %c5_151 = arith.constant 5 : index
    %c0_152 = arith.constant 0 : index
    %c0_153 = arith.constant 0 : index
    %440 = vector.load %arg11[%c5_151, %c0_152, %c0_153] : memref<8x8x512xf32, #tpu.memory_space<vmem>>, vector<1x8x512xf32>
    %441 = vector.shape_cast %440 : vector<1x8x512xf32> to vector<8x512xf32>
    %cst_154 = arith.constant dense<0.000000e+00> : vector<8x512xf32>
    %442 = tpu.matmul %436, %269, %cst_154 {dimension_numbers = #tpu.dot_dimension_numbers<[1], [0], [0], [1], [0, 0, 1, 1], [], []>} : vector<8x128xf32>, vector<128x512xf32>, vector<8x512xf32> -> vector<8x512xf32>
    %443 = arith.addf %441, %442 : vector<8x512xf32>
    %444 = vector.extract_strided_slice %443 {offsets = [0, 0], sizes = [8, 128], strides = [1, 1]} : vector<8x512xf32> to vector<8x128xf32>
    %445 = arith.negf %444 : vector<8x128xf32>
    %446 = math.exp %445 : vector<8x128xf32>
    %cst_155 = arith.constant 1.000000e+00 : f32
    %447 = vector.broadcast %cst_155 : f32 to vector<8x128xf32>
    %448 = arith.addf %447, %446 : vector<8x128xf32>
    %449 = arith.divf %447, %448 : vector<8x128xf32>
    %450 = vector.extract_strided_slice %443 {offsets = [0, 128], sizes = [8, 128], strides = [1, 1]} : vector<8x512xf32> to vector<8x128xf32>
    %451 = arith.negf %450 : vector<8x128xf32>
    %452 = math.exp %451 : vector<8x128xf32>
    %cst_156 = arith.constant 1.000000e+00 : f32
    %453 = vector.broadcast %cst_156 : f32 to vector<8x128xf32>
    %454 = arith.addf %453, %452 : vector<8x128xf32>
    %455 = arith.divf %453, %454 : vector<8x128xf32>
    %456 = vector.extract_strided_slice %443 {offsets = [0, 256], sizes = [8, 128], strides = [1, 1]} : vector<8x512xf32> to vector<8x128xf32>
    %457 = math.tanh %456 : vector<8x128xf32>
    %458 = vector.extract_strided_slice %443 {offsets = [0, 384], sizes = [8, 128], strides = [1, 1]} : vector<8x512xf32> to vector<8x128xf32>
    %459 = arith.negf %458 : vector<8x128xf32>
    %460 = math.exp %459 : vector<8x128xf32>
    %cst_157 = arith.constant 1.000000e+00 : f32
    %461 = vector.broadcast %cst_157 : f32 to vector<8x128xf32>
    %462 = arith.addf %461, %460 : vector<8x128xf32>
    %463 = arith.divf %461, %462 : vector<8x128xf32>
    %464 = arith.mulf %455, %434 : vector<8x128xf32>
    %465 = arith.mulf %449, %457 : vector<8x128xf32>
    %466 = arith.addf %464, %465 : vector<8x128xf32>
    %467 = math.tanh %466 : vector<8x128xf32>
    %468 = arith.mulf %463, %467 : vector<8x128xf32>
    %c5_158 = arith.constant 5 : index
    %c0_159 = arith.constant 0 : index
    %c0_160 = arith.constant 0 : index
    %469 = vector.load %arg10[%c5_158, %c0_159, %c0_160] : memref<8x8x128xf32, #tpu.memory_space<vmem>>, vector<1x8x128xf32>
    %470 = vector.shape_cast %469 : vector<1x8x128xf32> to vector<8x128xf32>
    %471 = vector.shape_cast %468 : vector<8x128xf32> to vector<1x8x128xf32>
    tpu.vector_store %arg10[%c5_158, %c0_159, %c0_160], %471 {strides = array<i32>} : memref<8x8x128xf32, #tpu.memory_space<vmem>>, vector<1x8x128xf32>,
    %c6_161 = arith.constant 6 : index
    %c0_162 = arith.constant 0 : index
    %c0_163 = arith.constant 0 : index
    %472 = vector.load %arg11[%c6_161, %c0_162, %c0_163] : memref<8x8x512xf32, #tpu.memory_space<vmem>>, vector<1x8x512xf32>
    %473 = vector.shape_cast %472 : vector<1x8x512xf32> to vector<8x512xf32>
    %cst_164 = arith.constant dense<0.000000e+00> : vector<8x512xf32>
    %474 = tpu.matmul %468, %269, %cst_164 {dimension_numbers = #tpu.dot_dimension_numbers<[1], [0], [0], [1], [0, 0, 1, 1], [], []>} : vector<8x128xf32>, vector<128x512xf32>, vector<8x512xf32> -> vector<8x512xf32>
    %475 = arith.addf %473, %474 : vector<8x512xf32>
    %476 = vector.extract_strided_slice %475 {offsets = [0, 0], sizes = [8, 128], strides = [1, 1]} : vector<8x512xf32> to vector<8x128xf32>
    %477 = arith.negf %476 : vector<8x128xf32>
    %478 = math.exp %477 : vector<8x128xf32>
    %cst_165 = arith.constant 1.000000e+00 : f32
    %479 = vector.broadcast %cst_165 : f32 to vector<8x128xf32>
    %480 = arith.addf %479, %478 : vector<8x128xf32>
    %481 = arith.divf %479, %480 : vector<8x128xf32>
    %482 = vector.extract_strided_slice %475 {offsets = [0, 128], sizes = [8, 128], strides = [1, 1]} : vector<8x512xf32> to vector<8x128xf32>
    %483 = arith.negf %482 : vector<8x128xf32>
    %484 = math.exp %483 : vector<8x128xf32>
    %cst_166 = arith.constant 1.000000e+00 : f32
    %485 = vector.broadcast %cst_166 : f32 to vector<8x128xf32>
    %486 = arith.addf %485, %484 : vector<8x128xf32>
    %487 = arith.divf %485, %486 : vector<8x128xf32>
    %488 = vector.extract_strided_slice %475 {offsets = [0, 256], sizes = [8, 128], strides = [1, 1]} : vector<8x512xf32> to vector<8x128xf32>
    %489 = math.tanh %488 : vector<8x128xf32>
    %490 = vector.extract_strided_slice %475 {offsets = [0, 384], sizes = [8, 128], strides = [1, 1]} : vector<8x512xf32> to vector<8x128xf32>
    %491 = arith.negf %490 : vector<8x128xf32>
    %492 = math.exp %491 : vector<8x128xf32>
    %cst_167 = arith.constant 1.000000e+00 : f32
    %493 = vector.broadcast %cst_167 : f32 to vector<8x128xf32>
    %494 = arith.addf %493, %492 : vector<8x128xf32>
    %495 = arith.divf %493, %494 : vector<8x128xf32>
    %496 = arith.mulf %487, %466 : vector<8x128xf32>
    %497 = arith.mulf %481, %489 : vector<8x128xf32>
    %498 = arith.addf %496, %497 : vector<8x128xf32>
    %499 = math.tanh %498 : vector<8x128xf32>
    %500 = arith.mulf %495, %499 : vector<8x128xf32>
    %c6_168 = arith.constant 6 : index
    %c0_169 = arith.constant 0 : index
    %c0_170 = arith.constant 0 : index
    %501 = vector.load %arg10[%c6_168, %c0_169, %c0_170] : memref<8x8x128xf32, #tpu.memory_space<vmem>>, vector<1x8x128xf32>
    %502 = vector.shape_cast %501 : vector<1x8x128xf32> to vector<8x128xf32>
    %503 = vector.shape_cast %500 : vector<8x128xf32> to vector<1x8x128xf32>
    tpu.vector_store %arg10[%c6_168, %c0_169, %c0_170], %503 {strides = array<i32>} : memref<8x8x128xf32, #tpu.memory_space<vmem>>, vector<1x8x128xf32>,
    %c7_171 = arith.constant 7 : index
    %c0_172 = arith.constant 0 : index
    %c0_173 = arith.constant 0 : index
    %504 = vector.load %arg11[%c7_171, %c0_172, %c0_173] : memref<8x8x512xf32, #tpu.memory_space<vmem>>, vector<1x8x512xf32>
    %505 = vector.shape_cast %504 : vector<1x8x512xf32> to vector<8x512xf32>
    %cst_174 = arith.constant dense<0.000000e+00> : vector<8x512xf32>
    %506 = tpu.matmul %500, %269, %cst_174 {dimension_numbers = #tpu.dot_dimension_numbers<[1], [0], [0], [1], [0, 0, 1, 1], [], []>} : vector<8x128xf32>, vector<128x512xf32>, vector<8x512xf32> -> vector<8x512xf32>
    %507 = arith.addf %505, %506 : vector<8x512xf32>
    %508 = vector.extract_strided_slice %507 {offsets = [0, 0], sizes = [8, 128], strides = [1, 1]} : vector<8x512xf32> to vector<8x128xf32>
    %509 = arith.negf %508 : vector<8x128xf32>
    %510 = math.exp %509 : vector<8x128xf32>
    %cst_175 = arith.constant 1.000000e+00 : f32
    %511 = vector.broadcast %cst_175 : f32 to vector<8x128xf32>
    %512 = arith.addf %511, %510 : vector<8x128xf32>
    %513 = arith.divf %511, %512 : vector<8x128xf32>
    %514 = vector.extract_strided_slice %507 {offsets = [0, 128], sizes = [8, 128], strides = [1, 1]} : vector<8x512xf32> to vector<8x128xf32>
    %515 = arith.negf %514 : vector<8x128xf32>
    %516 = math.exp %515 : vector<8x128xf32>
    %cst_176 = arith.constant 1.000000e+00 : f32
    %517 = vector.broadcast %cst_176 : f32 to vector<8x128xf32>
    %518 = arith.addf %517, %516 : vector<8x128xf32>
    %519 = arith.divf %517, %518 : vector<8x128xf32>
    %520 = vector.extract_strided_slice %507 {offsets = [0, 256], sizes = [8, 128], strides = [1, 1]} : vector<8x512xf32> to vector<8x128xf32>
    %521 = math.tanh %520 : vector<8x128xf32>
    %522 = vector.extract_strided_slice %507 {offsets = [0, 384], sizes = [8, 128], strides = [1, 1]} : vector<8x512xf32> to vector<8x128xf32>
    %523 = arith.negf %522 : vector<8x128xf32>
    %524 = math.exp %523 : vector<8x128xf32>
    %cst_177 = arith.constant 1.000000e+00 : f32
    %525 = vector.broadcast %cst_177 : f32 to vector<8x128xf32>
    %526 = arith.addf %525, %524 : vector<8x128xf32>
    %527 = arith.divf %525, %526 : vector<8x128xf32>
    %528 = arith.mulf %519, %498 : vector<8x128xf32>
    %529 = arith.mulf %513, %521 : vector<8x128xf32>
    %530 = arith.addf %528, %529 : vector<8x128xf32>
    %531 = math.tanh %530 : vector<8x128xf32>
    %532 = arith.mulf %527, %531 : vector<8x128xf32>
    %c7_178 = arith.constant 7 : index
    %c0_179 = arith.constant 0 : index
    %c0_180 = arith.constant 0 : index
    %533 = vector.load %arg10[%c7_178, %c0_179, %c0_180] : memref<8x8x128xf32, #tpu.memory_space<vmem>>, vector<1x8x128xf32>
    %534 = vector.shape_cast %533 : vector<1x8x128xf32> to vector<8x128xf32>
    %535 = vector.shape_cast %532 : vector<8x128xf32> to vector<1x8x128xf32>
    tpu.vector_store %arg10[%c7_178, %c0_179, %c0_180], %535 {strides = array<i32>} : memref<8x8x128xf32, #tpu.memory_space<vmem>>, vector<1x8x128xf32>,
    %c0_181 = arith.constant 0 : index
    %c0_182 = arith.constant 0 : index
    %536 = vector.load %arg7[%c0_181, %c0_182] : memref<128x128xf32, #tpu.memory_space<vmem>>, vector<128x128xf32>
    %cst_183 = arith.constant dense<0.000000e+00> : vector<8x128xf32>
    %537 = tpu.matmul %532, %536, %cst_183 {dimension_numbers = #tpu.dot_dimension_numbers<[1], [0], [0], [1], [0, 0, 1, 1], [], []>} : vector<8x128xf32>, vector<128x128xf32>, vector<8x128xf32> -> vector<8x128xf32>
    %c0_184 = arith.constant 0 : index
    %c0_185 = arith.constant 0 : index
    %538 = vector.load %arg8[%c0_184, %c0_185] : memref<1x128xf32, #tpu.memory_space<vmem>>, vector<1x128xf32>
    %539 = vector.broadcast %538 : vector<1x128xf32> to vector<8x128xf32>
    %540 = arith.addf %537, %539 : vector<8x128xf32>
    %c0_186 = arith.constant 0 : index
    %c0_187 = arith.constant 0 : index
    %541 = vector.load %arg9[%c0_186, %c0_187] : memref<8x128xf32, #tpu.memory_space<vmem>>, vector<8x128xf32>
    tpu.vector_store %arg9[%c0_186, %c0_187], %540 {strides = array<i32>} : memref<8x128xf32, #tpu.memory_space<vmem>>, vector<8x128xf32>,
    return
  }
}

</mosaic_0001>

<bundles_post_ra>
// kernel: tpu_custom_call.1
= control target key start
LH: loop header
LB: loop body
LE: loop exit
PB: predicated region body
PF: predicated region fallthrough
CT: control target
= control target key end

     0   :  { %14 = vsyncpa [#allocation5], 0  ;;  %s6614_s0 = inlined_call_operand.hbm [shape: f32[8,8,16], index: 0, kind: input, shape index: {}]   ;;  %s6615_s1 = inlined_call_operand.hbm [shape: f32[16,512], index: 1, kind: input, shape index: {}]   ;;  %s6616_s2 = inlined_call_operand.hbm [shape: f32[128,512], index: 2, kind: input, shape index: {}]   ;;  %s6617_s3 = inlined_call_operand.vmem [shape: f32[1,512], index: 3, kind: input, shape index: {}]   ;;  %s6618_s4 = inlined_call_operand.hbm [shape: f32[128,512], index: 4, kind: input, shape index: {}]   ;;  %s6619_s5 = inlined_call_operand.hbm [shape: f32[128,512], index: 5, kind: input, shape index: {}]   ;;  %s6620_s6 = inlined_call_operand.vmem [shape: f32[1,512], index: 6, kind: input, shape index: {}]   ;;  %s6621_s7 = inlined_call_operand.hbm [shape: f32[128,128], index: 7, kind: input, shape index: {}]   ;;  %s6622_s8 = inlined_call_operand.vmem [shape: f32[1,128], index: 8, kind: input, shape index: {}]   ;;  %s6623_s9 = inlined_call_operand.hbm [shape: f32[8,128], index: 9, kind: output, shape index: {}]  }
   0x1   :  { %15 = vsyncpa [#allocation8], 0 }
   0x2   :  { %16 = vsyncpa [#allocation11], 0 }
   0x3   :  { %17 = vsyncpa [#allocation14], 0 }
   0x4   :  { %18 = vsyncpa [#allocation6], 0  ;;  %s4506_s30 = smov [#allocation7]  }
   0x5   :  { %s36_s10 = sshll.u32 %s4506_s30, 4  ;;  %s37_s10 = int_to_ptr.vmem [resolvable:$true] %s36_s10 }
   0x6   :  { %s4364_s11 = scalar_lea.vmem %s37_s10, 1024  ;;  %p4369_p1 = scmp.lt.s32.totalorder %s37_s10, %s37_s10 }
   0x7   :  { %p4365_p0 = scmp.ne.s32.totalorder %s37_s10, %s4364_s11  ;;  %p4370_p2 = scmp.lt.s32.totalorder %s4364_s11, %s4364_s11 }
   0x9   :  { %p4371_p3 = por %p4370_p2, %p4369_p1 }
   0xb   :  { %p4372_p4 = pnand %p4371_p3, %p4365_p0 }
   0xd   :  { %4375 = shalt.err (!%p4372_p4)
}
   0xe   :  { %s4507_s12 = smov 512   ;;  %s4508_s13 = smov 32  }
   0xf   :  { %42 = dma.hbm_to_vmem [thread:$0]  %s6615_s1, 1024, %s37_s10, [#allocation8], %s4507_s12, %s4507_s12, %s4508_s13  }
  0x10   :  { %s4509_s16 = smov [#allocation10]   ;;  %s4510_s18 = smov [#allocation4]  }
  0x11   :  { %s62_s17 = sshll.u32 %s4509_s16, 4  ;;  %s24_s19 = sshll.u32 %s4510_s18, 4  ;;  %s63_s17 = int_to_ptr.vmem [resolvable:$true] %s62_s17  ;;  %s25_s19 = int_to_ptr.vmem [resolvable:$true] %s24_s19 }
  0x12   :  { %s4384_s20 = scalar_lea.vmem %s63_s17, 8192  ;;  %p4389_p6 = scmp.lt.s32.totalorder %s63_s17, %s63_s17 }
  0x13   :  { %p4385_p5 = scmp.ne.s32.totalorder %s63_s17, %s4384_s20  ;;  %p4390_p7 = scmp.lt.s32.totalorder %s4384_s20, %s4384_s20 }
  0x15   :  { %p4391_p8 = por %p4390_p7, %p4389_p6 }
  0x17   :  { %p4392_p9 = pnand %p4391_p8, %p4385_p5 }
  0x19   :  { %4395 = shalt.err (!%p4392_p9)
}
  0x1a   :  { %68 = dma.hbm_to_vmem [thread:$0]  %s6618_s4, 8192, %s63_s17, [#allocation11], %s4507_s12, %s4507_s12, %s4508_s13  }
  0x1b   :  { %s4404_s1 = scalar_lea.vmem %s25_s19, 1024  ;;  %p4409_p11 = scmp.lt.s32.totalorder %s25_s19, %s25_s19 }
  0x1c   :  { %p4405_p10 = scmp.ne.s32.totalorder %s25_s19, %s4404_s1  ;;  %p4410_p12 = scmp.lt.s32.totalorder %s4404_s1, %s4404_s1 }
  0x1e   :  { %p4411_p13 = por %p4410_p12, %p4409_p11 }
  0x20   :  { %p4412_p0 = pnand %p4411_p13, %p4405_p10 }
  0x22   :  { %4415 = shalt.err (!%p4412_p0)
}
  0x23   :  { %s4511_s23 = smov 128   ;;  %s4512_s24 = smov 8  }
  0x24   :  { %30 = dma.hbm_to_vmem [thread:$0]  %s6614_s0, 1024, %s25_s19, [#allocation5], %s4511_s23, %s4511_s23, %s4512_s24  }
  0x25   :  { %s4513_s27 = smov [#allocation9]   ;;  %s4514_s4 = smov [#allocation12]  }
  0x26   :  { %s48_s28 = sshll.u32 %s4513_s27, 4  ;;  %s74_s29 = sshll.u32 %s4514_s4, 4  ;;  %s49_s28 = int_to_ptr.vmem [resolvable:$true] %s48_s28  ;;  %s75_s29 = int_to_ptr.vmem [resolvable:$true] %s74_s29 }
  0x27   :  { %s4424_s30 = scalar_lea.vmem %s49_s28, 8192  ;;  %p4429_p2 = scmp.lt.s32.totalorder %s49_s28, %s49_s28 }
  0x28   :  { %p4425_p1 = scmp.ne.s32.totalorder %s49_s28, %s4424_s30  ;;  %p4430_p3 = scmp.lt.s32.totalorder %s4424_s30, %s4424_s30 }
  0x2a   :  { %p4431_p4 = por %p4430_p3, %p4429_p2 }
  0x2c   :  { %p4432_p5 = pnand %p4431_p4, %p4425_p1 }
  0x2e   :  { %4435 = shalt.err (!%p4432_p5)
}
  0x2f   :  { %54 = dma.hbm_to_vmem [thread:$0]  %s6616_s2, 8192, %s49_s28, [#allocation8], %s4507_s12, %s4507_s12, %s4508_s13  }
  0x30   :  { %s4444_s0 = scalar_lea.vmem %s75_s29, 8192  ;;  %p4449_p7 = scmp.lt.s32.totalorder %s75_s29, %s75_s29 }
  0x31   :  { %p4445_p6 = scmp.ne.s32.totalorder %s75_s29, %s4444_s0  ;;  %p4450_p8 = scmp.lt.s32.totalorder %s4444_s0, %s4444_s0 }
  0x33   :  { %p4451_p9 = por %p4450_p8, %p4449_p7 }
  0x35   :  { %p4452_p10 = pnand %p4451_p9, %p4445_p6 }
  0x37   :  { %4455 = shalt.err (!%p4452_p10)
}
  0x38   :  { %80 = dma.hbm_to_vmem [thread:$0]  %s6619_s5, 8192, %s75_s29, [#allocation11], %s4507_s12, %s4507_s12, %s4508_s13  }
  0x39   :  { %s4515_s16 = smov [#allocation13]  }
  0x3a   :  { %s88_s17 = sshll.u32 %s4515_s16, 4  ;;  %s89_s17 = int_to_ptr.vmem [resolvable:$true] %s88_s17 }
  0x3b   :  { %s4464_s18 = scalar_lea.vmem %s89_s17, 2048  ;;  %p4469_p12 = scmp.lt.s32.totalorder %s89_s17, %s89_s17 }
  0x3c   :  { %p4465_p11 = scmp.ne.s32.totalorder %s89_s17, %s4464_s18  ;;  %p4470_p13 = scmp.lt.s32.totalorder %s4464_s18, %s4464_s18 }
  0x3e   :  { %p4471_p0 = por %p4470_p13, %p4469_p12 }
  0x40   :  { %p4472_p1 = pnand %p4471_p0, %p4465_p11 }
  0x42   :  { %4475 = shalt.err (!%p4472_p1)
}
  0x43   :  { %94 = dma.hbm_to_vmem [thread:$0]  %s6621_s7, 2048, %s89_s17, [#allocation14], %s4511_s23, %s4511_s23, %s4512_s24  }
  0x44   :  { %4496 = dma.done.wait [#allocation5], 1024  }
  0x45   :  { %4497 = vsyncadd [#allocation5], 4294966272 }
  0x46   :  { %4498 = dma.done.wait [#allocation8], 9216  }
  0x47   :  { %4499 = vsyncadd [#allocation8], 4294958080 }
  0x48   :  { %4500 = dma.done.wait [#allocation11], 16384  }
  0x49   :  { %4501 = vsyncadd [#allocation11], 4294950912 }
  0x4a   :  { %4502 = dma.done.wait [#allocation14], 2048  }
  0x4b   :  { %4503 = vsyncadd [#allocation14], 4294965248  ;;  %v6624_v0 = vmov 0.0   ;;  %v120_v1 = vld [vmem:[#allocation7 + $0x28] sm:$0xff]  ;;  %v122_v2 = vld [vmem:[#allocation7 + $0x38] sm:$0xff]  ;;  %vm217_vm0 = vcmask 130048  }
  0x4c   :  { %306 = vmatprep.mubr.f32.mxu0 %v6624_v0  ;;  %419 = vmatprep.mubr.f32.mxu1 %v6624_v0  ;;  %v119_v3 = vld [vmem:[#allocation7 + $0x20] sm:$0xff]  ;;  %v121_v4 = vld [vmem:[#allocation7 + $0x30] sm:$0xff]  ;;  %v116_v5 = vld [vmem:[#allocation7 + $0x8] sm:$0xff]  ;;  %vm4517_vm1 = vmmov 0   ;;  %s4518_s20 = smov [#allocation15]  }
  0x4d   :  { %270 = vmatprep.subr.mxu0 %v120_v1  ;;  %383 = vmatprep.subr.mxu1 %v122_v2  ;;  %v118_v6 = vld [vmem:[#allocation7 + $0x18] sm:$0xff]  ;;  %v115_v7 = vld [vmem:[#allocation7] sm:$0xff]  ;;  %v117_v8 = vld [vmem:[#allocation7 + $0x10] sm:$0xff]  ;;  %s3830_s21 = sshll.u32 %s4518_s20, 4  ;;  %s3831_s21 = int_to_ptr.vmem [resolvable:$true] %s3830_s21 }
  0x4e   :  { %271 = vmatpush1.msra.mxu0 %v119_v3  ;;  %384 = vmatpush1.msra.mxu1 %v121_v4  ;;  %v188_v9 = vld [vmem:[#allocation4] sm:$0xff]  ;;  %v4607_v10 = vld [vmem:[#allocation9 + $0x1e8] sm:$0xff]  ;;  %v4609_v11 = vld [vmem:[#allocation9 + $0x1f8] sm:$0xff]  ;;  %s4476_s22 = scalar_lea.vmem %s3831_s21, 128  ;;  %p4481_p3 = scmp.lt.s32.totalorder %s3831_s21, %s3831_s21 }
  0x4f   :  { %272 = vmatprep.subr.mxu0 %v116_v5  ;;  %385 = vmatprep.subr.mxu1 %v118_v6  ;;  %6830 = vst [vmem:[#allocation21_spill] sm:$0xff] %v4607_v10  ;;  %6831 = vst [vmem:[#allocation22_spill] sm:$0xff] %v4609_v11  ;;  %v4611_v12 = vld [vmem:[#allocation9 + $0x1e0] sm:$0xff]  ;;  %v4613_v13 = vld [vmem:[#allocation9 + $0x1f0] sm:$0xff]  ;;  %p4477_p2 = scmp.ne.s32.totalorder %s3831_s21, %s4476_s22  ;;  %p4482_p4 = scmp.lt.s32.totalorder %s4476_s22, %s4476_s22 }
  0x50   :  { %273 = vmatpush1.msra.mxu0 %v115_v7  ;;  %386 = vmatpush1.msra.mxu1 %v117_v8  ;;  %v4617_v14 = vld [vmem:[#allocation9 + $0x1c8] sm:$0xff]  ;;  %v4619_v15 = vld [vmem:[#allocation9 + $0x1d8] sm:$0xff]  ;;  %v4625_v16 = vld [vmem:[#allocation9 + $0x1c0] sm:$0xff] }
  0x51   :  { %3842 = vmatmul.mubr.msk.f32.vlgmr.msra.gmra.mxu0 %vm217_vm0, %v188_v9  ;;  %3850 = vmatmul.mubr.msk.f32.vlgmr.msra.gmra.mxu1 %vm217_vm0, %v188_v9  ;;  %v4627_v17 = vld [vmem:[#allocation9 + $0x1d0] sm:$0xff]  ;;  %v189_v18 = vld [vmem:[#allocation4 + $0x8] sm:$0xff]  ;;  %v4635_v20 = vld [vmem:[#allocation9 + $0x1b8] sm:$0xff]  ;;  %p4483_p5 = por %p4482_p4, %p4481_p3 }
  0x52   :  { %504 = vmatprep.subr.mxu0 %v4607_v10  ;;  %575 = vmatprep.subr.mxu1 %v4609_v11  ;;  %v4633_v19 = vld [vmem:[#allocation9 + $0x1a8] sm:$0xff]  ;;  %v4639_v21 = vld [vmem:[#allocation9 + $0x1a0] sm:$0xff]  ;;  %v4641_v22 = vld [vmem:[#allocation9 + $0x1b0] sm:$0xff] }
  0x53   :  { %505 = vmatpush1.msra.mxu0 %v4611_v12  ;;  %576 = vmatpush1.msra.mxu1 %v4613_v13  ;;  %v4645_v23 = vld [vmem:[#allocation9 + $0x188] sm:$0xff]  ;;  %v4647_v24 = vld [vmem:[#allocation9 + $0x198] sm:$0xff]  ;;  %v4653_v25 = vld [vmem:[#allocation9 + $0x180] sm:$0xff]  ;;  %p4484_p6 = pnand %p4483_p5, %p4477_p2 }
  0x54   :  { %506 = vmatprep.subr.mxu0 %v4617_v14  ;;  %577 = vmatprep.subr.mxu1 %v4619_v15  ;;  %v4655_v26 = vld [vmem:[#allocation9 + $0x190] sm:$0xff]  ;;  %v4661_v28 = vld [vmem:[#allocation9 + $0x168] sm:$0xff]  ;;  %v4663_v29 = vld [vmem:[#allocation9 + $0x178] sm:$0xff] }
  0x55   :  { %312 = vmatprep.mubr.f32.mxu0 %v6624_v0  ;;  %425 = vmatprep.mubr.f32.mxu1 %v6624_v0  ;;  %v190_v27 = vld [vmem:[#allocation4 + $0x10] sm:$0xff]  ;;  %v4667_v30 = vld [vmem:[#allocation9 + $0x160] sm:$0xff]  ;;  %v4673_v32 = vld [vmem:[#allocation9 + $0x148] sm:$0xff] }
  0x56   :  { %507 = vmatpush1.msra.mxu0 %v4625_v16  ;;  %578 = vmatpush1.msra.mxu1 %v4627_v17  ;;  %v4669_v31 = vld [vmem:[#allocation9 + $0x170] sm:$0xff]  ;;  %v4675_v33 = vld [vmem:[#allocation9 + $0x158] sm:$0xff]  ;;  %v4681_v34 = vld [vmem:[#allocation9 + $0x140] sm:$0xff] }
  0x57   :  { %3843 = vmatmul.mubr.msk.f32.gmra.mxu0 %vm217_vm0, %v189_v18  ;;  %3851 = vmatmul.mubr.msk.f32.gmra.mxu1 %vm217_vm0, %v189_v18  ;;  %v4683_v35 = vld [vmem:[#allocation9 + $0x150] sm:$0xff]  ;;  %v191_v36 = vld [vmem:[#allocation4 + $0x18] sm:$0xff]  ;;  %v4689_v37 = vld [vmem:[#allocation9 + $0x128] sm:$0xff] }
  0x58   :  { %508 = vmatprep.subr.mxu0 %v4633_v19  ;;  %579 = vmatprep.subr.mxu1 %v4635_v20  ;;  %v4691_v38 = vld [vmem:[#allocation9 + $0x138] sm:$0xff]  ;;  %v4695_v39 = vld [vmem:[#allocation9 + $0x120] sm:$0xff]  ;;  %v4697_v40 = vld [vmem:[#allocation9 + $0x130] sm:$0xff] }
  0x59   :  { %509 = vmatpush1.msra.mxu0 %v4639_v21  ;;  %580 = vmatpush1.msra.mxu1 %v4641_v22  ;;  %v4701_v41 = vld [vmem:[#allocation9 + $0x108] sm:$0xff]  ;;  %v4703_v42 = vld [vmem:[#allocation9 + $0x118] sm:$0xff]  ;;  %v4709_v43 = vld [vmem:[#allocation9 + $0x100] sm:$0xff] }
  0x5a   :  { %510 = vmatprep.subr.mxu0 %v4645_v23  ;;  %581 = vmatprep.subr.mxu1 %v4647_v24  ;;  %v4711_v44 = vld [vmem:[#allocation9 + $0x110] sm:$0xff]  ;;  %v192_v45 = vld [vmem:[#allocation4 + $0x20] sm:$0xff]  ;;  %v4717_v46 = vld [vmem:[#allocation9 + $0xe8] sm:$0xff] }
  0x5b   :  { %318 = vmatprep.mubr.f32.mxu0 %v6624_v0  ;;  %431 = vmatprep.mubr.f32.mxu1 %v6624_v0  ;;  %v4719_v47 = vld [vmem:[#allocation9 + $0xf8] sm:$0xff]  ;;  %v4723_v48 = vld [vmem:[#allocation9 + $0xe0] sm:$0xff]  ;;  %v4725_v49 = vld [vmem:[#allocation9 + $0xf0] sm:$0xff] }
  0x5c   :  { %511 = vmatpush1.msra.mxu0 %v4653_v25  ;;  %582 = vmatpush1.msra.mxu1 %v4655_v26  ;;  %v4729_v50 = vld [vmem:[#allocation9 + $0xc8] sm:$0xff]  ;;  %v4731_v51 = vld [vmem:[#allocation9 + $0xd8] sm:$0xff]  ;;  %v4737_v52 = vld [vmem:[#allocation9 + $0xc0] sm:$0xff] }
  0x5d   :  { %3844 = vmatmul.mubr.msk.f32.gmra.mxu0 %vm217_vm0, %v190_v27  ;;  %3852 = vmatmul.mubr.msk.f32.gmra.mxu1 %vm217_vm0, %v190_v27  ;;  %v4739_v53 = vld [vmem:[#allocation9 + $0xd0] sm:$0xff]  ;;  %v193_v54 = vld [vmem:[#allocation4 + $0x28] sm:$0xff]  ;;  %v4747_v56 = vld [vmem:[#allocation9 + $0xb8] sm:$0xff] }
  0x5e   :  { %512 = vmatprep.subr.mxu0 %v4661_v28  ;;  %583 = vmatprep.subr.mxu1 %v4663_v29  ;;  %v4745_v55 = vld [vmem:[#allocation9 + $0xa8] sm:$0xff]  ;;  %v4751_v57 = vld [vmem:[#allocation9 + $0xa0] sm:$0xff]  ;;  %v4753_v58 = vld [vmem:[#allocation9 + $0xb0] sm:$0xff] }
  0x5f   :  { %513 = vmatpush1.msra.mxu0 %v4667_v30  ;;  %584 = vmatpush1.msra.mxu1 %v4669_v31  ;;  %6832 = vst [vmem:[#allocation23_spill] sm:$0xff] %v4753_v58  ;;  %v4757_v59 = vld [vmem:[#allocation9 + $0x88] sm:$0xff]  ;;  %v4759_v60 = vld [vmem:[#allocation9 + $0x98] sm:$0xff]  ;;  %v4765_v61 = vld [vmem:[#allocation9 + $0x80] sm:$0xff] }
  0x60   :  { %514 = vmatprep.subr.mxu0 %v4673_v32  ;;  %585 = vmatprep.subr.mxu1 %v4675_v33  ;;  %6833 = vst [vmem:[#allocation24_spill] sm:$0xff] %v4757_v59  ;;  %6834 = vst [vmem:[#allocation25_spill] sm:$0xff] %v4759_v60  ;;  %v4767_v62 = vld [vmem:[#allocation9 + $0x90] sm:$0xff]  ;;  %v4773_v1 = vld [vmem:[#allocation9 + $0x68] sm:$0xff] }
  0x61   :  { %324 = vmatprep.mubr.f32.mxu0 %v6624_v0  ;;  %437 = vmatprep.mubr.f32.mxu1 %v6624_v0  ;;  %6835 = vst [vmem:[#allocation26_spill] sm:$0xff] %v4765_v61  ;;  %6836 = vst [vmem:[#allocation27_spill] sm:$0xff] %v4767_v62  ;;  %v194_v63 = vld [vmem:[#allocation4 + $0x30] sm:$0xff]  ;;  %v4775_v2 = vld [vmem:[#allocation9 + $0x78] sm:$0xff] }
  0x62   :  { %515 = vmatpush1.msra.mxu0 %v4681_v34  ;;  %586 = vmatpush1.msra.mxu1 %v4683_v35  ;;  %6837 = vst [vmem:[#allocation28_spill] sm:$0xff] %v4773_v1  ;;  %6838 = vst [vmem:[#allocation29_spill] sm:$0xff] %v4775_v2  ;;  %v4779_v3 = vld [vmem:[#allocation9 + $0x60] sm:$0xff]  ;;  %v4781_v4 = vld [vmem:[#allocation9 + $0x70] sm:$0xff] }
  0x63   :  { %3845 = vmatmul.mubr.msk.f32.gmra.mxu0 %vm217_vm0, %v191_v36  ;;  %3853 = vmatmul.mubr.msk.f32.gmra.mxu1 %vm217_vm0, %v191_v36  ;;  %6839 = vst [vmem:[#allocation30_spill] sm:$0xff] %v4779_v3  ;;  %6840 = vst [vmem:[#allocation31_spill] sm:$0xff] %v4781_v4  ;;  %v4785_v5 = vld [vmem:[#allocation9 + $0x48] sm:$0xff]  ;;  %v4787_v6 = vld [vmem:[#allocation9 + $0x58] sm:$0xff] }
  0x64   :  { %516 = vmatprep.subr.mxu0 %v4689_v37  ;;  %587 = vmatprep.subr.mxu1 %v4691_v38  ;;  %6841 = vst [vmem:[#allocation32_spill] sm:$0xff] %v4785_v5  ;;  %6842 = vst [vmem:[#allocation33_spill] sm:$0xff] %v4787_v6  ;;  %v4793_v7 = vld [vmem:[#allocation9 + $0x40] sm:$0xff]  ;;  %v4795_v8 = vld [vmem:[#allocation9 + $0x50] sm:$0xff] }
  0x65   :  { %517 = vmatpush1.msra.mxu0 %v4695_v39  ;;  %588 = vmatpush1.msra.mxu1 %v4697_v40  ;;  %6843 = vst [vmem:[#allocation34_spill] sm:$0xff] %v4793_v7  ;;  %6844 = vst [vmem:[#allocation35_spill] sm:$0xff] %v4795_v8  ;;  %v195_v9 = vld [vmem:[#allocation4 + $0x38] sm:$0xff]  ;;  %v4801_v18 = vld [vmem:[#allocation9 + $0x28] sm:$0xff] }
  0x66   :  { %518 = vmatprep.subr.mxu0 %v4701_v41  ;;  %589 = vmatprep.subr.mxu1 %v4703_v42  ;;  %6845 = vst [vmem:[#allocation36_spill] sm:$0xff] %v4801_v18  ;;  %v4803_v27 = vld [vmem:[#allocation9 + $0x38] sm:$0xff]  ;;  %v4807_v36 = vld [vmem:[#allocation9 + $0x20] sm:$0xff] }
  0x67   :  { %330 = vmatprep.mubr.f32.mxu0 %v6624_v0  ;;  %443 = vmatprep.mubr.f32.mxu1 %v6624_v0  ;;  %6846 = vst [vmem:[#allocation37_spill] sm:$0xff] %v4803_v27  ;;  %6847 = vst [vmem:[#allocation38_spill] sm:$0xff] %v4807_v36 }
  0x68   :  { %519 = vmatpush1.msra.mxu0 %v4709_v43  ;;  %590 = vmatpush1.msra.mxu1 %v4711_v44 }
  0x69   :  { %3846 = vmatmul.mubr.msk.f32.gmra.mxu0 %vm217_vm0, %v192_v45  ;;  %3854 = vmatmul.mubr.msk.f32.gmra.mxu1 %vm217_vm0, %v192_v45  ;;  %v4809_v45 = vld [vmem:[#allocation9 + $0x30] sm:$0xff] }
  0x6a   :  { %520 = vmatprep.subr.mxu0 %v4717_v46  ;;  %591 = vmatprep.subr.mxu1 %v4719_v47  ;;  %6848 = vst [vmem:[#allocation39_spill] sm:$0xff] %v4809_v45 }
  0x6b   :  { %521 = vmatpush1.msra.mxu0 %v4723_v48  ;;  %592 = vmatpush1.msra.mxu1 %v4725_v49 }
  0x6c   :  { %522 = vmatprep.subr.mxu0 %v4729_v50  ;;  %593 = vmatprep.subr.mxu1 %v4731_v51 }
  0x6d   :  { %336 = vmatprep.mubr.f32.mxu0 %v6624_v0  ;;  %449 = vmatprep.mubr.f32.mxu1 %v6624_v0 }
  0x6e   :  { %523 = vmatpush1.msra.mxu0 %v4737_v52  ;;  %594 = vmatpush1.msra.mxu1 %v4739_v53 }
  0x6f   :  { %3847 = vmatmul.mubr.msk.f32.gmra.mxu0 %vm217_vm0, %v193_v54  ;;  %3855 = vmatmul.mubr.msk.f32.gmra.mxu1 %vm217_vm0, %v193_v54  ;;  %v4813_v54 = vld [vmem:[#allocation9 + $0x8] sm:$0xff] }
  0x70   :  { %524 = vmatprep.subr.mxu0 %v4745_v55  ;;  %595 = vmatprep.subr.mxu1 %v4747_v56  ;;  %6849 = vst [vmem:[#allocation40_spill] sm:$0xff] %v4813_v54 }
  0x71   :  { %525 = vmatpush1.msra.mxu0 %v4751_v57  ;;  %596 = vmatpush1.msra.mxu1 %v4753_v58 }
  0x72   :  { %526 = vmatprep.subr.mxu0 %v4757_v59  ;;  %597 = vmatprep.subr.mxu1 %v4759_v60 }
  0x73   :  { %342 = vmatprep.mubr.f32.mxu0 %v6624_v0  ;;  %455 = vmatprep.mubr.f32.mxu1 %v6624_v0 }
  0x74   :  { %527 = vmatpush1.msra.mxu0 %v4765_v61  ;;  %598 = vmatpush1.msra.mxu1 %v4767_v62 }
  0x75   :  { %3848 = vmatmul.mubr.msk.f32.gmra.mxu0 %vm217_vm0, %v194_v63  ;;  %3856 = vmatmul.mubr.msk.f32.gmra.mxu1 %vm217_vm0, %v194_v63  ;;  %v4815_v63 = vld [vmem:[#allocation9 + $0x18] sm:$0xff] }
  0x76   :  { %528 = vmatprep.subr.mxu0 %v4773_v1  ;;  %599 = vmatprep.subr.mxu1 %v4775_v2  ;;  %6850 = vst [vmem:[#allocation41_spill] sm:$0xff] %v4815_v63 }
  0x77   :  { %529 = vmatpush1.msra.mxu0 %v4779_v3  ;;  %600 = vmatpush1.msra.mxu1 %v4781_v4 }
  0x78   :  { %530 = vmatprep.subr.mxu0 %v4785_v5  ;;  %601 = vmatprep.subr.mxu1 %v4787_v6 }
  0x79   :  { %348 = vmatprep.mubr.f32.mxu0 %v6624_v0  ;;  %461 = vmatprep.mubr.f32.mxu1 %v6624_v0  ;;  %v4819_v0 = vld [vmem:[#allocation9] sm:$0xff] }
  0x7a   :  { %531 = vmatpush1.msra.mxu0 %v4793_v7  ;;  %602 = vmatpush1.msra.mxu1 %v4795_v8  ;;  %6851 = vst [vmem:[#allocation42_spill] sm:$0xff] %v4819_v0  ;;  %v4823_v8 = vld [vmem:[#allocation9 + $0x10] sm:$0xff] }
  0x7b   :  { %3849 = vmatmul.mubr.msk.f32.gmra.mxu0 %vm217_vm0, %v195_v9  ;;  %3857 = vmatmul.mubr.msk.f32.gmra.mxu1 %vm217_vm0, %v195_v9  ;;  %6852 = vst [vmem:[#allocation43_spill] sm:$0xff] %v4823_v8  ;;  %v6853_v9 = vmov 0.0  }
  0x7c   :  { %532 = vmatprep.subr.mxu0 %v4801_v18  ;;  %603 = vmatprep.subr.mxu1 %v4803_v27 }
  0x7d   :  { %533 = vmatpush1.msra.mxu0 %v4807_v36  ;;  %604 = vmatpush1.msra.mxu1 %v4809_v45 }
  0x7e   :  { %534 = vmatprep.subr.mxu0 %v4813_v54  ;;  %605 = vmatprep.subr.mxu1 %v4815_v63 }
  0x7f   :  { %535 = vmatpush1.msra.mxu0 %v4819_v0  ;;  %568 = vmatprep.mubr.f32.mxu0 %v6853_v9 }
  0x80   :  { %606 = vmatpush1.msra.mxu1 %v4823_v8  ;;  %639 = vmatprep.mubr.f32.mxu1 %v6853_v9 }
  0x81   :  { %569 = vmatmul.mubr.f32.vlgmr.msra.gmra.mxu0 %v6853_v9  ;;  %640 = vmatmul.mubr.f32.vlgmr.msra.gmra.mxu1 %v6853_v9 }
  0x82   :  { %680 = vmatprep.subr.mxu0 %v4607_v10  ;;  %751 = vmatprep.subr.mxu1 %v4609_v11 }
  0x83   :  { %681 = vmatpush1.msra.mxu0 %v4611_v12  ;;  %752 = vmatpush1.msra.mxu1 %v4613_v13 }
  0x84   :  { %682 = vmatprep.subr.mxu0 %v4617_v14  ;;  %753 = vmatprep.subr.mxu1 %v4619_v15 }
  0x85   :  { %683 = vmatpush1.msra.mxu0 %v4625_v16  ;;  %754 = vmatpush1.msra.mxu1 %v4627_v17 }
  0x86   :  { %684 = vmatprep.subr.mxu0 %v4633_v19  ;;  %755 = vmatprep.subr.mxu1 %v4635_v20 }
  0x87   :  { %685 = vmatpush1.msra.mxu0 %v4639_v21  ;;  %756 = vmatpush1.msra.mxu1 %v4641_v22 }
  0x88   :  { %686 = vmatprep.subr.mxu0 %v4645_v23  ;;  %757 = vmatprep.subr.mxu1 %v4647_v24 }
  0x89   :  { %687 = vmatpush1.msra.mxu0 %v4653_v25  ;;  %758 = vmatpush1.msra.mxu1 %v4655_v26 }
  0x8a   :  { %688 = vmatprep.subr.mxu0 %v4661_v28  ;;  %759 = vmatprep.subr.mxu1 %v4663_v29 }
  0x8b   :  { %689 = vmatpush1.msra.mxu0 %v4667_v30  ;;  %760 = vmatpush1.msra.mxu1 %v4669_v31 }
  0x8c   :  { %690 = vmatprep.subr.mxu0 %v4673_v32  ;;  %761 = vmatprep.subr.mxu1 %v4675_v33 }
  0x8d   :  { %691 = vmatpush1.msra.mxu0 %v4681_v34  ;;  %762 = vmatpush1.msra.mxu1 %v4683_v35 }
  0x8e   :  { %692 = vmatprep.subr.mxu0 %v4689_v37  ;;  %763 = vmatprep.subr.mxu1 %v4691_v38 }
  0x8f   :  { %693 = vmatpush1.msra.mxu0 %v4695_v39  ;;  %764 = vmatpush1.msra.mxu1 %v4697_v40 }
  0x90   :  { %694 = vmatprep.subr.mxu0 %v4701_v41  ;;  %765 = vmatprep.subr.mxu1 %v4703_v42 }
  0x91   :  { %695 = vmatpush1.msra.mxu0 %v4709_v43  ;;  %766 = vmatpush1.msra.mxu1 %v4711_v44 }
  0x92   :  { %696 = vmatprep.subr.mxu0 %v4717_v46  ;;  %767 = vmatprep.subr.mxu1 %v4719_v47 }
  0x93   :  { %697 = vmatpush1.msra.mxu0 %v4723_v48  ;;  %768 = vmatpush1.msra.mxu1 %v4725_v49 }
  0x94   :  { %698 = vmatprep.subr.mxu0 %v4729_v50  ;;  %769 = vmatprep.subr.mxu1 %v4731_v51 }
  0x95   :  { %699 = vmatpush1.msra.mxu0 %v4737_v52  ;;  %770 = vmatpush1.msra.mxu1 %v4739_v53 }
  0x96   :  { %700 = vmatprep.subr.mxu0 %v4745_v55  ;;  %771 = vmatprep.subr.mxu1 %v4747_v56 }
  0x97   :  { %701 = vmatpush1.msra.mxu0 %v4751_v57  ;;  %772 = vmatpush1.msra.mxu1 %v4753_v58 }
  0x98   :  { %702 = vmatprep.subr.mxu0 %v4757_v59  ;;  %773 = vmatprep.subr.mxu1 %v4759_v60  ;;  %v6854_v59 = vld [vmem:[#allocation35_spill] sm:$0xff] }
  0x99   :  { %703 = vmatpush1.msra.mxu0 %v4765_v61  ;;  %774 = vmatpush1.msra.mxu1 %v4767_v62 }
  0x9a   :  { %704 = vmatprep.subr.mxu0 %v4773_v1  ;;  %775 = vmatprep.subr.mxu1 %v4775_v2 }
  0x9b   :  { %705 = vmatpush1.msra.mxu0 %v4779_v3  ;;  %776 = vmatpush1.msra.mxu1 %v4781_v4 }
  0x9c   :  { %706 = vmatprep.subr.mxu0 %v4785_v5  ;;  %777 = vmatprep.subr.mxu1 %v4787_v6 }
  0x9d   :  { %707 = vmatpush1.msra.mxu0 %v4793_v7  ;;  %778 = vmatpush1.msra.mxu1 %v6854_v59 }
  0x9e   :  { %708 = vmatprep.subr.mxu0 %v4801_v18  ;;  %779 = vmatprep.subr.mxu1 %v4803_v27  ;;  %v197_v27 = vlaneseq }
  0x9f   :  { %709 = vmatpush1.msra.mxu0 %v4807_v36  ;;  %780 = vmatpush1.msra.mxu1 %v4809_v45 }
  0xa0   :  { %710 = vmatprep.subr.mxu0 %v4813_v54  ;;  %781 = vmatprep.subr.mxu1 %v4815_v63  ;;  %v4901_v36 = vshrl.u32 %v197_v27, 7 }
  0xa1   :  { %711 = vmatpush1.msra.mxu0 %v4819_v0  ;;  %744 = vmatprep.mubr.f32.mxu0 %v6853_v9 }
  0xa2   :  { %782 = vmatpush1.msra.mxu1 %v4823_v8  ;;  %815 = vmatprep.mubr.f32.mxu1 %v6853_v9  ;;  %6855 = vst [vmem:[#allocation44_spill] sm:$0xff] %v4901_v36  ;;  %v6663_v63 = vsub.s32 0, %v4901_v36  ;;  %v6666_v0 = vsub.s32 2, %v4901_v36  ;;  %v187_v8 = vld [vmem:[%s6617_s3] sm:$0xf]  ;;  %v6674_v27 = vsub.s32 3, %v4901_v36 }
  0xa3   :  { %857 = vmatprep.subr.mxu0 %v4607_v10  ;;  %928 = vmatprep.subr.mxu1 %v4609_v11  ;;  %v6673_v11 = vsub.s32 1, %v4901_v36 }
  0xa4   :  { %v200_v18 = vrot.slane %v187_v8, %v6663_v63  ;;  %v4922_v59 = vrot.slane %v187_v8, %v6666_v0  ;;  %v4928_v4 = vrot.slane %v187_v8, %v6674_v27 }
  0xa5   :  { %v204_v5 = vrot.slane %v187_v8, %v6673_v11 }
 0x111   :  { %v4903_v45 = vpop.f32.mrf.mxu0  ;;  %v4905_v54 = vpop.f32.mrf.mxu1 }
 0x113   :  { %v4912_v9 = vpop.f32.mrf.mxu0  ;;  %v4914_v10 = vpop.f32.mrf.mxu1 }
 0x117   :  { %v314_v7 = vpop.f32.mrf.mxu0  ;;  %v427_v6 = vpop.f32.mrf.mxu1 }
 0x118   :  { %v4930_v3 = vadd.f32 %v314_v7, %v200_v18  ;;  %v4933_v2 = vadd.f32 %v427_v6, %v4922_v59 }
 0x119   :  { %v316_v1 = vpop.f32.mrf.mxu0  ;;  %v429_v63 = vpop.f32.mrf.mxu1 }
 0x11a   :  { %6856 = vst [vmem:[#allocation45_spill] sm:$0xff] %v4933_v2  ;;  %v4935_v62 = vadd.f32 %v316_v1, %v204_v5  ;;  %v4938_v0 = vadd.f32 %v429_v63, %v4928_v4 }
 0x11c   :  { %6857 = vst [vmem:[#allocation46_spill] sm:$0xff] %v4935_v62  ;;  %6858 = vst [vmem:[#allocation47_spill] sm:$0xff] %v4938_v0 }
 0x11d   :  { %v320_v61 = vpop.f32.mrf.mxu0  ;;  %v433_v60 = vpop.f32.mrf.mxu1 }
 0x11e   :  { %v4940_v58 = vadd.f32 %v320_v61, %v200_v18  ;;  %v4943_v11 = vadd.f32 %v433_v60, %v4922_v59 }
 0x11f   :  { %v322_v8 = vpop.f32.mrf.mxu0  ;;  %v435_v7 = vpop.f32.mrf.mxu1 }
 0x120   :  { %6859 = vst [vmem:[#allocation48_spill] sm:$0xff] %v4940_v58  ;;  %6860 = vst [vmem:[#allocation49_spill] sm:$0xff] %v4943_v11  ;;  %v4945_v27 = vadd.f32 %v322_v8, %v204_v5  ;;  %v4948_v6 = vadd.f32 %v435_v7, %v4928_v4 }
 0x122   :  { %6861 = vst [vmem:[#allocation50_spill] sm:$0xff] %v4945_v27  ;;  %6862 = vst [vmem:[#allocation51_spill] sm:$0xff] %v4948_v6 }
 0x123   :  { %v326_v36 = vpop.f32.mrf.mxu0  ;;  %v439_v1 = vpop.f32.mrf.mxu1 }
 0x124   :  { %v4950_v2 = vadd.f32 %v326_v36, %v200_v18  ;;  %v4953_v63 = vadd.f32 %v439_v1, %v4922_v59 }
 0x125   :  { %v328_v0 = vpop.f32.mrf.mxu0  ;;  %v441_v61 = vpop.f32.mrf.mxu1 }
 0x126   :  { %6863 = vst [vmem:[#allocation52_spill] sm:$0xff] %v4950_v2  ;;  %6864 = vst [vmem:[#allocation53_spill] sm:$0xff] %v4953_v63  ;;  %v4955_v58 = vadd.f32 %v328_v0, %v204_v5  ;;  %v4958_v60 = vadd.f32 %v441_v61, %v4928_v4 }
 0x128   :  { %6865 = vst [vmem:[#allocation54_spill] sm:$0xff] %v4955_v58  ;;  %6866 = vst [vmem:[#allocation55_spill] sm:$0xff] %v4958_v60 }
 0x129   :  { %v332_v11 = vpop.f32.mrf.mxu0  ;;  %v445_v8 = vpop.f32.mrf.mxu1 }
 0x12a   :  { %v4960_v27 = vadd.f32 %v332_v11, %v200_v18  ;;  %v4963_v7 = vadd.f32 %v445_v8, %v4922_v59 }
 0x12b   :  { %v334_v6 = vpop.f32.mrf.mxu0  ;;  %v447_v36 = vpop.f32.mrf.mxu1 }
 0x12c   :  { %6867 = vst [vmem:[#allocation56_spill] sm:$0xff] %v4960_v27  ;;  %6868 = vst [vmem:[#allocation57_spill] sm:$0xff] %v4963_v7  ;;  %v4965_v2 = vadd.f32 %v334_v6, %v204_v5  ;;  %v4968_v1 = vadd.f32 %v447_v36, %v4928_v4 }
 0x12e   :  { %6869 = vst [vmem:[#allocation58_spill] sm:$0xff] %v4965_v2  ;;  %6870 = vst [vmem:[#allocation59_spill] sm:$0xff] %v4968_v1 }
 0x12f   :  { %v338_v63 = vpop.f32.mrf.mxu0  ;;  %v451_v0 = vpop.f32.mrf.mxu1 }
 0x130   :  { %v4970_v58 = vadd.f32 %v338_v63, %v200_v18  ;;  %v4973_v61 = vadd.f32 %v451_v0, %v4922_v59 }
 0x131   :  { %v340_v60 = vpop.f32.mrf.mxu0  ;;  %v453_v11 = vpop.f32.mrf.mxu1 }
 0x132   :  { %6871 = vst [vmem:[#allocation60_spill] sm:$0xff] %v4970_v58  ;;  %6872 = vst [vmem:[#allocation61_spill] sm:$0xff] %v4973_v61  ;;  %v4975_v27 = vadd.f32 %v340_v60, %v204_v5  ;;  %v4978_v8 = vadd.f32 %v453_v11, %v4928_v4 }
 0x134   :  { %6873 = vst [vmem:[#allocation62_spill] sm:$0xff] %v4975_v27  ;;  %6874 = vst [vmem:[#allocation63_spill] sm:$0xff] %v4978_v8 }
 0x135   :  { %v344_v7 = vpop.f32.mrf.mxu0  ;;  %v457_v6 = vpop.f32.mrf.mxu1 }
 0x136   :  { %v4980_v2 = vadd.f32 %v344_v7, %v200_v18  ;;  %v4983_v36 = vadd.f32 %v457_v6, %v4922_v59 }
 0x137   :  { %v346_v1 = vpop.f32.mrf.mxu0  ;;  %v459_v63 = vpop.f32.mrf.mxu1 }
 0x138   :  { %6875 = vst [vmem:[#allocation64_spill] sm:$0xff] %v4980_v2  ;;  %6876 = vst [vmem:[#allocation65_spill] sm:$0xff] %v4983_v36  ;;  %v4985_v58 = vadd.f32 %v346_v1, %v204_v5  ;;  %v4988_v0 = vadd.f32 %v459_v63, %v4928_v4  ;;  %v309_v1 = vadd.f32 %v4903_v45, %v200_v18 }
 0x139   :  { %v311_v63 = vadd.f32 %v4912_v9, %v204_v5 }
 0x13a   :  { %6877 = vst [vmem:[#allocation66_spill] sm:$0xff] %v4985_v58  ;;  %6878 = vst [vmem:[#allocation67_spill] sm:$0xff] %v4988_v0 }
 0x13b   :  { %v350_v61 = vpop.f32.mrf.mxu0  ;;  %v463_v60 = vpop.f32.mrf.mxu1 }
 0x13c   :  { %v4990_v27 = vadd.f32 %v350_v61, %v200_v18  ;;  %v4993_v11 = vadd.f32 %v463_v60, %v4922_v59 }
 0x13d   :  { %v352_v8 = vpop.f32.mrf.mxu0  ;;  %v465_v7 = vpop.f32.mrf.mxu1 }
 0x13e   :  { %6879 = vst [vmem:[#allocation68_spill] sm:$0xff] %v4990_v27  ;;  %6880 = vst [vmem:[#allocation69_spill] sm:$0xff] %v4993_v11  ;;  %v4995_v2 = vadd.f32 %v352_v8, %v204_v5  ;;  %v4998_v6 = vadd.f32 %v465_v7, %v4928_v4  ;;  %v424_v8 = vadd.f32 %v4914_v10, %v4928_v4 }
 0x13f   :  { %v422_v7 = vadd.f32 %v4905_v54, %v4922_v59 }
 0x140   :  { %6881 = vst [vmem:[#allocation70_spill] sm:$0xff] %v4995_v2  ;;  %6882 = vst [vmem:[#allocation71_spill] sm:$0xff] %v4998_v6 }
 0x141   :  { %v570_v36 = vpop.f32.mrf.mxu0  ;;  %v641_v27 = vpop.f32.mrf.mxu1 }
 0x142   :  { %v646_v0 = vadd.f32 %v570_v36, %v309_v1  ;;  %v648_v6 = vadd.f32 %v641_v27, %v422_v7  ;;  %v6884_v27 = vld [vmem:[#allocation23_spill] sm:$0xff]  ;;  %v6889_v7 = vld [vmem:[#allocation28_spill] sm:$0xff] }
 0x143   :  { %v572_v58 = vpop.f32.mrf.mxu0  ;;  %v643_v11 = vpop.f32.mrf.mxu1 }
 0x144   :  { %v3858_v62 = vmul.f32 -1.442695, %v646_v0  ;;  %v647_v61 = vadd.f32 %v572_v58, %v311_v63  ;;  %v649_v2 = vadd.f32 %v643_v11, %v424_v8  ;;  %v6888_v8 = vld [vmem:[#allocation27_spill] sm:$0xff] }
 0x146   :  { %3972 = vpow2.f32 %v3858_v62  ;;  %v3859_v60 = vmul.f32 -1.442695, %v647_v61  ;;  %v3860_v18 = vmul.f32 -1.442695, %v649_v2  ;;  %v6886_v61 = vld [vmem:[#allocation25_spill] sm:$0xff] }
 0x148   :  { %3974 = vpow2.f32 %v3859_v60  ;;  %v6887_v60 = vld [vmem:[#allocation26_spill] sm:$0xff] }
 0x149   :  { %3976 = vpow2.f32 %v3860_v18  ;;  %v6890_v18 = vld [vmem:[#allocation29_spill] sm:$0xff] }
 0x153   :  { %v3973_v45 = vpop.eup %3972 }
 0x154   :  { %v653_v5 = vadd.f32 1.0, %v3973_v45  ;;  %v6891_v45 = vld [vmem:[#allocation30_spill] sm:$0xff] }
 0x155   :  { %v3975_v9 = vpop.eup %3974 }
 0x156   :  { %3978 = vrcp.f32 %v653_v5  ;;  %v659_v58 = vadd.f32 1.0, %v3975_v9  ;;  %v3977_v62 = vpop.eup %3976  ;;  %v6892_v5 = vld [vmem:[#allocation31_spill] sm:$0xff]  ;;  %v6893_v9 = vld [vmem:[#allocation32_spill] sm:$0xff] }
 0x157   :  { %3980 = vtanh.f32 %v648_v6  ;;  %v666_v63 = vadd.f32 1.0, %v3977_v62  ;;  %v6885_v6 = vld [vmem:[#allocation24_spill] sm:$0xff]  ;;  %v6895_v62 = vld [vmem:[#allocation34_spill] sm:$0xff] }
 0x158   :  { %3982 = vrcp.f32 %v659_v58  ;;  %v6894_v58 = vld [vmem:[#allocation33_spill] sm:$0xff] }
 0x159   :  { %3984 = vrcp.f32 %v666_v63  ;;  %v6899_v63 = vld [vmem:[#allocation38_spill] sm:$0xff] }
 0x163   :  { %v3979_v36 = vpop.eup %3978 }
 0x164   :  { %v3981_v0 = vpop.eup %3980 }
 0x165   :  { %v3983_v1 = vpop.eup %3982  ;;  %v670_v4 = vmul.f32 %v3981_v0, %v3979_v36  ;;  %v6896_v36 = vld [vmem:[#allocation35_spill] sm:$0xff]  ;;  %v6897_v0 = vld [vmem:[#allocation36_spill] sm:$0xff] }
 0x166   :  { %v669_v10 = vmul.f32 0.0, %v3983_v1  ;;  %v3985_v59 = vpop.eup %3984  ;;  %v6898_v1 = vld [vmem:[#allocation37_spill] sm:$0xff] }
 0x168   :  { %v5006_v11 = vadd.f32 %v670_v4, %v669_v10  ;;  %v6900_v10 = vld [vmem:[#allocation39_spill] sm:$0xff]  ;;  %v6901_v4 = vld [vmem:[#allocation40_spill] sm:$0xff] }
 0x16a   :  { %3986 = vtanh.f32 %v5006_v11 }
 0x177   :  { %v3987_v2 = vpop.eup %3986 }
 0x178   :  { %v5009_v54 = vmul.f32 %v3987_v2, %v3985_v59  ;;  %v6902_v59 = vld [vmem:[#allocation41_spill] sm:$0xff]  ;;  %v6903_v2 = vld [vmem:[#allocation42_spill] sm:$0xff] }
 0x17a   :  { %6883 = vst [vmem:[#allocation72_spill] sm:$0xff] %v5009_v54  ;;  %745 = vmatmul.mubr.f32.vlgmr.msra.gmra.mxu0 %v5009_v54  ;;  %816 = vmatmul.mubr.f32.vlgmr.msra.gmra.mxu1 %v5009_v54  ;;  %v6904_v54 = vmov 0.0  }
 0x17b   :  { %858 = vmatpush1.msra.mxu0 %v4611_v12  ;;  %929 = vmatpush1.msra.mxu1 %v4613_v13 }
 0x17c   :  { %859 = vmatprep.subr.mxu0 %v4617_v14  ;;  %930 = vmatprep.subr.mxu1 %v4619_v15 }
 0x17d   :  { %860 = vmatpush1.msra.mxu0 %v4625_v16  ;;  %931 = vmatpush1.msra.mxu1 %v4627_v17 }
 0x17e   :  { %861 = vmatprep.subr.mxu0 %v4633_v19  ;;  %932 = vmatprep.subr.mxu1 %v4635_v20 }
 0x17f   :  { %862 = vmatpush1.msra.mxu0 %v4639_v21  ;;  %933 = vmatpush1.msra.mxu1 %v4641_v22 }
 0x180   :  { %863 = vmatprep.subr.mxu0 %v4645_v23  ;;  %934 = vmatprep.subr.mxu1 %v4647_v24 }
 0x181   :  { %864 = vmatpush1.msra.mxu0 %v4653_v25  ;;  %935 = vmatpush1.msra.mxu1 %v4655_v26 }
 0x182   :  { %865 = vmatprep.subr.mxu0 %v4661_v28  ;;  %936 = vmatprep.subr.mxu1 %v4663_v29 }
 0x183   :  { %866 = vmatpush1.msra.mxu0 %v4667_v30  ;;  %937 = vmatpush1.msra.mxu1 %v4669_v31 }
 0x184   :  { %867 = vmatprep.subr.mxu0 %v4673_v32  ;;  %938 = vmatprep.subr.mxu1 %v4675_v33 }
 0x185   :  { %868 = vmatpush1.msra.mxu0 %v4681_v34  ;;  %939 = vmatpush1.msra.mxu1 %v4683_v35 }
 0x186   :  { %869 = vmatprep.subr.mxu0 %v4689_v37  ;;  %940 = vmatprep.subr.mxu1 %v4691_v38 }
 0x187   :  { %870 = vmatpush1.msra.mxu0 %v4695_v39  ;;  %941 = vmatpush1.msra.mxu1 %v4697_v40 }
 0x188   :  { %871 = vmatprep.subr.mxu0 %v4701_v41  ;;  %942 = vmatprep.subr.mxu1 %v4703_v42 }
 0x189   :  { %872 = vmatpush1.msra.mxu0 %v4709_v43  ;;  %943 = vmatpush1.msra.mxu1 %v4711_v44 }
 0x18a   :  { %873 = vmatprep.subr.mxu0 %v4717_v46  ;;  %944 = vmatprep.subr.mxu1 %v4719_v47 }
 0x18b   :  { %874 = vmatpush1.msra.mxu0 %v4723_v48  ;;  %945 = vmatpush1.msra.mxu1 %v4725_v49 }
 0x18c   :  { %875 = vmatprep.subr.mxu0 %v4729_v50  ;;  %946 = vmatprep.subr.mxu1 %v4731_v51 }
 0x18d   :  { %876 = vmatpush1.msra.mxu0 %v4737_v52  ;;  %947 = vmatpush1.msra.mxu1 %v4739_v53 }
 0x18e   :  { %877 = vmatprep.subr.mxu0 %v4745_v55  ;;  %948 = vmatprep.subr.mxu1 %v4747_v56 }
 0x18f   :  { %878 = vmatpush1.msra.mxu0 %v4751_v57  ;;  %949 = vmatpush1.msra.mxu1 %v6884_v27 }
 0x190   :  { %879 = vmatprep.subr.mxu0 %v6885_v6  ;;  %950 = vmatprep.subr.mxu1 %v6886_v61 }
 0x191   :  { %880 = vmatpush1.msra.mxu0 %v6887_v60  ;;  %951 = vmatpush1.msra.mxu1 %v6888_v8 }
 0x192   :  { %881 = vmatprep.subr.mxu0 %v6889_v7  ;;  %952 = vmatprep.subr.mxu1 %v6890_v18  ;;  %v6910_v18 = vld [vmem:[#allocation45_spill] sm:$0xff] }
 0x193   :  { %882 = vmatpush1.msra.mxu0 %v6891_v45  ;;  %953 = vmatpush1.msra.mxu1 %v6892_v5  ;;  %v6909_v45 = vld [vmem:[#allocation47_spill] sm:$0xff] }
 0x194   :  { %883 = vmatprep.subr.mxu0 %v6893_v9  ;;  %954 = vmatprep.subr.mxu1 %v6894_v58  ;;  %v6905_v58 = vld [vmem:[#allocation43_spill] sm:$0xff] }
 0x195   :  { %884 = vmatpush1.msra.mxu0 %v6895_v62  ;;  %955 = vmatpush1.msra.mxu1 %v6896_v36  ;;  %v6906_v36 = vld [vmem:[#allocation21_spill] sm:$0xff] }
 0x196   :  { %885 = vmatprep.subr.mxu0 %v6897_v0  ;;  %956 = vmatprep.subr.mxu1 %v6898_v1  ;;  %v6907_v0 = vld [vmem:[#allocation22_spill] sm:$0xff] }
 0x197   :  { %886 = vmatpush1.msra.mxu0 %v6899_v63  ;;  %957 = vmatpush1.msra.mxu1 %v6900_v10 }
 0x198   :  { %887 = vmatprep.subr.mxu0 %v6901_v4  ;;  %958 = vmatprep.subr.mxu1 %v6902_v59  ;;  %v6908_v4 = vld [vmem:[#allocation46_spill] sm:$0xff] }
 0x199   :  { %888 = vmatpush1.msra.mxu0 %v6903_v2  ;;  %921 = vmatprep.mubr.f32.mxu0 %v6904_v54 }
 0x19a   :  { %959 = vmatpush1.msra.mxu1 %v6905_v58  ;;  %992 = vmatprep.mubr.f32.mxu1 %v6904_v54 }
 0x19b   :  { %1034 = vmatprep.subr.mxu0 %v6906_v36  ;;  %1105 = vmatprep.subr.mxu1 %v6907_v0 }
 0x23a   :  { %v746_v1 = vpop.f32.mrf.mxu0  ;;  %v817_v59 = vpop.f32.mrf.mxu1 }
 0x23b   :  { %v822_v63 = vadd.f32 %v746_v1, %v4930_v3  ;;  %v824_v54 = vadd.f32 %v817_v59, %v6910_v18 }
 0x23c   :  { %v748_v10 = vpop.f32.mrf.mxu0  ;;  %v819_v5 = vpop.f32.mrf.mxu1 }
 0x23d   :  { %v3861_v62 = vmul.f32 -1.442695, %v822_v63  ;;  %v823_v9 = vadd.f32 %v748_v10, %v6908_v4  ;;  %v825_v58 = vadd.f32 %v819_v5, %v6909_v45 }
 0x23f   :  { %3988 = vpow2.f32 %v3861_v62  ;;  %v3862_v2 = vmul.f32 -1.442695, %v823_v9  ;;  %v3863_v7 = vmul.f32 -1.442695, %v825_v58 }
 0x241   :  { %3990 = vpow2.f32 %v3862_v2 }
 0x242   :  { %3992 = vtanh.f32 %v824_v54 }
 0x243   :  { %3994 = vpow2.f32 %v3863_v7 }
 0x24c   :  { %v3989_v36 = vpop.eup %3988 }
 0x24d   :  { %v829_v8 = vadd.f32 1.0, %v3989_v36 }
 0x24e   :  { %v3991_v0 = vpop.eup %3990 }
 0x24f   :  { %3996 = vrcp.f32 %v829_v8  ;;  %v835_v3 = vadd.f32 1.0, %v3991_v0  ;;  %v3993_v1 = vpop.eup %3992  ;;  %v6933_v8 = vld [vmem:[#allocation50_spill] sm:$0xff]  ;;  %v6934_v0 = vld [vmem:[#allocation51_spill] sm:$0xff] }
 0x250   :  { %v3995_v63 = vpop.eup %3994 }
 0x251   :  { %3998 = vrcp.f32 %v835_v3  ;;  %v842_v4 = vadd.f32 1.0, %v3995_v63 }
 0x253   :  { %4000 = vrcp.f32 %v842_v4 }
 0x25c   :  { %v3997_v62 = vpop.eup %3996 }
 0x25d   :  { %v846_v10 = vmul.f32 %v3997_v62, %v3993_v1  ;;  %v6935_v1 = vld [vmem:[#allocation49_spill] sm:$0xff] }
 0x25e   :  { %v3999_v9 = vpop.eup %3998 }
 0x25f   :  { %v845_v2 = vmul.f32 %v3999_v9, %v5006_v11 }
 0x260   :  { %v4001_v18 = vpop.eup %4000 }
 0x261   :  { %v5084_v45 = vadd.f32 %v846_v10, %v845_v2 }
 0x263   :  { %4002 = vtanh.f32 %v5084_v45 }
 0x270   :  { %v4003_v54 = vpop.eup %4002 }
 0x271   :  { %v5087_v5 = vmul.f32 %v4003_v54, %v4001_v18 }
 0x273   :  { %6911 = vst [vmem:[#allocation23_spill] sm:$0xff] %v5087_v5  ;;  %922 = vmatmul.mubr.f32.vlgmr.msra.gmra.mxu0 %v5087_v5  ;;  %993 = vmatmul.mubr.f32.vlgmr.msra.gmra.mxu1 %v5087_v5  ;;  %v5236_v5 = vld [vmem:[#allocation9 + $0x150] sm:$0xff] }
 0x274   :  { %1035 = vmatpush1.msra.mxu0 %v4611_v12  ;;  %1106 = vmatpush1.msra.mxu1 %v4613_v13  ;;  %v6912_v12 = vld [vmem:[#allocation27_spill] sm:$0xff]  ;;  %v6913_v13 = vld [vmem:[#allocation28_spill] sm:$0xff] }
 0x275   :  { %1036 = vmatprep.subr.mxu0 %v4617_v14  ;;  %1107 = vmatprep.subr.mxu1 %v4619_v15  ;;  %v6914_v14 = vld [vmem:[#allocation29_spill] sm:$0xff]  ;;  %v6915_v15 = vld [vmem:[#allocation30_spill] sm:$0xff] }
 0x276   :  { %1037 = vmatpush1.msra.mxu0 %v4625_v16  ;;  %1108 = vmatpush1.msra.mxu1 %v4627_v17  ;;  %v6916_v16 = vld [vmem:[#allocation31_spill] sm:$0xff]  ;;  %v6917_v17 = vld [vmem:[#allocation32_spill] sm:$0xff] }
 0x277   :  { %1038 = vmatprep.subr.mxu0 %v4633_v19  ;;  %1109 = vmatprep.subr.mxu1 %v4635_v20  ;;  %v6918_v19 = vld [vmem:[#allocation33_spill] sm:$0xff]  ;;  %v6919_v20 = vld [vmem:[#allocation34_spill] sm:$0xff] }
 0x278   :  { %1039 = vmatpush1.msra.mxu0 %v4639_v21  ;;  %1110 = vmatpush1.msra.mxu1 %v4641_v22  ;;  %v6920_v21 = vld [vmem:[#allocation35_spill] sm:$0xff]  ;;  %v6921_v22 = vld [vmem:[#allocation36_spill] sm:$0xff] }
 0x279   :  { %1040 = vmatprep.subr.mxu0 %v4645_v23  ;;  %1111 = vmatprep.subr.mxu1 %v4647_v24  ;;  %v6922_v23 = vld [vmem:[#allocation37_spill] sm:$0xff]  ;;  %v6923_v24 = vld [vmem:[#allocation38_spill] sm:$0xff] }
 0x27a   :  { %1041 = vmatpush1.msra.mxu0 %v4653_v25  ;;  %1112 = vmatpush1.msra.mxu1 %v4655_v26  ;;  %v6924_v25 = vld [vmem:[#allocation39_spill] sm:$0xff]  ;;  %v6925_v26 = vld [vmem:[#allocation40_spill] sm:$0xff] }
 0x27b   :  { %1042 = vmatprep.subr.mxu0 %v4661_v28  ;;  %1113 = vmatprep.subr.mxu1 %v4663_v29  ;;  %v6926_v28 = vld [vmem:[#allocation41_spill] sm:$0xff]  ;;  %v6927_v29 = vld [vmem:[#allocation42_spill] sm:$0xff] }
 0x27c   :  { %1043 = vmatpush1.msra.mxu0 %v4667_v30  ;;  %1114 = vmatpush1.msra.mxu1 %v4669_v31  ;;  %v6928_v30 = vmov 0.0   ;;  %v6929_v31 = vld [vmem:[#allocation43_spill] sm:$0xff] }
 0x27d   :  { %1044 = vmatprep.subr.mxu0 %v4673_v32  ;;  %1115 = vmatprep.subr.mxu1 %v4675_v33  ;;  %v5155_v32 = vld [vmem:[#allocation9 + $0x1e8] sm:$0xff]  ;;  %v5158_v33 = vld [vmem:[#allocation9 + $0x1f8] sm:$0xff] }
 0x27e   :  { %1045 = vmatpush1.msra.mxu0 %v4681_v34  ;;  %1116 = vmatpush1.msra.mxu1 %v4683_v35  ;;  %6930 = vst [vmem:[#allocation24_spill] sm:$0xff] %v5155_v32  ;;  %6931 = vst [vmem:[#allocation25_spill] sm:$0xff] %v5158_v33  ;;  %v6932_v35 = vld [vmem:[#allocation48_spill] sm:$0xff] }
 0x27f   :  { %1046 = vmatprep.subr.mxu0 %v4689_v37  ;;  %1117 = vmatprep.subr.mxu1 %v4691_v38 }
 0x280   :  { %1047 = vmatpush1.msra.mxu0 %v4695_v39  ;;  %1118 = vmatpush1.msra.mxu1 %v4697_v40 }
 0x281   :  { %1048 = vmatprep.subr.mxu0 %v4701_v41  ;;  %1119 = vmatprep.subr.mxu1 %v4703_v42 }
 0x282   :  { %1049 = vmatpush1.msra.mxu0 %v4709_v43  ;;  %1120 = vmatpush1.msra.mxu1 %v4711_v44 }
 0x283   :  { %1050 = vmatprep.subr.mxu0 %v4717_v46  ;;  %1121 = vmatprep.subr.mxu1 %v4719_v47 }
 0x284   :  { %1051 = vmatpush1.msra.mxu0 %v4723_v48  ;;  %1122 = vmatpush1.msra.mxu1 %v4725_v49 }
 0x285   :  { %1052 = vmatprep.subr.mxu0 %v4729_v50  ;;  %1123 = vmatprep.subr.mxu1 %v4731_v51 }
 0x286   :  { %1053 = vmatpush1.msra.mxu0 %v4737_v52  ;;  %1124 = vmatpush1.msra.mxu1 %v4739_v53 }
 0x287   :  { %1054 = vmatprep.subr.mxu0 %v4745_v55  ;;  %1125 = vmatprep.subr.mxu1 %v4747_v56 }
 0x288   :  { %1055 = vmatpush1.msra.mxu0 %v4751_v57  ;;  %1126 = vmatpush1.msra.mxu1 %v6884_v27 }
 0x289   :  { %1056 = vmatprep.subr.mxu0 %v6885_v6  ;;  %1127 = vmatprep.subr.mxu1 %v6886_v61 }
 0x28a   :  { %1057 = vmatpush1.msra.mxu0 %v6887_v60  ;;  %1128 = vmatpush1.msra.mxu1 %v6912_v12 }
 0x28b   :  { %1058 = vmatprep.subr.mxu0 %v6913_v13  ;;  %1129 = vmatprep.subr.mxu1 %v6914_v14 }
 0x28c   :  { %1059 = vmatpush1.msra.mxu0 %v6915_v15  ;;  %1130 = vmatpush1.msra.mxu1 %v6916_v16 }
 0x28d   :  { %1060 = vmatprep.subr.mxu0 %v6917_v17  ;;  %1131 = vmatprep.subr.mxu1 %v6918_v19 }
 0x28e   :  { %1061 = vmatpush1.msra.mxu0 %v6919_v20  ;;  %1132 = vmatpush1.msra.mxu1 %v6920_v21 }
 0x28f   :  { %1062 = vmatprep.subr.mxu0 %v6921_v22  ;;  %1133 = vmatprep.subr.mxu1 %v6922_v23 }
 0x290   :  { %1063 = vmatpush1.msra.mxu0 %v6923_v24  ;;  %1134 = vmatpush1.msra.mxu1 %v6924_v25 }
 0x291   :  { %1064 = vmatprep.subr.mxu0 %v6925_v26  ;;  %1135 = vmatprep.subr.mxu1 %v6926_v28 }
 0x292   :  { %1065 = vmatpush1.msra.mxu0 %v6927_v29  ;;  %1098 = vmatprep.mubr.f32.mxu0 %v6928_v30 }
 0x293   :  { %1136 = vmatpush1.msra.mxu1 %v6929_v31  ;;  %1169 = vmatprep.mubr.f32.mxu1 %v6928_v30 }
 0x294   :  { %1211 = vmatprep.subr.mxu0 %v5155_v32  ;;  %1282 = vmatprep.subr.mxu1 %v5158_v33 }
 0x333   :  { %v923_v34 = vpop.f32.mrf.mxu0  ;;  %v994_v58 = vpop.f32.mrf.mxu1 }
 0x334   :  { %v999_v37 = vadd.f32 %v923_v34, %v6932_v35  ;;  %v1001_v63 = vadd.f32 %v994_v58, %v6935_v1  ;;  %v5185_v1 = vld [vmem:[#allocation9 + $0x1c0] sm:$0xff] }
 0x335   :  { %v925_v38 = vpop.f32.mrf.mxu0  ;;  %v996_v36 = vpop.f32.mrf.mxu1 }
 0x336   :  { %v3864_v11 = vmul.f32 -1.442695, %v999_v37  ;;  %v1000_v7 = vadd.f32 %v925_v38, %v6933_v8  ;;  %v1002_v3 = vadd.f32 %v996_v36, %v6934_v0  ;;  %v5173_v36 = vld [vmem:[#allocation9 + $0x1e0] sm:$0xff]  ;;  %v5176_v0 = vld [vmem:[#allocation9 + $0x1f0] sm:$0xff] }
 0x338   :  { %4004 = vpow2.f32 %v3864_v11  ;;  %v3865_v59 = vmul.f32 -1.442695, %v1000_v7  ;;  %v3866_v62 = vmul.f32 -1.442695, %v1002_v3  ;;  %v5182_v3 = vld [vmem:[#allocation9 + $0x1d8] sm:$0xff] }
 0x33a   :  { %4006 = vpow2.f32 %v3865_v59 }
 0x33b   :  { %4008 = vtanh.f32 %v1001_v63  ;;  %v5188_v63 = vld [vmem:[#allocation9 + $0x1d0] sm:$0xff] }
 0x33c   :  { %4010 = vpow2.f32 %v3866_v62  ;;  %v5191_v62 = vld [vmem:[#allocation9 + $0x1a8] sm:$0xff] }
 0x345   :  { %v4005_v10 = vpop.eup %4004 }
 0x346   :  { %v1006_v9 = vadd.f32 1.0, %v4005_v10  ;;  %v5194_v10 = vld [vmem:[#allocation9 + $0x1b8] sm:$0xff] }
 0x347   :  { %v4007_v4 = vpop.eup %4006 }
 0x348   :  { %4012 = vrcp.f32 %v1006_v9  ;;  %v1012_v2 = vadd.f32 1.0, %v4007_v4  ;;  %v4009_v18 = vpop.eup %4008  ;;  %v5197_v9 = vld [vmem:[#allocation9 + $0x1a0] sm:$0xff]  ;;  %v5200_v4 = vld [vmem:[#allocation9 + $0x1b0] sm:$0xff] }
 0x349   :  { %v4011_v54 = vpop.eup %4010 }
 0x34a   :  { %4014 = vrcp.f32 %v1012_v2  ;;  %v1019_v38 = vadd.f32 1.0, %v4011_v54  ;;  %v5203_v2 = vld [vmem:[#allocation9 + $0x188] sm:$0xff]  ;;  %v5209_v54 = vld [vmem:[#allocation9 + $0x180] sm:$0xff] }
 0x34c   :  { %4016 = vrcp.f32 %v1019_v38  ;;  %v5221_v38 = vld [vmem:[#allocation9 + $0x160] sm:$0xff] }
 0x34d   :  { %6937 = vst [vmem:[#allocation21_spill] sm:$0xff] %v5221_v38 }
 0x355   :  { %v4013_v34 = vpop.eup %4012 }
 0x356   :  { %v1023_v35 = vmul.f32 %v4013_v34, %v4009_v18  ;;  %v5206_v18 = vld [vmem:[#allocation9 + $0x198] sm:$0xff]  ;;  %v5212_v34 = vld [vmem:[#allocation9 + $0x190] sm:$0xff] }
 0x357   :  { %v4015_v37 = vpop.eup %4014 }
 0x358   :  { %v1022_v11 = vmul.f32 %v4015_v37, %v5084_v45  ;;  %v5179_v45 = vld [vmem:[#allocation9 + $0x1c8] sm:$0xff]  ;;  %v5218_v37 = vld [vmem:[#allocation9 + $0x178] sm:$0xff] }
 0x359   :  { %v4017_v7 = vpop.eup %4016 }
 0x35a   :  { %v5166_v8 = vadd.f32 %v1023_v35, %v1022_v11  ;;  %v5215_v35 = vld [vmem:[#allocation9 + $0x168] sm:$0xff]  ;;  %v5224_v11 = vld [vmem:[#allocation9 + $0x170] sm:$0xff] }
 0x35b   :  { %6938 = vst [vmem:[#allocation22_spill] sm:$0xff] %v5224_v11 }
 0x35c   :  { %4018 = vtanh.f32 %v5166_v8 }
 0x369   :  { %v4019_v58 = vpop.eup %4018 }
 0x36a   :  { %v5169_v59 = vmul.f32 %v4019_v58, %v4017_v7  ;;  %v5227_v7 = vld [vmem:[#allocation9 + $0x148] sm:$0xff]  ;;  %v5230_v58 = vld [vmem:[#allocation9 + $0x158] sm:$0xff] }
 0x36c   :  { %6936 = vst [vmem:[#allocation26_spill] sm:$0xff] %v5169_v59  ;;  %1099 = vmatmul.mubr.f32.vlgmr.msra.gmra.mxu0 %v5169_v59  ;;  %1170 = vmatmul.mubr.f32.vlgmr.msra.gmra.mxu1 %v5169_v59  ;;  %v5233_v59 = vld [vmem:[#allocation9 + $0x140] sm:$0xff] }
 0x36d   :  { %1212 = vmatpush1.msra.mxu0 %v5173_v36  ;;  %1283 = vmatpush1.msra.mxu1 %v5176_v0 }
 0x36e   :  { %1213 = vmatprep.subr.mxu0 %v5179_v45  ;;  %1284 = vmatprep.subr.mxu1 %v5182_v3 }
 0x36f   :  { %1214 = vmatpush1.msra.mxu0 %v5185_v1  ;;  %1285 = vmatpush1.msra.mxu1 %v5188_v63 }
 0x370   :  { %1215 = vmatprep.subr.mxu0 %v5191_v62  ;;  %1286 = vmatprep.subr.mxu1 %v5194_v10 }
 0x371   :  { %1216 = vmatpush1.msra.mxu0 %v5197_v9  ;;  %1287 = vmatpush1.msra.mxu1 %v5200_v4 }
 0x372   :  { %1217 = vmatprep.subr.mxu0 %v5203_v2  ;;  %1288 = vmatprep.subr.mxu1 %v5206_v18 }
 0x373   :  { %1218 = vmatpush1.msra.mxu0 %v5209_v54  ;;  %1289 = vmatpush1.msra.mxu1 %v5212_v34 }
 0x374   :  { %1219 = vmatprep.subr.mxu0 %v5215_v35  ;;  %1290 = vmatprep.subr.mxu1 %v5218_v37 }
 0x375   :  { %1220 = vmatpush1.msra.mxu0 %v5221_v38  ;;  %1291 = vmatpush1.msra.mxu1 %v5224_v11  ;;  %v5239_v38 = vld [vmem:[#allocation9 + $0x128] sm:$0xff]  ;;  %v5242_v11 = vld [vmem:[#allocation9 + $0x138] sm:$0xff] }
 0x376   :  { %1221 = vmatprep.subr.mxu0 %v5227_v7  ;;  %1292 = vmatprep.subr.mxu1 %v5230_v58 }
 0x377   :  { %1222 = vmatpush1.msra.mxu0 %v5233_v59  ;;  %1293 = vmatpush1.msra.mxu1 %v5236_v5 }
 0x378   :  { %1223 = vmatprep.subr.mxu0 %v5239_v38  ;;  %1294 = vmatprep.subr.mxu1 %v5242_v11 }
 0x379   :  { %1224 = vmatpush1.msra.mxu0 %v4695_v39  ;;  %1295 = vmatpush1.msra.mxu1 %v4697_v40  ;;  %v6939_v40 = vld [vmem:[#allocation52_spill] sm:$0xff] }
 0x37a   :  { %1225 = vmatprep.subr.mxu0 %v4701_v41  ;;  %1296 = vmatprep.subr.mxu1 %v4703_v42 }
 0x37b   :  { %1226 = vmatpush1.msra.mxu0 %v4709_v43  ;;  %1297 = vmatpush1.msra.mxu1 %v4711_v44  ;;  %v6940_v44 = vld [vmem:[#allocation54_spill] sm:$0xff] }
 0x37c   :  { %1227 = vmatprep.subr.mxu0 %v4717_v46  ;;  %1298 = vmatprep.subr.mxu1 %v4719_v47 }
 0x37d   :  { %1228 = vmatpush1.msra.mxu0 %v4723_v48  ;;  %1299 = vmatpush1.msra.mxu1 %v4725_v49 }
 0x37e   :  { %1229 = vmatprep.subr.mxu0 %v4729_v50  ;;  %1300 = vmatprep.subr.mxu1 %v4731_v51  ;;  %v6941_v50 = vld [vmem:[#allocation55_spill] sm:$0xff] }
 0x37f   :  { %1230 = vmatpush1.msra.mxu0 %v4737_v52  ;;  %1301 = vmatpush1.msra.mxu1 %v4739_v53  ;;  %v6942_v52 = vld [vmem:[#allocation53_spill] sm:$0xff] }
 0x380   :  { %1231 = vmatprep.subr.mxu0 %v4745_v55  ;;  %1302 = vmatprep.subr.mxu1 %v4747_v56 }
 0x381   :  { %1232 = vmatpush1.msra.mxu0 %v4751_v57  ;;  %1303 = vmatpush1.msra.mxu1 %v6884_v27 }
 0x382   :  { %1233 = vmatprep.subr.mxu0 %v6885_v6  ;;  %1304 = vmatprep.subr.mxu1 %v6886_v61 }
 0x383   :  { %1234 = vmatpush1.msra.mxu0 %v6887_v60  ;;  %1305 = vmatpush1.msra.mxu1 %v6912_v12 }
 0x384   :  { %1235 = vmatprep.subr.mxu0 %v6913_v13  ;;  %1306 = vmatprep.subr.mxu1 %v6914_v14 }
 0x385   :  { %1236 = vmatpush1.msra.mxu0 %v6915_v15  ;;  %1307 = vmatpush1.msra.mxu1 %v6916_v16 }
 0x386   :  { %1237 = vmatprep.subr.mxu0 %v6917_v17  ;;  %1308 = vmatprep.subr.mxu1 %v6918_v19 }
 0x387   :  { %1238 = vmatpush1.msra.mxu0 %v6919_v20  ;;  %1309 = vmatpush1.msra.mxu1 %v6920_v21 }
 0x388   :  { %1239 = vmatprep.subr.mxu0 %v6921_v22  ;;  %1310 = vmatprep.subr.mxu1 %v6922_v23  ;;  %v6944_v22 = vld [vmem:[#allocation21_spill] sm:$0xff]  ;;  %v6945_v23 = vld [vmem:[#allocation22_spill] sm:$0xff] }
 0x389   :  { %1240 = vmatpush1.msra.mxu0 %v6923_v24  ;;  %1311 = vmatpush1.msra.mxu1 %v6924_v25  ;;  %v5323_v24 = vld [vmem:[#allocation9 + $0x120] sm:$0xff]  ;;  %v5326_v25 = vld [vmem:[#allocation9 + $0x130] sm:$0xff] }
 0x38a   :  { %1241 = vmatprep.subr.mxu0 %v6925_v26  ;;  %1312 = vmatprep.subr.mxu1 %v6926_v28  ;;  %v5329_v26 = vld [vmem:[#allocation9 + $0x108] sm:$0xff]  ;;  %v5332_v28 = vld [vmem:[#allocation9 + $0x118] sm:$0xff] }
 0x38b   :  { %1242 = vmatpush1.msra.mxu0 %v6927_v29  ;;  %1275 = vmatprep.mubr.f32.mxu0 %v6928_v30  ;;  %v5335_v29 = vld [vmem:[#allocation9 + $0x100] sm:$0xff] }
 0x38c   :  { %1313 = vmatpush1.msra.mxu1 %v6929_v31  ;;  %1346 = vmatprep.mubr.f32.mxu1 %v6928_v30  ;;  %v5338_v31 = vld [vmem:[#allocation9 + $0x110] sm:$0xff] }
 0x38d   :  { %1388 = vmatprep.subr.mxu0 %v5155_v32  ;;  %1459 = vmatprep.subr.mxu1 %v5158_v33 }
 0x42c   :  { %v1100_v39 = vpop.f32.mrf.mxu0  ;;  %v1171_v47 = vpop.f32.mrf.mxu1 }
 0x42d   :  { %v1176_v41 = vadd.f32 %v1100_v39, %v6939_v40  ;;  %v1178_v53 = vadd.f32 %v1171_v47, %v6942_v52  ;;  %v5344_v39 = vld [vmem:[#allocation9 + $0xf8] sm:$0xff]  ;;  %v5347_v40 = vld [vmem:[#allocation9 + $0xe0] sm:$0xff]  ;;  %v5365_v47 = vld [vmem:[#allocation9 + $0xa8] sm:$0xff] }
 0x42e   :  { %v1102_v42 = vpop.f32.mrf.mxu0  ;;  %v1173_v49 = vpop.f32.mrf.mxu1  ;;  %v5380_v52 = vld [vmem:[#allocation9 + $0x98] sm:$0xff] }
 0x42f   :  { %v3867_v43 = vmul.f32 -1.442695, %v1176_v41  ;;  %v1177_v46 = vadd.f32 %v1102_v42, %v6940_v44  ;;  %v1179_v51 = vadd.f32 %v1173_v49, %v6941_v50  ;;  %v5350_v41 = vld [vmem:[#allocation9 + $0xf0] sm:$0xff]  ;;  %v5353_v42 = vld [vmem:[#allocation9 + $0xc8] sm:$0xff]  ;;  %v5359_v44 = vld [vmem:[#allocation9 + $0xc0] sm:$0xff] }
 0x430   :  { %v5371_v49 = vld [vmem:[#allocation9 + $0xa0] sm:$0xff]  ;;  %v5374_v50 = vld [vmem:[#allocation9 + $0xb0] sm:$0xff] }
 0x431   :  { %4020 = vpow2.f32 %v3867_v43  ;;  %v3868_v48 = vmul.f32 -1.442695, %v1177_v46  ;;  %v3869_v55 = vmul.f32 -1.442695, %v1179_v51  ;;  %v5356_v43 = vld [vmem:[#allocation9 + $0xd8] sm:$0xff]  ;;  %v5362_v46 = vld [vmem:[#allocation9 + $0xd0] sm:$0xff] }
 0x432   :  { %v5377_v51 = vld [vmem:[#allocation9 + $0x88] sm:$0xff] }
 0x433   :  { %4022 = vpow2.f32 %v3868_v48  ;;  %v5368_v48 = vld [vmem:[#allocation9 + $0xb8] sm:$0xff] }
 0x434   :  { %4024 = vtanh.f32 %v1178_v53  ;;  %v5383_v53 = vld [vmem:[#allocation9 + $0x80] sm:$0xff] }
 0x435   :  { %4026 = vpow2.f32 %v3869_v55  ;;  %v5386_v55 = vld [vmem:[#allocation9 + $0x90] sm:$0xff] }
 0x436   :  { %6946 = vst [vmem:[#allocation47_spill] sm:$0xff] %v5386_v55 }
 0x43e   :  { %v4021_v56 = vpop.eup %4020 }
 0x43f   :  { %v1183_v57 = vadd.f32 1.0, %v4021_v56  ;;  %v5389_v56 = vld [vmem:[#allocation9 + $0x68] sm:$0xff] }
 0x440   :  { %v4023_v27 = vpop.eup %4022  ;;  %6947 = vst [vmem:[#allocation45_spill] sm:$0xff] %v5389_v56 }
 0x441   :  { %4028 = vrcp.f32 %v1183_v57  ;;  %v1189_v6 = vadd.f32 1.0, %v4023_v27  ;;  %v4025_v61 = vpop.eup %4024  ;;  %v5392_v57 = vld [vmem:[#allocation9 + $0x78] sm:$0xff]  ;;  %v5395_v27 = vld [vmem:[#allocation9 + $0x60] sm:$0xff] }
 0x442   :  { %v4027_v60 = vpop.eup %4026  ;;  %6948 = vst [vmem:[#allocation27_spill] sm:$0xff] %v5392_v57  ;;  %6949 = vst [vmem:[#allocation28_spill] sm:$0xff] %v5395_v27 }
 0x443   :  { %4030 = vrcp.f32 %v1189_v6  ;;  %v1196_v15 = vadd.f32 1.0, %v4027_v60  ;;  %v5398_v6 = vld [vmem:[#allocation9 + $0x70] sm:$0xff]  ;;  %v5404_v60 = vld [vmem:[#allocation9 + $0x58] sm:$0xff] }
 0x444   :  { %6950 = vst [vmem:[#allocation29_spill] sm:$0xff] %v5398_v6  ;;  %6952 = vst [vmem:[#allocation31_spill] sm:$0xff] %v5404_v60 }
 0x445   :  { %4032 = vrcp.f32 %v1196_v15  ;;  %v5416_v15 = vld [vmem:[#allocation9 + $0x38] sm:$0xff] }
 0x446   :  { %6956 = vst [vmem:[#allocation35_spill] sm:$0xff] %v5416_v15 }
 0x44e   :  { %v4029_v12 = vpop.eup %4028 }
 0x44f   :  { %v1200_v13 = vmul.f32 %v4029_v12, %v4025_v61  ;;  %v5401_v61 = vld [vmem:[#allocation9 + $0x48] sm:$0xff]  ;;  %v5407_v12 = vld [vmem:[#allocation9 + $0x40] sm:$0xff] }
 0x450   :  { %v4031_v14 = vpop.eup %4030  ;;  %6951 = vst [vmem:[#allocation30_spill] sm:$0xff] %v5401_v61  ;;  %6953 = vst [vmem:[#allocation32_spill] sm:$0xff] %v5407_v12 }
 0x451   :  { %v1199_v16 = vmul.f32 %v4031_v14, %v5166_v8  ;;  %v5341_v8 = vld [vmem:[#allocation9 + $0xe8] sm:$0xff] }
 0x452   :  { %v4033_v19 = vpop.eup %4032  ;;  %v5413_v14 = vld [vmem:[#allocation9 + $0x28] sm:$0xff] }
 0x453   :  { %v5292_v17 = vadd.f32 %v1200_v13, %v1199_v16  ;;  %v5410_v13 = vld [vmem:[#allocation9 + $0x50] sm:$0xff]  ;;  %6955 = vst [vmem:[#allocation34_spill] sm:$0xff] %v5413_v14  ;;  %v5419_v16 = vld [vmem:[#allocation9 + $0x20] sm:$0xff] }
 0x454   :  { %6954 = vst [vmem:[#allocation33_spill] sm:$0xff] %v5410_v13  ;;  %6957 = vst [vmem:[#allocation36_spill] sm:$0xff] %v5419_v16 }
 0x455   :  { %4034 = vtanh.f32 %v5292_v17 }
 0x462   :  { %v4035_v20 = vpop.eup %4034 }
 0x463   :  { %v5295_v21 = vmul.f32 %v4035_v20, %v4033_v19  ;;  %v5422_v19 = vld [vmem:[#allocation9 + $0x30] sm:$0xff]  ;;  %v5425_v20 = vld [vmem:[#allocation9 + $0x8] sm:$0xff] }
 0x464   :  { %6958 = vst [vmem:[#allocation37_spill] sm:$0xff] %v5422_v19  ;;  %6959 = vst [vmem:[#allocation38_spill] sm:$0xff] %v5425_v20 }
 0x465   :  { %6943 = vst [vmem:[#allocation46_spill] sm:$0xff] %v5295_v21  ;;  %1276 = vmatmul.mubr.f32.vlgmr.msra.gmra.mxu0 %v5295_v21  ;;  %1347 = vmatmul.mubr.f32.vlgmr.msra.gmra.mxu1 %v5295_v21  ;;  %v5428_v21 = vld [vmem:[#allocation9 + $0x18] sm:$0xff] }
 0x466   :  { %1389 = vmatpush1.msra.mxu0 %v5173_v36  ;;  %1460 = vmatpush1.msra.mxu1 %v5176_v0  ;;  %6960 = vst [vmem:[#allocation39_spill] sm:$0xff] %v5428_v21 }
 0x467   :  { %1390 = vmatprep.subr.mxu0 %v5179_v45  ;;  %1461 = vmatprep.subr.mxu1 %v5182_v3 }
 0x468   :  { %1391 = vmatpush1.msra.mxu0 %v5185_v1  ;;  %1462 = vmatpush1.msra.mxu1 %v5188_v63 }
 0x469   :  { %1392 = vmatprep.subr.mxu0 %v5191_v62  ;;  %1463 = vmatprep.subr.mxu1 %v5194_v10 }
 0x46a   :  { %1393 = vmatpush1.msra.mxu0 %v5197_v9  ;;  %1464 = vmatpush1.msra.mxu1 %v5200_v4 }
 0x46b   :  { %1394 = vmatprep.subr.mxu0 %v5203_v2  ;;  %1465 = vmatprep.subr.mxu1 %v5206_v18 }
 0x46c   :  { %1395 = vmatpush1.msra.mxu0 %v5209_v54  ;;  %1466 = vmatpush1.msra.mxu1 %v5212_v34 }
 0x46d   :  { %1396 = vmatprep.subr.mxu0 %v5215_v35  ;;  %1467 = vmatprep.subr.mxu1 %v5218_v37 }
 0x46e   :  { %1397 = vmatpush1.msra.mxu0 %v6944_v22  ;;  %1468 = vmatpush1.msra.mxu1 %v6945_v23 }
 0x46f   :  { %1398 = vmatprep.subr.mxu0 %v5227_v7  ;;  %1469 = vmatprep.subr.mxu1 %v5230_v58 }
 0x470   :  { %1399 = vmatpush1.msra.mxu0 %v5233_v59  ;;  %1470 = vmatpush1.msra.mxu1 %v5236_v5 }
 0x471   :  { %1400 = vmatprep.subr.mxu0 %v5239_v38  ;;  %1471 = vmatprep.subr.mxu1 %v5242_v11 }
 0x472   :  { %1401 = vmatpush1.msra.mxu0 %v5323_v24  ;;  %1472 = vmatpush1.msra.mxu1 %v5326_v25 }
 0x473   :  { %1402 = vmatprep.subr.mxu0 %v5329_v26  ;;  %1473 = vmatprep.subr.mxu1 %v5332_v28 }
 0x474   :  { %1403 = vmatpush1.msra.mxu0 %v5335_v29  ;;  %1474 = vmatpush1.msra.mxu1 %v5338_v31 }
 0x475   :  { %1404 = vmatprep.subr.mxu0 %v5341_v8  ;;  %1475 = vmatprep.subr.mxu1 %v5344_v39 }
 0x476   :  { %1405 = vmatpush1.msra.mxu0 %v5347_v40  ;;  %1476 = vmatpush1.msra.mxu1 %v5350_v41 }
 0x477   :  { %1406 = vmatprep.subr.mxu0 %v5353_v42  ;;  %1477 = vmatprep.subr.mxu1 %v5356_v43 }
 0x478   :  { %1407 = vmatpush1.msra.mxu0 %v5359_v44  ;;  %1478 = vmatpush1.msra.mxu1 %v5362_v46 }
 0x479   :  { %1408 = vmatprep.subr.mxu0 %v5365_v47  ;;  %1479 = vmatprep.subr.mxu1 %v5368_v48 }
 0x47a   :  { %1409 = vmatpush1.msra.mxu0 %v5371_v49  ;;  %1480 = vmatpush1.msra.mxu1 %v5374_v50 }
 0x47b   :  { %1410 = vmatprep.subr.mxu0 %v5377_v51  ;;  %1481 = vmatprep.subr.mxu1 %v5380_v52 }
 0x47c   :  { %1411 = vmatpush1.msra.mxu0 %v5383_v53  ;;  %1482 = vmatpush1.msra.mxu1 %v5386_v55 }
 0x47d   :  { %1412 = vmatprep.subr.mxu0 %v5389_v56  ;;  %1483 = vmatprep.subr.mxu1 %v5392_v57  ;;  %v6966_v57 = vld [vmem:[#allocation57_spill] sm:$0xff] }
 0x47e   :  { %1413 = vmatpush1.msra.mxu0 %v5395_v27  ;;  %1484 = vmatpush1.msra.mxu1 %v5398_v6  ;;  %v6965_v27 = vld [vmem:[#allocation59_spill] sm:$0xff] }
 0x47f   :  { %1414 = vmatprep.subr.mxu0 %v5401_v61  ;;  %1485 = vmatprep.subr.mxu1 %v5404_v60 }
 0x480   :  { %1415 = vmatpush1.msra.mxu0 %v5407_v12  ;;  %1486 = vmatpush1.msra.mxu1 %v5410_v13  ;;  %v6964_v12 = vld [vmem:[#allocation58_spill] sm:$0xff] }
 0x481   :  { %1416 = vmatprep.subr.mxu0 %v5413_v14  ;;  %1487 = vmatprep.subr.mxu1 %v5416_v15  ;;  %v5431_v14 = vld [vmem:[#allocation9] sm:$0xff]  ;;  %v5435_v15 = vld [vmem:[#allocation9 + $0x10] sm:$0xff] }
 0x482   :  { %1417 = vmatpush1.msra.mxu0 %v5419_v16  ;;  %1488 = vmatpush1.msra.mxu1 %v5422_v19  ;;  %6961 = vst [vmem:[#allocation40_spill] sm:$0xff] %v5431_v14  ;;  %6962 = vst [vmem:[#allocation41_spill] sm:$0xff] %v5435_v15  ;;  %v6963_v19 = vld [vmem:[#allocation56_spill] sm:$0xff] }
 0x483   :  { %1418 = vmatprep.subr.mxu0 %v5425_v20  ;;  %1489 = vmatprep.subr.mxu1 %v5428_v21 }
 0x484   :  { %1419 = vmatpush1.msra.mxu0 %v5431_v14  ;;  %1452 = vmatprep.mubr.f32.mxu0 %v6928_v30 }
 0x485   :  { %1490 = vmatpush1.msra.mxu1 %v5435_v15  ;;  %1523 = vmatprep.mubr.f32.mxu1 %v6928_v30 }
 0x486   :  { %1565 = vmatprep.subr.mxu0 %v5155_v32  ;;  %1636 = vmatprep.subr.mxu1 %v5158_v33 }
 0x525   :  { %v1277_v20 = vpop.f32.mrf.mxu0  ;;  %v1348_v14 = vpop.f32.mrf.mxu1 }
 0x526   :  { %v1353_v16 = vadd.f32 %v1277_v20, %v6963_v19  ;;  %v1355_v30 = vadd.f32 %v1348_v14, %v6966_v57  ;;  %v6973_v14 = vld [vmem:[#allocation30_spill] sm:$0xff] }
 0x527   :  { %v1279_v21 = vpop.f32.mrf.mxu0  ;;  %v1350_v6 = vpop.f32.mrf.mxu1 }
 0x528   :  { %v3870_v13 = vmul.f32 -1.442695, %v1353_v16  ;;  %v1354_v60 = vadd.f32 %v1279_v21, %v6964_v12  ;;  %v1356_v15 = vadd.f32 %v1350_v6, %v6965_v27  ;;  %v6972_v6 = vld [vmem:[#allocation29_spill] sm:$0xff] }
 0x52a   :  { %4036 = vpow2.f32 %v3870_v13  ;;  %v3871_v61 = vmul.f32 -1.442695, %v1354_v60  ;;  %v3872_v56 = vmul.f32 -1.442695, %v1356_v15  ;;  %v6974_v15 = vld [vmem:[#allocation31_spill] sm:$0xff] }
 0x52c   :  { %4038 = vpow2.f32 %v3871_v61 }
 0x52d   :  { %4040 = vtanh.f32 %v1355_v30 }
 0x52e   :  { %4042 = vpow2.f32 %v3872_v56  ;;  %v6971_v56 = vld [vmem:[#allocation28_spill] sm:$0xff] }
 0x537   :  { %v4037_v32 = vpop.eup %4036 }
 0x538   :  { %v1360_v55 = vadd.f32 1.0, %v4037_v32 }
 0x539   :  { %v4039_v33 = vpop.eup %4038 }
 0x53a   :  { %4044 = vrcp.f32 %v1360_v55  ;;  %v1366_v19 = vadd.f32 1.0, %v4039_v33  ;;  %v4041_v16 = vpop.eup %4040  ;;  %v6968_v33 = vld [vmem:[#allocation47_spill] sm:$0xff] }
 0x53b   :  { %v4043_v21 = vpop.eup %4042  ;;  %v6970_v55 = vld [vmem:[#allocation27_spill] sm:$0xff] }
 0x53c   :  { %4046 = vrcp.f32 %v1366_v19  ;;  %v1373_v61 = vadd.f32 1.0, %v4043_v21  ;;  %v6975_v19 = vld [vmem:[#allocation32_spill] sm:$0xff]  ;;  %v6977_v21 = vld [vmem:[#allocation34_spill] sm:$0xff] }
 0x53e   :  { %4048 = vrcp.f32 %v1373_v61  ;;  %v6981_v61 = vld [vmem:[#allocation38_spill] sm:$0xff] }
 0x547   :  { %v4045_v12 = vpop.eup %4044 }
 0x548   :  { %v1377_v13 = vmul.f32 %v4045_v12, %v4041_v16  ;;  %v6976_v16 = vld [vmem:[#allocation33_spill] sm:$0xff]  ;;  %v6978_v12 = vld [vmem:[#allocation35_spill] sm:$0xff] }
 0x549   :  { %v4047_v60 = vpop.eup %4046 }
 0x54a   :  { %v1376_v20 = vmul.f32 %v4047_v60, %v5292_v17  ;;  %v6969_v17 = vld [vmem:[#allocation45_spill] sm:$0xff] }
 0x54b   :  { %v4049_v32 = vpop.eup %4048  ;;  %v6980_v60 = vld [vmem:[#allocation37_spill] sm:$0xff] }
 0x54c   :  { %v5446_v27 = vadd.f32 %v1377_v13, %v1376_v20  ;;  %v6979_v13 = vld [vmem:[#allocation36_spill] sm:$0xff]  ;;  %v6982_v20 = vld [vmem:[#allocation39_spill] sm:$0xff] }
 0x54e   :  { %4050 = vtanh.f32 %v5446_v27 }
 0x55b   :  { %v4051_v30 = vpop.eup %4050 }
 0x55c   :  { %v5449_v57 = vmul.f32 %v4051_v30, %v4049_v32  ;;  %v6983_v32 = vld [vmem:[#allocation40_spill] sm:$0xff]  ;;  %v6984_v30 = vmov 0.0  }
 0x55e   :  { %6967 = vst [vmem:[#allocation42_spill] sm:$0xff] %v5449_v57  ;;  %1453 = vmatmul.mubr.f32.vlgmr.msra.gmra.mxu0 %v5449_v57  ;;  %1524 = vmatmul.mubr.f32.vlgmr.msra.gmra.mxu1 %v5449_v57  ;;  %v6985_v57 = vld [vmem:[#allocation41_spill] sm:$0xff] }
 0x55f   :  { %1566 = vmatpush1.msra.mxu0 %v5173_v36  ;;  %1637 = vmatpush1.msra.mxu1 %v5176_v0 }
 0x560   :  { %1567 = vmatprep.subr.mxu0 %v5179_v45  ;;  %1638 = vmatprep.subr.mxu1 %v5182_v3 }
 0x561   :  { %1568 = vmatpush1.msra.mxu0 %v5185_v1  ;;  %1639 = vmatpush1.msra.mxu1 %v5188_v63 }
 0x562   :  { %1569 = vmatprep.subr.mxu0 %v5191_v62  ;;  %1640 = vmatprep.subr.mxu1 %v5194_v10 }
 0x563   :  { %1570 = vmatpush1.msra.mxu0 %v5197_v9  ;;  %1641 = vmatpush1.msra.mxu1 %v5200_v4 }
 0x564   :  { %1571 = vmatprep.subr.mxu0 %v5203_v2  ;;  %1642 = vmatprep.subr.mxu1 %v5206_v18 }
 0x565   :  { %1572 = vmatpush1.msra.mxu0 %v5209_v54  ;;  %1643 = vmatpush1.msra.mxu1 %v5212_v34 }
 0x566   :  { %1573 = vmatprep.subr.mxu0 %v5215_v35  ;;  %1644 = vmatprep.subr.mxu1 %v5218_v37 }
 0x567   :  { %1574 = vmatpush1.msra.mxu0 %v6944_v22  ;;  %1645 = vmatpush1.msra.mxu1 %v6945_v23 }
 0x568   :  { %1575 = vmatprep.subr.mxu0 %v5227_v7  ;;  %1646 = vmatprep.subr.mxu1 %v5230_v58 }
 0x569   :  { %1576 = vmatpush1.msra.mxu0 %v5233_v59  ;;  %1647 = vmatpush1.msra.mxu1 %v5236_v5 }
 0x56a   :  { %1577 = vmatprep.subr.mxu0 %v5239_v38  ;;  %1648 = vmatprep.subr.mxu1 %v5242_v11 }
 0x56b   :  { %1578 = vmatpush1.msra.mxu0 %v5323_v24  ;;  %1649 = vmatpush1.msra.mxu1 %v5326_v25 }
 0x56c   :  { %1579 = vmatprep.subr.mxu0 %v5329_v26  ;;  %1650 = vmatprep.subr.mxu1 %v5332_v28 }
 0x56d   :  { %1580 = vmatpush1.msra.mxu0 %v5335_v29  ;;  %1651 = vmatpush1.msra.mxu1 %v5338_v31 }
 0x56e   :  { %1581 = vmatprep.subr.mxu0 %v5341_v8  ;;  %1652 = vmatprep.subr.mxu1 %v5344_v39 }
 0x56f   :  { %1582 = vmatpush1.msra.mxu0 %v5347_v40  ;;  %1653 = vmatpush1.msra.mxu1 %v5350_v41 }
 0x570   :  { %1583 = vmatprep.subr.mxu0 %v5353_v42  ;;  %1654 = vmatprep.subr.mxu1 %v5356_v43 }
 0x571   :  { %1584 = vmatpush1.msra.mxu0 %v5359_v44  ;;  %1655 = vmatpush1.msra.mxu1 %v5362_v46 }
 0x572   :  { %1585 = vmatprep.subr.mxu0 %v5365_v47  ;;  %1656 = vmatprep.subr.mxu1 %v5368_v48 }
 0x573   :  { %1586 = vmatpush1.msra.mxu0 %v5371_v49  ;;  %1657 = vmatpush1.msra.mxu1 %v5374_v50 }
 0x574   :  { %1587 = vmatprep.subr.mxu0 %v5377_v51  ;;  %1658 = vmatprep.subr.mxu1 %v5380_v52 }
 0x575   :  { %1588 = vmatpush1.msra.mxu0 %v5383_v53  ;;  %1659 = vmatpush1.msra.mxu1 %v6968_v33 }
 0x576   :  { %1589 = vmatprep.subr.mxu0 %v6969_v17  ;;  %1660 = vmatprep.subr.mxu1 %v6970_v55  ;;  %v6991_v55 = vld [vmem:[#allocation61_spill] sm:$0xff] }
 0x577   :  { %1590 = vmatpush1.msra.mxu0 %v6971_v56  ;;  %1661 = vmatpush1.msra.mxu1 %v6972_v6  ;;  %v6990_v56 = vld [vmem:[#allocation63_spill] sm:$0xff] }
 0x578   :  { %1591 = vmatprep.subr.mxu0 %v6973_v14  ;;  %1662 = vmatprep.subr.mxu1 %v6974_v15 }
 0x579   :  { %1592 = vmatpush1.msra.mxu0 %v6975_v19  ;;  %1663 = vmatpush1.msra.mxu1 %v6976_v16  ;;  %v6986_v16 = vld [vmem:[#allocation24_spill] sm:$0xff] }
 0x57a   :  { %1593 = vmatprep.subr.mxu0 %v6977_v21  ;;  %1664 = vmatprep.subr.mxu1 %v6978_v12  ;;  %v6987_v21 = vld [vmem:[#allocation25_spill] sm:$0xff] }
 0x57b   :  { %1594 = vmatpush1.msra.mxu0 %v6979_v13  ;;  %1665 = vmatpush1.msra.mxu1 %v6980_v60  ;;  %v6988_v13 = vld [vmem:[#allocation60_spill] sm:$0xff] }
 0x57c   :  { %1595 = vmatprep.subr.mxu0 %v6981_v61  ;;  %1666 = vmatprep.subr.mxu1 %v6982_v20  ;;  %v6989_v61 = vld [vmem:[#allocation62_spill] sm:$0xff] }
 0x57d   :  { %1596 = vmatpush1.msra.mxu0 %v6983_v32  ;;  %1629 = vmatprep.mubr.f32.mxu0 %v6984_v30 }
 0x57e   :  { %1667 = vmatpush1.msra.mxu1 %v6985_v57  ;;  %1700 = vmatprep.mubr.f32.mxu1 %v6984_v30 }
 0x57f   :  { %1742 = vmatprep.subr.mxu0 %v6986_v16  ;;  %1813 = vmatprep.subr.mxu1 %v6987_v21 }
 0x61e   :  { %v1454_v12 = vpop.f32.mrf.mxu0  ;;  %v1525_v20 = vpop.f32.mrf.mxu1 }
 0x61f   :  { %v1530_v19 = vadd.f32 %v1454_v12, %v6988_v13  ;;  %v1532_v30 = vadd.f32 %v1525_v20, %v6991_v55 }
 0x620   :  { %v1456_v60 = vpop.f32.mrf.mxu0  ;;  %v1527_v6 = vpop.f32.mrf.mxu1 }
 0x621   :  { %v3873_v15 = vmul.f32 -1.442695, %v1530_v19  ;;  %v1531_v14 = vadd.f32 %v1456_v60, %v6989_v61  ;;  %v1533_v57 = vadd.f32 %v1527_v6, %v6990_v56 }
 0x623   :  { %4052 = vpow2.f32 %v3873_v15  ;;  %v3874_v32 = vmul.f32 -1.442695, %v1531_v14  ;;  %v3875_v17 = vmul.f32 -1.442695, %v1533_v57 }
 0x625   :  { %4054 = vpow2.f32 %v3874_v32 }
 0x626   :  { %4056 = vtanh.f32 %v1532_v30 }
 0x627   :  { %4058 = vpow2.f32 %v3875_v17 }
 0x630   :  { %v4053_v16 = vpop.eup %4052 }
 0x631   :  { %v1537_v33 = vadd.f32 1.0, %v4053_v16  ;;  %v1974_v16 = vld [vmem:[#allocation10 + $0x1e0] sm:$0xff] }
 0x632   :  { %v4055_v21 = vpop.eup %4054 }
 0x633   :  { %4060 = vrcp.f32 %v1537_v33  ;;  %v1543_v12 = vadd.f32 1.0, %v4055_v21  ;;  %v4057_v19 = vpop.eup %4056  ;;  %v1976_v21 = vld [vmem:[#allocation10 + $0x1f0] sm:$0xff] }
 0x634   :  { %v4059_v13 = vpop.eup %4058 }
 0x635   :  { %4062 = vrcp.f32 %v1543_v12  ;;  %v1550_v61 = vadd.f32 1.0, %v4059_v13  ;;  %v1971_v12 = vld [vmem:[#allocation10 + $0x1c8] sm:$0xff]  ;;  %v1970_v13 = vld [vmem:[#allocation10 + $0x1c0] sm:$0xff] }
 0x637   :  { %4064 = vrcp.f32 %v1550_v61  ;;  %v1966_v61 = vld [vmem:[#allocation10 + $0x1a0] sm:$0xff] }
 0x640   :  { %v4061_v15 = vpop.eup %4060 }
 0x641   :  { %v1554_v60 = vmul.f32 %v4061_v15, %v4057_v19  ;;  %v1973_v19 = vld [vmem:[#allocation10 + $0x1d8] sm:$0xff]  ;;  %v1972_v15 = vld [vmem:[#allocation10 + $0x1d0] sm:$0xff] }
 0x642   :  { %v4063_v14 = vpop.eup %4062 }
 0x643   :  { %v1553_v32 = vmul.f32 %v4063_v14, %v5446_v27  ;;  %v1969_v14 = vld [vmem:[#allocation10 + $0x1b8] sm:$0xff] }
 0x644   :  { %v4065_v57 = vpop.eup %4064 }
 0x645   :  { %v5524_v56 = vadd.f32 %v1554_v60, %v1553_v32  ;;  %v1967_v60 = vld [vmem:[#allocation10 + $0x1a8] sm:$0xff]  ;;  %v1968_v32 = vld [vmem:[#allocation10 + $0x1b0] sm:$0xff] }
 0x647   :  { %4066 = vtanh.f32 %v5524_v56 }
 0x654   :  { %v4067_v55 = vpop.eup %4066 }
 0x655   :  { %v5527_v6 = vmul.f32 %v4067_v55, %v4065_v57  ;;  %v1965_v57 = vld [vmem:[#allocation10 + $0x198] sm:$0xff]  ;;  %v1962_v55 = vld [vmem:[#allocation10 + $0x180] sm:$0xff] }
 0x657   :  { %1630 = vmatmul.mubr.f32.vlgmr.msra.gmra.mxu0 %v5527_v6  ;;  %1701 = vmatmul.mubr.f32.vlgmr.msra.gmra.mxu1 %v5527_v6 }
 0x658   :  { %1743 = vmatpush1.msra.mxu0 %v5173_v36  ;;  %1814 = vmatpush1.msra.mxu1 %v5176_v0  ;;  %v6994_v36 = vld [vmem:[#allocation27_spill] sm:$0xff]  ;;  %v6995_v0 = vld [vmem:[#allocation28_spill] sm:$0xff] }
 0x659   :  { %1744 = vmatprep.subr.mxu0 %v5179_v45  ;;  %1815 = vmatprep.subr.mxu1 %v5182_v3  ;;  %v6996_v45 = vld [vmem:[#allocation29_spill] sm:$0xff]  ;;  %v6997_v3 = vld [vmem:[#allocation30_spill] sm:$0xff] }
 0x65a   :  { %1745 = vmatpush1.msra.mxu0 %v5185_v1  ;;  %1816 = vmatpush1.msra.mxu1 %v5188_v63  ;;  %v6998_v1 = vld [vmem:[#allocation31_spill] sm:$0xff]  ;;  %v6999_v63 = vld [vmem:[#allocation32_spill] sm:$0xff] }
 0x65b   :  { %1746 = vmatprep.subr.mxu0 %v5191_v62  ;;  %1817 = vmatprep.subr.mxu1 %v5194_v10  ;;  %v7000_v62 = vld [vmem:[#allocation33_spill] sm:$0xff]  ;;  %v7001_v10 = vld [vmem:[#allocation34_spill] sm:$0xff] }
 0x65c   :  { %1747 = vmatpush1.msra.mxu0 %v5197_v9  ;;  %1818 = vmatpush1.msra.mxu1 %v5200_v4  ;;  %v7002_v9 = vld [vmem:[#allocation35_spill] sm:$0xff]  ;;  %v7003_v4 = vld [vmem:[#allocation36_spill] sm:$0xff] }
 0x65d   :  { %1748 = vmatprep.subr.mxu0 %v5203_v2  ;;  %1819 = vmatprep.subr.mxu1 %v5206_v18  ;;  %v7004_v2 = vld [vmem:[#allocation37_spill] sm:$0xff]  ;;  %v7005_v18 = vld [vmem:[#allocation38_spill] sm:$0xff] }
 0x65e   :  { %1749 = vmatpush1.msra.mxu0 %v5209_v54  ;;  %1820 = vmatpush1.msra.mxu1 %v5212_v34  ;;  %v7006_v54 = vld [vmem:[#allocation39_spill] sm:$0xff]  ;;  %v7007_v34 = vld [vmem:[#allocation40_spill] sm:$0xff] }
 0x65f   :  { %1750 = vmatprep.subr.mxu0 %v5215_v35  ;;  %1821 = vmatprep.subr.mxu1 %v5218_v37  ;;  %v7008_v35 = vld [vmem:[#allocation41_spill] sm:$0xff]  ;;  %v7009_v37 = vmov 0.0  }
 0x660   :  { %1751 = vmatpush1.msra.mxu0 %v6944_v22  ;;  %1822 = vmatpush1.msra.mxu1 %v6945_v23 }
 0x661   :  { %1752 = vmatprep.subr.mxu0 %v5227_v7  ;;  %1823 = vmatprep.subr.mxu1 %v5230_v58  ;;  %v7010_v58 = vld [vmem:[#allocation64_spill] sm:$0xff] }
 0x662   :  { %1753 = vmatpush1.msra.mxu0 %v5233_v59  ;;  %1824 = vmatpush1.msra.mxu1 %v5236_v5  ;;  %v6992_v5 = vld [vmem:[#allocation47_spill] sm:$0xff]  ;;  %v6993_v59 = vld [vmem:[#allocation45_spill] sm:$0xff] }
 0x663   :  { %1754 = vmatprep.subr.mxu0 %v5239_v38  ;;  %1825 = vmatprep.subr.mxu1 %v5242_v11  ;;  %v1975_v38 = vld [vmem:[#allocation10 + $0x1e8] sm:$0xff]  ;;  %v1977_v11 = vld [vmem:[#allocation10 + $0x1f8] sm:$0xff] }
 0x664   :  { %1755 = vmatpush1.msra.mxu0 %v5323_v24  ;;  %1826 = vmatpush1.msra.mxu1 %v5326_v25  ;;  %v7011_v25 = vld [vmem:[#allocation66_spill] sm:$0xff] }
 0x665   :  { %1756 = vmatprep.subr.mxu0 %v5329_v26  ;;  %1827 = vmatprep.subr.mxu1 %v5332_v28 }
 0x666   :  { %1757 = vmatpush1.msra.mxu0 %v5335_v29  ;;  %1828 = vmatpush1.msra.mxu1 %v5338_v31 }
 0x667   :  { %1758 = vmatprep.subr.mxu0 %v5341_v8  ;;  %1829 = vmatprep.subr.mxu1 %v5344_v39  ;;  %v7012_v8 = vld [vmem:[#allocation67_spill] sm:$0xff] }
 0x668   :  { %1759 = vmatpush1.msra.mxu0 %v5347_v40  ;;  %1830 = vmatpush1.msra.mxu1 %v5350_v41  ;;  %v7013_v40 = vld [vmem:[#allocation65_spill] sm:$0xff] }
 0x669   :  { %1760 = vmatprep.subr.mxu0 %v5353_v42  ;;  %1831 = vmatprep.subr.mxu1 %v5356_v43 }
 0x66a   :  { %1761 = vmatpush1.msra.mxu0 %v5359_v44  ;;  %1832 = vmatpush1.msra.mxu1 %v5362_v46 }
 0x66b   :  { %1762 = vmatprep.subr.mxu0 %v5365_v47  ;;  %1833 = vmatprep.subr.mxu1 %v5368_v48 }
 0x66c   :  { %1763 = vmatpush1.msra.mxu0 %v5371_v49  ;;  %1834 = vmatpush1.msra.mxu1 %v5374_v50 }
 0x66d   :  { %1764 = vmatprep.subr.mxu0 %v5377_v51  ;;  %1835 = vmatprep.subr.mxu1 %v5380_v52 }
 0x66e   :  { %1765 = vmatpush1.msra.mxu0 %v5383_v53  ;;  %1836 = vmatpush1.msra.mxu1 %v6992_v5  ;;  %v1964_v5 = vld [vmem:[#allocation10 + $0x190] sm:$0xff] }
 0x66f   :  { %1766 = vmatprep.subr.mxu0 %v6993_v59  ;;  %1837 = vmatprep.subr.mxu1 %v6994_v36  ;;  %v1959_v59 = vld [vmem:[#allocation10 + $0x168] sm:$0xff]  ;;  %v1961_v36 = vld [vmem:[#allocation10 + $0x178] sm:$0xff] }
 0x670   :  { %1767 = vmatpush1.msra.mxu0 %v6995_v0  ;;  %1838 = vmatpush1.msra.mxu1 %v6996_v45  ;;  %v1958_v0 = vld [vmem:[#allocation10 + $0x160] sm:$0xff]  ;;  %v1960_v45 = vld [vmem:[#allocation10 + $0x170] sm:$0xff] }
 0x671   :  { %1768 = vmatprep.subr.mxu0 %v6997_v3  ;;  %1839 = vmatprep.subr.mxu1 %v6998_v1  ;;  %v1955_v3 = vld [vmem:[#allocation10 + $0x148] sm:$0xff]  ;;  %v1957_v1 = vld [vmem:[#allocation10 + $0x158] sm:$0xff] }
 0x672   :  { %1769 = vmatpush1.msra.mxu0 %v6999_v63  ;;  %1840 = vmatpush1.msra.mxu1 %v7000_v62  ;;  %v1954_v63 = vld [vmem:[#allocation10 + $0x140] sm:$0xff]  ;;  %v1956_v62 = vld [vmem:[#allocation10 + $0x150] sm:$0xff] }
 0x673   :  { %1770 = vmatprep.subr.mxu0 %v7001_v10  ;;  %1841 = vmatprep.subr.mxu1 %v7002_v9  ;;  %v1951_v10 = vld [vmem:[#allocation10 + $0x128] sm:$0xff]  ;;  %v1953_v9 = vld [vmem:[#allocation10 + $0x138] sm:$0xff] }
 0x674   :  { %1771 = vmatpush1.msra.mxu0 %v7003_v4  ;;  %1842 = vmatpush1.msra.mxu1 %v7004_v2  ;;  %v1950_v4 = vld [vmem:[#allocation10 + $0x120] sm:$0xff]  ;;  %v1952_v2 = vld [vmem:[#allocation10 + $0x130] sm:$0xff] }
 0x675   :  { %1772 = vmatprep.subr.mxu0 %v7005_v18  ;;  %1843 = vmatprep.subr.mxu1 %v7006_v54  ;;  %v1947_v18 = vld [vmem:[#allocation10 + $0x108] sm:$0xff]  ;;  %v1949_v54 = vld [vmem:[#allocation10 + $0x118] sm:$0xff] }
 0x676   :  { %1773 = vmatpush1.msra.mxu0 %v7007_v34  ;;  %1844 = vmatpush1.msra.mxu1 %v7008_v35  ;;  %v1946_v34 = vld [vmem:[#allocation10 + $0x100] sm:$0xff]  ;;  %v1948_v35 = vld [vmem:[#allocation10 + $0x110] sm:$0xff] }
 0x677   :  { %1806 = vmatprep.mubr.f32.mxu0 %v7009_v37  ;;  %1877 = vmatprep.mubr.f32.mxu1 %v7009_v37 }
 0x678   :  { %2072 = vmatprep.subr.mxu0 %v1975_v38  ;;  %2185 = vmatprep.subr.mxu1 %v1977_v11  ;;  %v1943_v38 = vld [vmem:[#allocation10 + $0xe8] sm:$0xff]  ;;  %v1945_v11 = vld [vmem:[#allocation10 + $0xf8] sm:$0xff] }
 0x717   :  { %v1631_v7 = vpop.f32.mrf.mxu0  ;;  %v1702_v28 = vpop.f32.mrf.mxu1 }
 0x718   :  { %v1707_v22 = vadd.f32 %v1631_v7, %v7010_v58  ;;  %v1709_v41 = vadd.f32 %v1702_v28, %v7013_v40  ;;  %v1942_v7 = vld [vmem:[#allocation10 + $0xe0] sm:$0xff]  ;;  %v1944_v58 = vld [vmem:[#allocation10 + $0xf0] sm:$0xff]  ;;  %v1937_v28 = vld [vmem:[#allocation10 + $0xb8] sm:$0xff] }
 0x719   :  { %v1633_v23 = vpop.f32.mrf.mxu0  ;;  %v1704_v31 = vpop.f32.mrf.mxu1  ;;  %v1930_v40 = vld [vmem:[#allocation10 + $0x80] sm:$0xff] }
 0x71a   :  { %v3876_v24 = vmul.f32 -1.442695, %v1707_v22  ;;  %v1708_v26 = vadd.f32 %v1633_v23, %v7011_v25  ;;  %v1710_v39 = vadd.f32 %v1704_v31, %v7012_v8  ;;  %v1939_v22 = vld [vmem:[#allocation10 + $0xc8] sm:$0xff]  ;;  %v1941_v23 = vld [vmem:[#allocation10 + $0xd8] sm:$0xff]  ;;  %v1940_v25 = vld [vmem:[#allocation10 + $0xd0] sm:$0xff] }
 0x71b   :  { %v1936_v31 = vld [vmem:[#allocation10 + $0xb0] sm:$0xff]  ;;  %v1931_v8 = vld [vmem:[#allocation10 + $0x88] sm:$0xff] }
 0x71c   :  { %4068 = vpow2.f32 %v3876_v24  ;;  %v3877_v29 = vmul.f32 -1.442695, %v1708_v26  ;;  %v3878_v42 = vmul.f32 -1.442695, %v1710_v39  ;;  %v1938_v24 = vld [vmem:[#allocation10 + $0xc0] sm:$0xff]  ;;  %v1935_v26 = vld [vmem:[#allocation10 + $0xa8] sm:$0xff] }
 0x71d   :  { %v1933_v39 = vld [vmem:[#allocation10 + $0x98] sm:$0xff] }
 0x71e   :  { %4070 = vpow2.f32 %v3877_v29  ;;  %v1934_v29 = vld [vmem:[#allocation10 + $0xa0] sm:$0xff] }
 0x71f   :  { %4072 = vtanh.f32 %v1709_v41  ;;  %v1932_v41 = vld [vmem:[#allocation10 + $0x90] sm:$0xff] }
 0x720   :  { %4074 = vpow2.f32 %v3878_v42  ;;  %v1927_v42 = vld [vmem:[#allocation10 + $0x68] sm:$0xff] }
 0x729   :  { %v4069_v43 = vpop.eup %4068 }
 0x72a   :  { %v1714_v44 = vadd.f32 1.0, %v4069_v43  ;;  %v1929_v43 = vld [vmem:[#allocation10 + $0x78] sm:$0xff] }
 0x72b   :  { %v4071_v46 = vpop.eup %4070 }
 0x72c   :  { %4076 = vrcp.f32 %v1714_v44  ;;  %v1720_v47 = vadd.f32 1.0, %v4071_v46  ;;  %v4073_v48 = vpop.eup %4072  ;;  %v1926_v44 = vld [vmem:[#allocation10 + $0x60] sm:$0xff]  ;;  %v1928_v46 = vld [vmem:[#allocation10 + $0x70] sm:$0xff] }
 0x72d   :  { %v4075_v49 = vpop.eup %4074 }
 0x72e   :  { %4078 = vrcp.f32 %v1720_v47  ;;  %v1727_v53 = vadd.f32 1.0, %v4075_v49  ;;  %v1923_v47 = vld [vmem:[#allocation10 + $0x48] sm:$0xff]  ;;  %v1922_v49 = vld [vmem:[#allocation10 + $0x40] sm:$0xff] }
 0x730   :  { %4080 = vrcp.f32 %v1727_v53  ;;  %v1918_v53 = vld [vmem:[#allocation10 + $0x20] sm:$0xff] }
 0x739   :  { %v4077_v50 = vpop.eup %4076 }
 0x73a   :  { %v1731_v51 = vmul.f32 %v4077_v50, %v4073_v48  ;;  %v1925_v48 = vld [vmem:[#allocation10 + $0x58] sm:$0xff]  ;;  %v1924_v50 = vld [vmem:[#allocation10 + $0x50] sm:$0xff] }
 0x73b   :  { %v4079_v52 = vpop.eup %4078 }
 0x73c   :  { %v1730_v27 = vmul.f32 %v4079_v52, %v5524_v56  ;;  %v1963_v56 = vld [vmem:[#allocation10 + $0x188] sm:$0xff]  ;;  %v1921_v52 = vld [vmem:[#allocation10 + $0x38] sm:$0xff] }
 0x73d   :  { %v4081_v17 = vpop.eup %4080 }
 0x73e   :  { %v5600_v33 = vadd.f32 %v1731_v51, %v1730_v27  ;;  %v1919_v51 = vld [vmem:[#allocation10 + $0x28] sm:$0xff]  ;;  %v1920_v27 = vld [vmem:[#allocation10 + $0x30] sm:$0xff] }
 0x740   :  { %4082 = vtanh.f32 %v5600_v33 }
 0x74d   :  { %v4083_v20 = vpop.eup %4082 }
 0x74e   :  { %v5603_v30 = vmul.f32 %v4083_v20, %v4081_v17  ;;  %v1915_v17 = vld [vmem:[#allocation10 + $0x8] sm:$0xff]  ;;  %v1917_v20 = vld [vmem:[#allocation10 + $0x18] sm:$0xff] }
 0x750   :  { %1807 = vmatmul.mubr.f32.vlgmr.msra.gmra.mxu0 %v5603_v30  ;;  %1878 = vmatmul.mubr.f32.vlgmr.msra.gmra.mxu1 %v5603_v30 }
 0x751   :  { %2073 = vmatpush1.msra.mxu0 %v1974_v16  ;;  %2186 = vmatpush1.msra.mxu1 %v1976_v21  ;;  %v1914_v16 = vld [vmem:[#allocation10] sm:$0xff]  ;;  %v1916_v21 = vld [vmem:[#allocation10 + $0x10] sm:$0xff] }
 0x752   :  { %2074 = vmatprep.subr.mxu0 %v1971_v12  ;;  %2187 = vmatprep.subr.mxu1 %v1973_v19  ;;  %v7014_v12 = vld [vmem:[#allocation72_spill] sm:$0xff]  ;;  %v7015_v19 = vld [vmem:[#allocation23_spill] sm:$0xff] }
 0x753   :  { %2075 = vmatpush1.msra.mxu0 %v1970_v13  ;;  %2188 = vmatpush1.msra.mxu1 %v1972_v15  ;;  %v7016_v13 = vld [vmem:[#allocation26_spill] sm:$0xff] }
 0x754   :  { %2076 = vmatprep.subr.mxu0 %v1967_v60  ;;  %2189 = vmatprep.subr.mxu1 %v1969_v14  ;;  %v7017_v15 = vld [vmem:[#allocation46_spill] sm:$0xff]  ;;  %v5637_v14 = vld [vmem:[#allocation12 + $0x1e8] sm:$0xff] }
 0x755   :  { %2077 = vmatpush1.msra.mxu0 %v1966_v61  ;;  %2190 = vmatpush1.msra.mxu1 %v1968_v32  ;;  %v7018_v60 = vld [vmem:[#allocation42_spill] sm:$0xff]  ;;  %7019 = vst [vmem:[#allocation43_spill] sm:$0xff] %v5637_v14  ;;  %v5639_v61 = vld [vmem:[#allocation12 + $0x1f8] sm:$0xff] }
 0x756   :  { %2078 = vmatprep.subr.mxu0 %v1963_v56  ;;  %2191 = vmatprep.subr.mxu1 %v1965_v57  ;;  %7020 = vst [vmem:[#allocation48_spill] sm:$0xff] %v5639_v61  ;;  %v5645_v32 = vld [vmem:[#allocation12 + $0x1f0] sm:$0xff]  ;;  %v5651_v56 = vld [vmem:[#allocation12 + $0x1d8] sm:$0xff]  ;;  %v5655_v57 = vld [vmem:[#allocation12 + $0x1c0] sm:$0xff] }
 0x757   :  { %2079 = vmatpush1.msra.mxu0 %v1962_v55  ;;  %2192 = vmatpush1.msra.mxu1 %v1964_v5  ;;  %v5657_v55 = vld [vmem:[#allocation12 + $0x1d0] sm:$0xff]  ;;  %v5661_v5 = vld [vmem:[#allocation12 + $0x1a8] sm:$0xff] }
 0x758   :  { %2080 = vmatprep.subr.mxu0 %v1959_v59  ;;  %2193 = vmatprep.subr.mxu1 %v1961_v36  ;;  %v5663_v59 = vld [vmem:[#allocation12 + $0x1b8] sm:$0xff]  ;;  %v5667_v36 = vld [vmem:[#allocation12 + $0x1a0] sm:$0xff] }
 0x759   :  { %2081 = vmatpush1.msra.mxu0 %v1958_v0  ;;  %2194 = vmatpush1.msra.mxu1 %v1960_v45  ;;  %v5669_v0 = vld [vmem:[#allocation12 + $0x1b0] sm:$0xff]  ;;  %v5673_v45 = vld [vmem:[#allocation12 + $0x188] sm:$0xff] }
 0x75a   :  { %2082 = vmatprep.subr.mxu0 %v1955_v3  ;;  %2195 = vmatprep.subr.mxu1 %v1957_v1  ;;  %v5675_v3 = vld [vmem:[#allocation12 + $0x198] sm:$0xff]  ;;  %v5679_v1 = vld [vmem:[#allocation12 + $0x180] sm:$0xff] }
 0x75b   :  { %2083 = vmatpush1.msra.mxu0 %v1954_v63  ;;  %2196 = vmatpush1.msra.mxu1 %v1956_v62  ;;  %v5681_v63 = vld [vmem:[#allocation12 + $0x190] sm:$0xff]  ;;  %v5685_v62 = vld [vmem:[#allocation12 + $0x168] sm:$0xff] }
 0x75c   :  { %2084 = vmatprep.subr.mxu0 %v1951_v10  ;;  %2197 = vmatprep.subr.mxu1 %v1953_v9  ;;  %v5687_v10 = vld [vmem:[#allocation12 + $0x178] sm:$0xff]  ;;  %v5691_v9 = vld [vmem:[#allocation12 + $0x160] sm:$0xff] }
 0x75d   :  { %2085 = vmatpush1.msra.mxu0 %v1950_v4  ;;  %2198 = vmatpush1.msra.mxu1 %v1952_v2  ;;  %v5693_v4 = vld [vmem:[#allocation12 + $0x170] sm:$0xff]  ;;  %v5697_v2 = vld [vmem:[#allocation12 + $0x148] sm:$0xff] }
 0x75e   :  { %2086 = vmatprep.subr.mxu0 %v1947_v18  ;;  %2199 = vmatprep.subr.mxu1 %v1949_v54  ;;  %v5699_v18 = vld [vmem:[#allocation12 + $0x158] sm:$0xff]  ;;  %v5703_v54 = vld [vmem:[#allocation12 + $0x140] sm:$0xff] }
 0x75f   :  { %2087 = vmatpush1.msra.mxu0 %v1946_v34  ;;  %2200 = vmatpush1.msra.mxu1 %v1948_v35  ;;  %v5705_v34 = vld [vmem:[#allocation12 + $0x150] sm:$0xff]  ;;  %v5709_v35 = vld [vmem:[#allocation12 + $0x128] sm:$0xff] }
 0x760   :  { %2088 = vmatprep.subr.mxu0 %v1943_v38  ;;  %2201 = vmatprep.subr.mxu1 %v1945_v11  ;;  %v5711_v38 = vld [vmem:[#allocation12 + $0x138] sm:$0xff]  ;;  %v5715_v11 = vld [vmem:[#allocation12 + $0x120] sm:$0xff] }
 0x761   :  { %2089 = vmatpush1.msra.mxu0 %v1942_v7  ;;  %2202 = vmatpush1.msra.mxu1 %v1944_v58  ;;  %v5717_v7 = vld [vmem:[#allocation12 + $0x130] sm:$0xff]  ;;  %v5721_v58 = vld [vmem:[#allocation12 + $0x108] sm:$0xff] }
 0x762   :  { %2090 = vmatprep.subr.mxu0 %v1939_v22  ;;  %2203 = vmatprep.subr.mxu1 %v1941_v23  ;;  %v5723_v22 = vld [vmem:[#allocation12 + $0x118] sm:$0xff]  ;;  %v5727_v23 = vld [vmem:[#allocation12 + $0x100] sm:$0xff] }
 0x763   :  { %2091 = vmatpush1.msra.mxu0 %v1938_v24  ;;  %2204 = vmatpush1.msra.mxu1 %v1940_v25  ;;  %v5729_v24 = vld [vmem:[#allocation12 + $0x110] sm:$0xff]  ;;  %v5733_v25 = vld [vmem:[#allocation12 + $0xe8] sm:$0xff] }
 0x764   :  { %2092 = vmatprep.subr.mxu0 %v1935_v26  ;;  %2205 = vmatprep.subr.mxu1 %v1937_v28  ;;  %v5735_v26 = vld [vmem:[#allocation12 + $0xf8] sm:$0xff]  ;;  %v5739_v28 = vld [vmem:[#allocation12 + $0xe0] sm:$0xff] }
 0x765   :  { %2093 = vmatpush1.msra.mxu0 %v1934_v29  ;;  %2206 = vmatpush1.msra.mxu1 %v1936_v31  ;;  %v5741_v29 = vld [vmem:[#allocation12 + $0xf0] sm:$0xff]  ;;  %v5745_v31 = vld [vmem:[#allocation12 + $0xc8] sm:$0xff] }
 0x766   :  { %2094 = vmatprep.subr.mxu0 %v1931_v8  ;;  %2207 = vmatprep.subr.mxu1 %v1933_v39  ;;  %v5747_v8 = vld [vmem:[#allocation12 + $0xd8] sm:$0xff]  ;;  %v5751_v39 = vld [vmem:[#allocation12 + $0xc0] sm:$0xff] }
 0x767   :  { %2095 = vmatpush1.msra.mxu0 %v1930_v40  ;;  %2208 = vmatpush1.msra.mxu1 %v1932_v41  ;;  %v5753_v40 = vld [vmem:[#allocation12 + $0xd0] sm:$0xff]  ;;  %v5757_v41 = vld [vmem:[#allocation12 + $0xa8] sm:$0xff] }
 0x768   :  { %2096 = vmatprep.subr.mxu0 %v1927_v42  ;;  %2209 = vmatprep.subr.mxu1 %v1929_v43  ;;  %v5759_v42 = vld [vmem:[#allocation12 + $0xb8] sm:$0xff]  ;;  %v5763_v43 = vld [vmem:[#allocation12 + $0xa0] sm:$0xff] }
 0x769   :  { %2097 = vmatpush1.msra.mxu0 %v1926_v44  ;;  %2210 = vmatpush1.msra.mxu1 %v1928_v46  ;;  %v5765_v44 = vld [vmem:[#allocation12 + $0xb0] sm:$0xff]  ;;  %v5769_v46 = vld [vmem:[#allocation12 + $0x88] sm:$0xff] }
 0x76a   :  { %2098 = vmatprep.subr.mxu0 %v1923_v47  ;;  %2211 = vmatprep.subr.mxu1 %v1925_v48  ;;  %7021 = vst [vmem:[#allocation50_spill] sm:$0xff] %v5765_v44  ;;  %7022 = vst [vmem:[#allocation51_spill] sm:$0xff] %v5769_v46  ;;  %v5771_v47 = vld [vmem:[#allocation12 + $0x98] sm:$0xff]  ;;  %v5775_v48 = vld [vmem:[#allocation12 + $0x80] sm:$0xff] }
 0x76b   :  { %2099 = vmatpush1.msra.mxu0 %v1922_v49  ;;  %2212 = vmatpush1.msra.mxu1 %v1924_v50  ;;  %7023 = vst [vmem:[#allocation49_spill] sm:$0xff] %v5771_v47  ;;  %7024 = vst [vmem:[#allocation52_spill] sm:$0xff] %v5775_v48  ;;  %v5777_v49 = vld [vmem:[#allocation12 + $0x90] sm:$0xff]  ;;  %v5781_v50 = vld [vmem:[#allocation12 + $0x68] sm:$0xff] }
 0x76c   :  { %2100 = vmatprep.subr.mxu0 %v1919_v51  ;;  %2213 = vmatprep.subr.mxu1 %v1921_v52  ;;  %7025 = vst [vmem:[#allocation54_spill] sm:$0xff] %v5777_v49  ;;  %7026 = vst [vmem:[#allocation55_spill] sm:$0xff] %v5781_v50  ;;  %v5783_v51 = vld [vmem:[#allocation12 + $0x78] sm:$0xff]  ;;  %v5787_v52 = vld [vmem:[#allocation12 + $0x60] sm:$0xff] }
 0x76d   :  { %2101 = vmatpush1.msra.mxu0 %v1918_v53  ;;  %2214 = vmatpush1.msra.mxu1 %v1920_v27  ;;  %7027 = vst [vmem:[#allocation53_spill] sm:$0xff] %v5783_v51  ;;  %7028 = vst [vmem:[#allocation21_spill] sm:$0xff] %v5787_v52  ;;  %v5789_v53 = vld [vmem:[#allocation12 + $0x70] sm:$0xff]  ;;  %v5793_v27 = vld [vmem:[#allocation12 + $0x48] sm:$0xff] }
 0x76e   :  { %2102 = vmatprep.subr.mxu0 %v1915_v17  ;;  %2215 = vmatprep.subr.mxu1 %v1917_v20  ;;  %7029 = vst [vmem:[#allocation22_spill] sm:$0xff] %v5789_v53  ;;  %7030 = vst [vmem:[#allocation56_spill] sm:$0xff] %v5793_v27  ;;  %v5795_v17 = vld [vmem:[#allocation12 + $0x58] sm:$0xff]  ;;  %v5799_v20 = vld [vmem:[#allocation12 + $0x40] sm:$0xff] }
 0x76f   :  { %2103 = vmatpush1.msra.mxu0 %v1914_v16  ;;  %2136 = vmatprep.mubr.f32.mxu0 %v7009_v37  ;;  %7031 = vst [vmem:[#allocation58_spill] sm:$0xff] %v5795_v17  ;;  %7032 = vst [vmem:[#allocation59_spill] sm:$0xff] %v5799_v20  ;;  %v5801_v16 = vld [vmem:[#allocation12 + $0x50] sm:$0xff] }
 0x770   :  { %2216 = vmatpush1.msra.mxu1 %v1916_v21  ;;  %2249 = vmatprep.mubr.f32.mxu1 %v7009_v37  ;;  %7033 = vst [vmem:[#allocation57_spill] sm:$0xff] %v5801_v16  ;;  %v5805_v21 = vld [vmem:[#allocation12 + $0x28] sm:$0xff] }
 0x771   :  { %2137 = vmatmul.mubr.f32.vlgmr.msra.gmra.mxu0 %v7014_v12  ;;  %2250 = vmatmul.mubr.f32.vlgmr.msra.gmra.mxu1 %v7014_v12  ;;  %7034 = vst [vmem:[#allocation24_spill] sm:$0xff] %v5805_v21  ;;  %v5807_v12 = vld [vmem:[#allocation12 + $0x38] sm:$0xff] }
 0x772   :  { %2142 = vmatprep.mubr.f32.mxu0 %v7009_v37  ;;  %2255 = vmatprep.mubr.f32.mxu1 %v7009_v37  ;;  %7035 = vst [vmem:[#allocation25_spill] sm:$0xff] %v5807_v12 }
 0x773   :  { %2334 = vmatprep.subr.mxu0 %v5637_v14  ;;  %2405 = vmatprep.subr.mxu1 %v5639_v61 }
 0x774   :  { %2406 = vmatpush1.msra.mxu1 %v5645_v32 }
 0x775   :  { %2143 = vmatmul.mubr.f32.gmra.mxu0 %v7015_v19  ;;  %2256 = vmatmul.mubr.f32.gmra.mxu1 %v7015_v19  ;;  %v5811_v19 = vld [vmem:[#allocation12 + $0x20] sm:$0xff] }
 0x776   :  { %2148 = vmatprep.mubr.f32.mxu0 %v7009_v37  ;;  %2261 = vmatprep.mubr.f32.mxu1 %v7009_v37  ;;  %7036 = vst [vmem:[#allocation60_spill] sm:$0xff] %v5811_v19 }
 0x777   :  { %2407 = vmatprep.subr.mxu1 %v5651_v56 }
 0x778   :  { %2408 = vmatpush1.msra.mxu1 %v5657_v55 }
 0x779   :  { %2149 = vmatmul.mubr.f32.gmra.mxu0 %v7016_v13  ;;  %2262 = vmatmul.mubr.f32.gmra.mxu1 %v7016_v13  ;;  %v5813_v13 = vld [vmem:[#allocation12 + $0x30] sm:$0xff] }
 0x77a   :  { %2154 = vmatprep.mubr.f32.mxu0 %v7009_v37  ;;  %2267 = vmatprep.mubr.f32.mxu1 %v7009_v37  ;;  %7037 = vst [vmem:[#allocation62_spill] sm:$0xff] %v5813_v13 }
 0x77b   :  { %2409 = vmatprep.subr.mxu1 %v5663_v59 }
 0x77c   :  { %2410 = vmatpush1.msra.mxu1 %v5669_v0 }
 0x77d   :  { %2155 = vmatmul.mubr.f32.gmra.mxu0 %v7017_v15  ;;  %2268 = vmatmul.mubr.f32.gmra.mxu1 %v7017_v15  ;;  %v5817_v15 = vld [vmem:[#allocation12 + $0x8] sm:$0xff] }
 0x77e   :  { %2160 = vmatprep.mubr.f32.mxu0 %v7009_v37  ;;  %2273 = vmatprep.mubr.f32.mxu1 %v7009_v37  ;;  %7038 = vst [vmem:[#allocation63_spill] sm:$0xff] %v5817_v15 }
 0x77f   :  { %2411 = vmatprep.subr.mxu1 %v5675_v3 }
 0x780   :  { %2412 = vmatpush1.msra.mxu1 %v5681_v63 }
 0x781   :  { %2161 = vmatmul.mubr.f32.gmra.mxu0 %v7018_v60  ;;  %2274 = vmatmul.mubr.f32.gmra.mxu1 %v7018_v60  ;;  %v5819_v60 = vld [vmem:[#allocation12 + $0x18] sm:$0xff] }
 0x782   :  { %2166 = vmatprep.mubr.f32.mxu0 %v7009_v37  ;;  %2279 = vmatprep.mubr.f32.mxu1 %v7009_v37  ;;  %7039 = vst [vmem:[#allocation61_spill] sm:$0xff] %v5819_v60 }
 0x783   :  { %2413 = vmatprep.subr.mxu1 %v5687_v10 }
 0x784   :  { %2414 = vmatpush1.msra.mxu1 %v5693_v4 }
 0x785   :  { %2167 = vmatmul.mubr.f32.gmra.mxu0 %v5527_v6  ;;  %2280 = vmatmul.mubr.f32.gmra.mxu1 %v5527_v6  ;;  %v5643_v6 = vld [vmem:[#allocation12 + $0x1e0] sm:$0xff] }
 0x786   :  { %2172 = vmatprep.mubr.f32.mxu0 %v7009_v37  ;;  %2285 = vmatprep.mubr.f32.mxu1 %v7009_v37 }
 0x787   :  { %2335 = vmatpush1.msra.mxu0 %v5643_v6  ;;  %2415 = vmatprep.subr.mxu1 %v5699_v18 }
 0x788   :  { %2416 = vmatpush1.msra.mxu1 %v5705_v34 }
 0x789   :  { %2173 = vmatmul.mubr.f32.gmra.mxu0 %v5603_v30  ;;  %2286 = vmatmul.mubr.f32.gmra.mxu1 %v5603_v30  ;;  %v5649_v30 = vld [vmem:[#allocation12 + $0x1c8] sm:$0xff] }
 0x78a   :  { %2178 = vmatprep.mubr.f32.mxu0 %v7009_v37  ;;  %2291 = vmatprep.mubr.f32.mxu1 %v7009_v37 }
 0x78b   :  { %2336 = vmatprep.subr.mxu0 %v5649_v30  ;;  %2417 = vmatprep.subr.mxu1 %v5711_v38 }
 0x78c   :  { %2337 = vmatpush1.msra.mxu0 %v5655_v57  ;;  %2418 = vmatpush1.msra.mxu1 %v5717_v7 }
 0x78d   :  { %2338 = vmatprep.subr.mxu0 %v5661_v5  ;;  %2419 = vmatprep.subr.mxu1 %v5723_v22 }
 0x78e   :  { %2339 = vmatpush1.msra.mxu0 %v5667_v36  ;;  %2420 = vmatpush1.msra.mxu1 %v5729_v24 }
 0x78f   :  { %2340 = vmatprep.subr.mxu0 %v5673_v45  ;;  %2421 = vmatprep.subr.mxu1 %v5735_v26 }
 0x790   :  { %2341 = vmatpush1.msra.mxu0 %v5679_v1  ;;  %2422 = vmatpush1.msra.mxu1 %v5741_v29 }
 0x791   :  { %2342 = vmatprep.subr.mxu0 %v5685_v62  ;;  %2423 = vmatprep.subr.mxu1 %v5747_v8 }
 0x792   :  { %2343 = vmatpush1.msra.mxu0 %v5691_v9  ;;  %2424 = vmatpush1.msra.mxu1 %v5753_v40 }
 0x793   :  { %2344 = vmatprep.subr.mxu0 %v5697_v2  ;;  %2425 = vmatprep.subr.mxu1 %v5759_v42 }
 0x794   :  { %2345 = vmatpush1.msra.mxu0 %v5703_v54  ;;  %2426 = vmatpush1.msra.mxu1 %v5765_v44 }
 0x795   :  { %2346 = vmatprep.subr.mxu0 %v5709_v35  ;;  %2427 = vmatprep.subr.mxu1 %v5771_v47 }
 0x796   :  { %2347 = vmatpush1.msra.mxu0 %v5715_v11  ;;  %2428 = vmatpush1.msra.mxu1 %v5777_v49 }
 0x797   :  { %2348 = vmatprep.subr.mxu0 %v5721_v58  ;;  %2429 = vmatprep.subr.mxu1 %v5783_v51  ;;  %v7044_v51 = vld [vmem:[#allocation71_spill] sm:$0xff] }
 0x798   :  { %2349 = vmatpush1.msra.mxu0 %v5727_v23  ;;  %2430 = vmatpush1.msra.mxu1 %v5789_v53 }
 0x799   :  { %2350 = vmatprep.subr.mxu0 %v5733_v25  ;;  %2431 = vmatprep.subr.mxu1 %v5795_v17 }
 0x79a   :  { %2351 = vmatpush1.msra.mxu0 %v5739_v28  ;;  %2432 = vmatpush1.msra.mxu1 %v5801_v16  ;;  %v5821_v16 = vld [vmem:[#allocation12] sm:$0xff] }
 0x79b   :  { %2352 = vmatprep.subr.mxu0 %v5745_v31  ;;  %2433 = vmatprep.subr.mxu1 %v5807_v12  ;;  %7040 = vst [vmem:[#allocation47_spill] sm:$0xff] %v5821_v16 }
 0x79c   :  { %2353 = vmatpush1.msra.mxu0 %v5751_v39  ;;  %2434 = vmatpush1.msra.mxu1 %v5813_v13 }
 0x79d   :  { %2354 = vmatprep.subr.mxu0 %v5757_v41  ;;  %2435 = vmatprep.subr.mxu1 %v5819_v60 }
 0x79e   :  { %2355 = vmatpush1.msra.mxu0 %v5763_v43 }
 0x79f   :  { %2356 = vmatprep.subr.mxu0 %v5769_v46 }
 0x7a0   :  { %2357 = vmatpush1.msra.mxu0 %v5775_v48 }
 0x7a1   :  { %2358 = vmatprep.subr.mxu0 %v5781_v50  ;;  %v7045_v50 = vld [vmem:[#allocation69_spill] sm:$0xff] }
 0x7a2   :  { %2359 = vmatpush1.msra.mxu0 %v5787_v52 }
 0x7a3   :  { %2360 = vmatprep.subr.mxu0 %v5793_v27  ;;  %v7043_v27 = vld [vmem:[#allocation70_spill] sm:$0xff] }
 0x7a4   :  { %2361 = vmatpush1.msra.mxu0 %v5799_v20 }
 0x7a5   :  { %2362 = vmatprep.subr.mxu0 %v5805_v21  ;;  %v5825_v21 = vld [vmem:[#allocation12 + $0x10] sm:$0xff] }
 0x7a6   :  { %2363 = vmatpush1.msra.mxu0 %v5811_v19  ;;  %7041 = vst [vmem:[#allocation45_spill] sm:$0xff] %v5825_v21  ;;  %2436 = vmatpush1.msra.mxu1 %v5825_v21  ;;  %v7042_v19 = vld [vmem:[#allocation68_spill] sm:$0xff] }
 0x7a7   :  { %2364 = vmatprep.subr.mxu0 %v5817_v15  ;;  %2580 = vmatprep.subr.mxu1 %v5639_v61 }
 0x7a8   :  { %2365 = vmatpush1.msra.mxu0 %v5821_v16 }
 0x7a9   :  { %2509 = vmatprep.subr.mxu0 %v5637_v14 }
 0x810   :  { %v1808_v13 = vpop.f32.mrf.mxu0  ;;  %v1879_v15 = vpop.f32.mrf.mxu1 }
 0x811   :  { %v1884_v12 = vadd.f32 %v1808_v13, %v7042_v19  ;;  %v1886_v21 = vadd.f32 %v1879_v15, %v7045_v50  ;;  %v7052_v15 = vld [vmem:[#allocation56_spill] sm:$0xff] }
 0x812   :  { %v1810_v20 = vpop.f32.mrf.mxu0  ;;  %v1881_v52 = vpop.f32.mrf.mxu1 }
 0x813   :  { %v3879_v17 = vmul.f32 -1.442695, %v1884_v12  ;;  %v1885_v53 = vadd.f32 %v1810_v20, %v7043_v27  ;;  %v1887_v16 = vadd.f32 %v1881_v52, %v7044_v51 }
 0x815   :  { %4084 = vpow2.f32 %v3879_v17  ;;  %v3880_v60 = vmul.f32 -1.442695, %v1885_v53  ;;  %v3881_v49 = vmul.f32 -1.442695, %v1887_v16  ;;  %v7050_v16 = vld [vmem:[#allocation21_spill] sm:$0xff] }
 0x817   :  { %4086 = vpow2.f32 %v3880_v60 }
 0x818   :  { %4088 = vtanh.f32 %v1886_v21  ;;  %v7051_v21 = vld [vmem:[#allocation22_spill] sm:$0xff] }
 0x819   :  { %4090 = vpow2.f32 %v3881_v49  ;;  %v7049_v49 = vld [vmem:[#allocation53_spill] sm:$0xff] }
 0x822   :  { %v4085_v14 = vpop.eup %4084 }
 0x823   :  { %v1891_v48 = vadd.f32 1.0, %v4085_v14 }
 0x824   :  { %v4087_v61 = vpop.eup %4086 }
 0x825   :  { %4092 = vrcp.f32 %v1891_v48  ;;  %v1897_v19 = vadd.f32 1.0, %v4087_v61  ;;  %v4089_v12 = vpop.eup %4088  ;;  %v7047_v61 = vld [vmem:[#allocation54_spill] sm:$0xff]  ;;  %v7048_v48 = vld [vmem:[#allocation55_spill] sm:$0xff] }
 0x826   :  { %v4091_v27 = vpop.eup %4090 }
 0x827   :  { %4094 = vrcp.f32 %v1897_v19  ;;  %v1904_v13 = vadd.f32 1.0, %v4091_v27  ;;  %v7053_v19 = vld [vmem:[#allocation58_spill] sm:$0xff]  ;;  %v7055_v27 = vld [vmem:[#allocation57_spill] sm:$0xff] }
 0x829   :  { %4096 = vrcp.f32 %v1904_v13  ;;  %v7059_v13 = vld [vmem:[#allocation62_spill] sm:$0xff] }
 0x832   :  { %v4093_v17 = vpop.eup %4092 }
 0x833   :  { %v1908_v20 = vmul.f32 %v4093_v17, %v4089_v12  ;;  %v7054_v12 = vld [vmem:[#allocation59_spill] sm:$0xff]  ;;  %v7056_v17 = vld [vmem:[#allocation24_spill] sm:$0xff] }
 0x834   :  { %v4095_v53 = vpop.eup %4094 }
 0x835   :  { %v1907_v60 = vmul.f32 %v4095_v53, %v5600_v33  ;;  %v7046_v33 = vld [vmem:[#allocation52_spill] sm:$0xff] }
 0x836   :  { %v4097_v50 = vpop.eup %4096  ;;  %v7058_v53 = vld [vmem:[#allocation60_spill] sm:$0xff] }
 0x837   :  { %v1909_v51 = vadd.f32 %v1908_v20, %v1907_v60  ;;  %v7057_v20 = vld [vmem:[#allocation25_spill] sm:$0xff]  ;;  %v7060_v60 = vld [vmem:[#allocation63_spill] sm:$0xff] }
 0x839   :  { %4098 = vtanh.f32 %v1909_v51  ;;  %v7061_v51 = vld [vmem:[#allocation61_spill] sm:$0xff] }
 0x846   :  { %v4099_v52 = vpop.eup %4098 }
 0x847   :  { %v1911_v14 = vmul.f32 %v4099_v52, %v4097_v50  ;;  %v7062_v50 = vld [vmem:[#allocation47_spill] sm:$0xff]  ;;  %v7063_v52 = vld [vmem:[#allocation45_spill] sm:$0xff] }
 0x849   :  { %2179 = vmatmul.mubr.f32.gmra.mxu0 %v1911_v14  ;;  %2292 = vmatmul.mubr.f32.gmra.mxu1 %v1911_v14  ;;  %v7064_v14 = vld [vmem:[#allocation43_spill] sm:$0xff] }
 0x84a   :  { %2398 = vmatprep.mubr.f32.mxu0 %v7009_v37  ;;  %2469 = vmatprep.mubr.f32.mxu1 %v7009_v37 }
 0x84d   :  { %2399 = vmatmul.mubr.f32.vlgmr.msra.gmra.mxu0 %v7009_v37  ;;  %2470 = vmatmul.mubr.f32.vlgmr.msra.gmra.mxu1 %v7009_v37 }
 0x84e   :  { %2510 = vmatpush1.msra.mxu0 %v5643_v6  ;;  %2581 = vmatpush1.msra.mxu1 %v5645_v32 }
 0x84f   :  { %2511 = vmatprep.subr.mxu0 %v5649_v30  ;;  %2582 = vmatprep.subr.mxu1 %v5651_v56 }
 0x850   :  { %2512 = vmatpush1.msra.mxu0 %v5655_v57  ;;  %2583 = vmatpush1.msra.mxu1 %v5657_v55 }
 0x851   :  { %2513 = vmatprep.subr.mxu0 %v5661_v5  ;;  %2584 = vmatprep.subr.mxu1 %v5663_v59 }
 0x852   :  { %2514 = vmatpush1.msra.mxu0 %v5667_v36  ;;  %2585 = vmatpush1.msra.mxu1 %v5669_v0 }
 0x853   :  { %2515 = vmatprep.subr.mxu0 %v5673_v45  ;;  %2586 = vmatprep.subr.mxu1 %v5675_v3 }
 0x854   :  { %2516 = vmatpush1.msra.mxu0 %v5679_v1  ;;  %2587 = vmatpush1.msra.mxu1 %v5681_v63 }
 0x855   :  { %2517 = vmatprep.subr.mxu0 %v5685_v62  ;;  %2588 = vmatprep.subr.mxu1 %v5687_v10 }
 0x856   :  { %2518 = vmatpush1.msra.mxu0 %v5691_v9  ;;  %2589 = vmatpush1.msra.mxu1 %v5693_v4 }
 0x857   :  { %2519 = vmatprep.subr.mxu0 %v5697_v2  ;;  %2590 = vmatprep.subr.mxu1 %v5699_v18 }
 0x858   :  { %2520 = vmatpush1.msra.mxu0 %v5703_v54  ;;  %2591 = vmatpush1.msra.mxu1 %v5705_v34 }
 0x859   :  { %2521 = vmatprep.subr.mxu0 %v5709_v35  ;;  %2592 = vmatprep.subr.mxu1 %v5711_v38 }
 0x85a   :  { %2522 = vmatpush1.msra.mxu0 %v5715_v11  ;;  %2593 = vmatpush1.msra.mxu1 %v5717_v7 }
 0x85b   :  { %2523 = vmatprep.subr.mxu0 %v5721_v58  ;;  %2594 = vmatprep.subr.mxu1 %v5723_v22 }
 0x85c   :  { %2524 = vmatpush1.msra.mxu0 %v5727_v23  ;;  %2595 = vmatpush1.msra.mxu1 %v5729_v24 }
 0x85d   :  { %2525 = vmatprep.subr.mxu0 %v5733_v25  ;;  %2596 = vmatprep.subr.mxu1 %v5735_v26 }
 0x85e   :  { %2526 = vmatpush1.msra.mxu0 %v5739_v28  ;;  %2597 = vmatpush1.msra.mxu1 %v5741_v29 }
 0x85f   :  { %2527 = vmatprep.subr.mxu0 %v5745_v31  ;;  %2598 = vmatprep.subr.mxu1 %v5747_v8 }
 0x860   :  { %2528 = vmatpush1.msra.mxu0 %v5751_v39  ;;  %2599 = vmatpush1.msra.mxu1 %v5753_v40 }
 0x861   :  { %2529 = vmatprep.subr.mxu0 %v5757_v41  ;;  %2600 = vmatprep.subr.mxu1 %v5759_v42 }
 0x862   :  { %2530 = vmatpush1.msra.mxu0 %v5763_v43  ;;  %2601 = vmatpush1.msra.mxu1 %v5765_v44 }
 0x863   :  { %2531 = vmatprep.subr.mxu0 %v5769_v46  ;;  %2602 = vmatprep.subr.mxu1 %v5771_v47 }
 0x864   :  { %2532 = vmatpush1.msra.mxu0 %v7046_v33  ;;  %2603 = vmatpush1.msra.mxu1 %v7047_v61 }
 0x865   :  { %2533 = vmatprep.subr.mxu0 %v7048_v48  ;;  %2604 = vmatprep.subr.mxu1 %v7049_v49 }
 0x866   :  { %2534 = vmatpush1.msra.mxu0 %v7050_v16  ;;  %2605 = vmatpush1.msra.mxu1 %v7051_v21 }
 0x867   :  { %2535 = vmatprep.subr.mxu0 %v7052_v15  ;;  %2606 = vmatprep.subr.mxu1 %v7053_v19 }
 0x868   :  { %2536 = vmatpush1.msra.mxu0 %v7054_v12  ;;  %2607 = vmatpush1.msra.mxu1 %v7055_v27 }
 0x869   :  { %2537 = vmatprep.subr.mxu0 %v7056_v17  ;;  %2608 = vmatprep.subr.mxu1 %v7057_v20  ;;  %v7065_v17 = vld [vmem:[#allocation48_spill] sm:$0xff]  ;;  %v2138_v20 = vpop.f32.mrf.mxu0 }
 0x86a   :  { %2538 = vmatpush1.msra.mxu0 %v7058_v53  ;;  %2609 = vmatpush1.msra.mxu1 %v7059_v13  ;;  %v2251_v53 = vpop.f32.mrf.mxu1 }
 0x86b   :  { %2539 = vmatprep.subr.mxu0 %v7060_v60  ;;  %2610 = vmatprep.subr.mxu1 %v7061_v51  ;;  %v2140_v27 = vpop.f32.mrf.mxu0 }
 0x86c   :  { %2540 = vmatpush1.msra.mxu0 %v7062_v50  ;;  %2573 = vmatprep.mubr.f32.mxu0 %v7009_v37  ;;  %v2253_v13 = vpop.f32.mrf.mxu1 }
 0x86d   :  { %2611 = vmatpush1.msra.mxu1 %v7063_v52  ;;  %2644 = vmatprep.mubr.f32.mxu1 %v7009_v37  ;;  %v5906_v12 = vpop.f32.mrf.mxu0 }
 0x86e   :  { %2684 = vmatprep.subr.mxu0 %v7064_v14  ;;  %2755 = vmatprep.subr.mxu1 %v7065_v17  ;;  %7066 = vst [vmem:[#allocation27_spill] sm:$0xff] %v5906_v12  ;;  %v5908_v60 = vpop.f32.mrf.mxu1 }
 0x86f   :  { %7067 = vst [vmem:[#allocation28_spill] sm:$0xff] %v5908_v60  ;;  %v5910_v51 = vpop.f32.mrf.mxu0 }
 0x870   :  { %7068 = vst [vmem:[#allocation29_spill] sm:$0xff] %v5910_v51  ;;  %v5912_v50 = vpop.f32.mrf.mxu1 }
 0x871   :  { %7069 = vst [vmem:[#allocation30_spill] sm:$0xff] %v5912_v50  ;;  %v5914_v19 = vpop.f32.mrf.mxu0 }
 0x872   :  { %7070 = vst [vmem:[#allocation31_spill] sm:$0xff] %v5914_v19  ;;  %v5916_v52 = vpop.f32.mrf.mxu1 }
 0x873   :  { %7071 = vst [vmem:[#allocation32_spill] sm:$0xff] %v5916_v52  ;;  %v5918_v37 = vpop.f32.mrf.mxu0 }
 0x874   :  { %7072 = vst [vmem:[#allocation33_spill] sm:$0xff] %v5918_v37  ;;  %v5920_v14 = vpop.f32.mrf.mxu1 }
 0x875   :  { %7073 = vst [vmem:[#allocation34_spill] sm:$0xff] %v5920_v14  ;;  %v5922_v17 = vpop.f32.mrf.mxu0 }
 0x876   :  { %7074 = vst [vmem:[#allocation35_spill] sm:$0xff] %v5922_v17  ;;  %v5924_v15 = vpop.f32.mrf.mxu1 }
 0x877   :  { %7075 = vst [vmem:[#allocation36_spill] sm:$0xff] %v5924_v15  ;;  %v5926_v21 = vpop.f32.mrf.mxu0 }
 0x878   :  { %7076 = vst [vmem:[#allocation37_spill] sm:$0xff] %v5926_v21  ;;  %v5928_v12 = vpop.f32.mrf.mxu1 }
 0x879   :  { %7077 = vst [vmem:[#allocation38_spill] sm:$0xff] %v5928_v12  ;;  %v5930_v60 = vpop.f32.mrf.mxu0 }
 0x87a   :  { %7078 = vst [vmem:[#allocation39_spill] sm:$0xff] %v5930_v60  ;;  %v5932_v51 = vpop.f32.mrf.mxu1 }
 0x87b   :  { %7079 = vst [vmem:[#allocation40_spill] sm:$0xff] %v5932_v51  ;;  %v5934_v50 = vpop.f32.mrf.mxu0  ;;  %v2042_v51 = vld [vmem:[%s6620_s6] sm:$0xf] }
 0x87c   :  { %7080 = vst [vmem:[#allocation41_spill] sm:$0xff] %v5934_v50  ;;  %v5936_v19 = vpop.f32.mrf.mxu1  ;;  %v7089_v50 = vld [vmem:[#allocation44_spill] sm:$0xff] }
 0x87d   :  { %7081 = vst [vmem:[#allocation64_spill] sm:$0xff] %v5936_v19  ;;  %v5938_v52 = vpop.f32.mrf.mxu0  ;;  %v7090_v19 = vsub.s32 0, %v7089_v50 }
 0x87e   :  { %7082 = vst [vmem:[#allocation66_spill] sm:$0xff] %v5938_v52  ;;  %v5940_v37 = vpop.f32.mrf.mxu1 }
 0x87f   :  { %7083 = vst [vmem:[#allocation67_spill] sm:$0xff] %v5940_v37  ;;  %v5942_v14 = vpop.f32.mrf.mxu0  ;;  %v5957_v12 = vrot.slane %v2042_v51, %v7090_v19 }
 0x880   :  { %7084 = vst [vmem:[#allocation65_spill] sm:$0xff] %v5942_v14  ;;  %v5944_v17 = vpop.f32.mrf.mxu1 }
 0x881   :  { %7085 = vst [vmem:[#allocation72_spill] sm:$0xff] %v5944_v17  ;;  %v5946_v15 = vpop.f32.mrf.mxu0  ;;  %7091 = vst [vmem:[#allocation42_spill] sm:$0xff] %v5957_v12  ;;  %v7094_v17 = vsub.s32 1, %v7089_v50  ;;  %v2139_v16 = vadd.f32 %v2138_v20, %v5957_v12 }
 0x882   :  { %7086 = vst [vmem:[#allocation23_spill] sm:$0xff] %v5946_v15  ;;  %v5948_v21 = vpop.f32.mrf.mxu1 }
 0x883   :  { %7087 = vst [vmem:[#allocation26_spill] sm:$0xff] %v5948_v21  ;;  %v5953_v60 = vpop.f32.mrf.mxu0  ;;  %v5965_v14 = vrot.slane %v2042_v51, %v7094_v17  ;;  %v7098_v17 = vsub.s32 3, %v7089_v50 }
 0x884   :  { %7088 = vst [vmem:[#allocation46_spill] sm:$0xff] %v5953_v60  ;;  %v5959_v52 = vpop.f32.mrf.mxu1 }
 0x885   :  { %7092 = vst [vmem:[#allocation68_spill] sm:$0xff] %v5959_v52  ;;  %v2141_v60 = vadd.f32 %v2140_v27, %v5965_v14  ;;  %v5977_v46 = vrot.slane %v2042_v51, %v7098_v17 }
 0x887   :  { %7099 = vst [vmem:[#allocation73_spill] sm:$0xff] %v5977_v46  ;;  %v2254_v20 = vadd.f32 %v2253_v13, %v5977_v46 }
 0x909   :  { %v5961_v37 = vpop.f32.mrf.mxu0  ;;  %v5967_v15 = vpop.f32.mrf.mxu1 }
 0x90a   :  { %7093 = vst [vmem:[#allocation70_spill] sm:$0xff] %v5961_v37  ;;  %7095 = vst [vmem:[#allocation71_spill] sm:$0xff] %v5967_v15 }
 0x90b   :  { %v5969_v21 = vpop.f32.mrf.mxu0  ;;  %v5973_v48 = vpop.f32.mrf.mxu1 }
 0x90c   :  { %7096 = vst [vmem:[#allocation69_spill] sm:$0xff] %v5969_v21  ;;  %7097 = vst [vmem:[#allocation44_spill] sm:$0xff] %v5973_v48  ;;  %v7100_v21 = vsub.s32 2, %v7089_v50 }
 0x90d   :  { %v2400_v49 = vpop.f32.mrf.mxu0  ;;  %v2471_v37 = vpop.f32.mrf.mxu1 }
 0x90e   :  { %v2476_v19 = vadd.f32 %v2400_v49, %v2139_v16  ;;  %v5982_v27 = vrot.slane %v2042_v51, %v7100_v21 }
 0x90f   :  { %v2402_v61 = vpop.f32.mrf.mxu0  ;;  %v2473_v15 = vpop.f32.mrf.mxu1 }
 0x910   :  { %v3882_v52 = vmul.f32 -1.442695, %v2476_v19  ;;  %v2477_v33 = vadd.f32 %v2402_v61, %v2141_v60  ;;  %v2479_v48 = vadd.f32 %v2473_v15, %v2254_v20  ;;  %v2252_v49 = vadd.f32 %v2251_v53, %v5982_v27  ;;  %v7102_v20 = vld [vmem:[#allocation49_spill] sm:$0xff] }
 0x912   :  { %4100 = vpow2.f32 %v3882_v52  ;;  %v3883_v47 = vmul.f32 -1.442695, %v2477_v33  ;;  %v3884_v16 = vmul.f32 -1.442695, %v2479_v48  ;;  %v2478_v60 = vadd.f32 %v2471_v37, %v2252_v49  ;;  %v7103_v49 = vld [vmem:[#allocation52_spill] sm:$0xff] }
 0x914   :  { %4102 = vpow2.f32 %v3883_v47 }
 0x915   :  { %4104 = vpow2.f32 %v3884_v16  ;;  %v7104_v16 = vld [vmem:[#allocation54_spill] sm:$0xff] }
 0x91f   :  { %v4101_v61 = vpop.eup %4100 }
 0x920   :  { %v2483_v52 = vadd.f32 1.0, %v4101_v61  ;;  %v7105_v61 = vld [vmem:[#allocation55_spill] sm:$0xff] }
 0x921   :  { %v4103_v33 = vpop.eup %4102 }
 0x922   :  { %4106 = vrcp.f32 %v2483_v52  ;;  %v2489_v19 = vadd.f32 1.0, %v4103_v33  ;;  %v4105_v47 = vpop.eup %4104  ;;  %v7107_v52 = vld [vmem:[#allocation21_spill] sm:$0xff]  ;;  %v7108_v33 = vld [vmem:[#allocation22_spill] sm:$0xff] }
 0x923   :  { %4108 = vtanh.f32 %v2478_v60  ;;  %v2496_v50 = vadd.f32 1.0, %v4105_v47  ;;  %v7106_v60 = vld [vmem:[#allocation53_spill] sm:$0xff]  ;;  %v7110_v47 = vld [vmem:[#allocation58_spill] sm:$0xff] }
 0x924   :  { %4110 = vrcp.f32 %v2489_v19  ;;  %v7109_v19 = vld [vmem:[#allocation56_spill] sm:$0xff] }
 0x925   :  { %4112 = vrcp.f32 %v2496_v50  ;;  %v7113_v50 = vld [vmem:[#allocation24_spill] sm:$0xff] }
 0x92f   :  { %v4107_v17 = vpop.eup %4106 }
 0x930   :  { %v4109_v13 = vpop.eup %4108 }
 0x931   :  { %v4111_v46 = vpop.eup %4110  ;;  %v2500_v51 = vmul.f32 %v4109_v13, %v4107_v17  ;;  %v7111_v17 = vld [vmem:[#allocation59_spill] sm:$0xff]  ;;  %v7112_v13 = vld [vmem:[#allocation57_spill] sm:$0xff] }
 0x932   :  { %v2499_v21 = vmul.f32 0.0, %v4111_v46  ;;  %v4113_v37 = vpop.eup %4112  ;;  %v7101_v46 = vld [vmem:[#allocation51_spill] sm:$0xff] }
 0x934   :  { %v5985_v15 = vadd.f32 %v2500_v51, %v2499_v21  ;;  %v7114_v21 = vld [vmem:[#allocation25_spill] sm:$0xff]  ;;  %v7115_v51 = vld [vmem:[#allocation60_spill] sm:$0xff] }
 0x936   :  { %4114 = vtanh.f32 %v5985_v15 }
 0x943   :  { %v4115_v48 = vpop.eup %4114 }
 0x944   :  { %v2503_v53 = vmul.f32 %v4115_v48, %v4113_v37  ;;  %v7116_v37 = vld [vmem:[#allocation62_spill] sm:$0xff]  ;;  %v7117_v48 = vld [vmem:[#allocation63_spill] sm:$0xff] }
 0x946   :  { %2574 = vmatmul.mubr.f32.vlgmr.msra.gmra.mxu0 %v2503_v53  ;;  %2645 = vmatmul.mubr.f32.vlgmr.msra.gmra.mxu1 %v2503_v53  ;;  %v7118_v53 = vld [vmem:[#allocation61_spill] sm:$0xff] }
 0x947   :  { %2685 = vmatpush1.msra.mxu0 %v5643_v6  ;;  %2756 = vmatpush1.msra.mxu1 %v5645_v32 }
 0x948   :  { %2686 = vmatprep.subr.mxu0 %v5649_v30  ;;  %2757 = vmatprep.subr.mxu1 %v5651_v56 }
 0x949   :  { %2687 = vmatpush1.msra.mxu0 %v5655_v57  ;;  %2758 = vmatpush1.msra.mxu1 %v5657_v55 }
 0x94a   :  { %2688 = vmatprep.subr.mxu0 %v5661_v5  ;;  %2759 = vmatprep.subr.mxu1 %v5663_v59 }
 0x94b   :  { %2689 = vmatpush1.msra.mxu0 %v5667_v36  ;;  %2760 = vmatpush1.msra.mxu1 %v5669_v0 }
 0x94c   :  { %2690 = vmatprep.subr.mxu0 %v5673_v45  ;;  %2761 = vmatprep.subr.mxu1 %v5675_v3 }
 0x94d   :  { %2691 = vmatpush1.msra.mxu0 %v5679_v1  ;;  %2762 = vmatpush1.msra.mxu1 %v5681_v63 }
 0x94e   :  { %2692 = vmatprep.subr.mxu0 %v5685_v62  ;;  %2763 = vmatprep.subr.mxu1 %v5687_v10 }
 0x94f   :  { %2693 = vmatpush1.msra.mxu0 %v5691_v9  ;;  %2764 = vmatpush1.msra.mxu1 %v5693_v4 }
 0x950   :  { %2694 = vmatprep.subr.mxu0 %v5697_v2  ;;  %2765 = vmatprep.subr.mxu1 %v5699_v18 }
 0x951   :  { %2695 = vmatpush1.msra.mxu0 %v5703_v54  ;;  %2766 = vmatpush1.msra.mxu1 %v5705_v34 }
 0x952   :  { %2696 = vmatprep.subr.mxu0 %v5709_v35  ;;  %2767 = vmatprep.subr.mxu1 %v5711_v38 }
 0x953   :  { %2697 = vmatpush1.msra.mxu0 %v5715_v11  ;;  %2768 = vmatpush1.msra.mxu1 %v5717_v7 }
 0x954   :  { %2698 = vmatprep.subr.mxu0 %v5721_v58  ;;  %2769 = vmatprep.subr.mxu1 %v5723_v22 }
 0x955   :  { %2699 = vmatpush1.msra.mxu0 %v5727_v23  ;;  %2770 = vmatpush1.msra.mxu1 %v5729_v24 }
 0x956   :  { %2700 = vmatprep.subr.mxu0 %v5733_v25  ;;  %2771 = vmatprep.subr.mxu1 %v5735_v26 }
 0x957   :  { %2701 = vmatpush1.msra.mxu0 %v5739_v28  ;;  %2772 = vmatpush1.msra.mxu1 %v5741_v29 }
 0x958   :  { %2702 = vmatprep.subr.mxu0 %v5745_v31  ;;  %2773 = vmatprep.subr.mxu1 %v5747_v8 }
 0x959   :  { %2703 = vmatpush1.msra.mxu0 %v5751_v39  ;;  %2774 = vmatpush1.msra.mxu1 %v5753_v40 }
 0x95a   :  { %2704 = vmatprep.subr.mxu0 %v5757_v41  ;;  %2775 = vmatprep.subr.mxu1 %v5759_v42 }
 0x95b   :  { %2705 = vmatpush1.msra.mxu0 %v5763_v43  ;;  %2776 = vmatpush1.msra.mxu1 %v5765_v44 }
 0x95c   :  { %2706 = vmatprep.subr.mxu0 %v7101_v46  ;;  %2777 = vmatprep.subr.mxu1 %v7102_v20  ;;  %v7128_v20 = vld [vmem:[#allocation28_spill] sm:$0xff] }
 0x95d   :  { %2707 = vmatpush1.msra.mxu0 %v7103_v49  ;;  %2778 = vmatpush1.msra.mxu1 %v7104_v16  ;;  %v7126_v16 = vld [vmem:[#allocation73_spill] sm:$0xff] }
 0x95e   :  { %2708 = vmatprep.subr.mxu0 %v7105_v61  ;;  %2779 = vmatprep.subr.mxu1 %v7106_v60 }
 0x95f   :  { %2709 = vmatpush1.msra.mxu0 %v7107_v52  ;;  %2780 = vmatpush1.msra.mxu1 %v7108_v33  ;;  %v7119_v33 = vld [vmem:[#allocation47_spill] sm:$0xff] }
 0x960   :  { %2710 = vmatprep.subr.mxu0 %v7109_v19  ;;  %2781 = vmatprep.subr.mxu1 %v7110_v47  ;;  %v7120_v19 = vmov 0.0   ;;  %v7121_v47 = vld [vmem:[#allocation45_spill] sm:$0xff] }
 0x961   :  { %2711 = vmatpush1.msra.mxu0 %v7111_v17  ;;  %2782 = vmatpush1.msra.mxu1 %v7112_v13  ;;  %v7122_v13 = vld [vmem:[#allocation43_spill] sm:$0xff] }
 0x962   :  { %2712 = vmatprep.subr.mxu0 %v7113_v50  ;;  %2783 = vmatprep.subr.mxu1 %v7114_v21  ;;  %v7123_v50 = vld [vmem:[#allocation48_spill] sm:$0xff] }
 0x963   :  { %2713 = vmatpush1.msra.mxu0 %v7115_v51  ;;  %2784 = vmatpush1.msra.mxu1 %v7116_v37  ;;  %v7124_v51 = vld [vmem:[#allocation27_spill] sm:$0xff] }
 0x964   :  { %2714 = vmatprep.subr.mxu0 %v7117_v48  ;;  %2785 = vmatprep.subr.mxu1 %v7118_v53  ;;  %v2145_v21 = vadd.f32 %v7124_v51, %v5957_v12  ;;  %v7125_v48 = vld [vmem:[#allocation29_spill] sm:$0xff]  ;;  %v2258_v51 = vadd.f32 %v7128_v20, %v5982_v27 }
 0x965   :  { %2715 = vmatpush1.msra.mxu0 %v7119_v33  ;;  %2748 = vmatprep.mubr.f32.mxu0 %v7120_v19  ;;  %v2147_v17 = vadd.f32 %v7125_v48, %v5965_v14 }
 0x966   :  { %2786 = vmatpush1.msra.mxu1 %v7121_v47  ;;  %2819 = vmatprep.mubr.f32.mxu1 %v7120_v19 }
 0x967   :  { %2859 = vmatprep.subr.mxu0 %v7122_v13  ;;  %2930 = vmatprep.subr.mxu1 %v7123_v50  ;;  %v7127_v13 = vld [vmem:[#allocation30_spill] sm:$0xff] }
 0x968   :  { %v2260_v49 = vadd.f32 %v7127_v13, %v7126_v16 }
 0xa06   :  { %v2575_v37 = vpop.f32.mrf.mxu0  ;;  %v2646_v61 = vpop.f32.mrf.mxu1 }
 0xa07   :  { %v2651_v53 = vadd.f32 %v2575_v37, %v2145_v21  ;;  %v2653_v12 = vadd.f32 %v2646_v61, %v2258_v51  ;;  %v7141_v61 = vld [vmem:[#allocation57_spill] sm:$0xff]  ;;  %v7144_v51 = vld [vmem:[#allocation60_spill] sm:$0xff] }
 0xa08   :  { %v2577_v52 = vpop.f32.mrf.mxu0  ;;  %v2648_v19 = vpop.f32.mrf.mxu1 }
 0xa09   :  { %v3885_v33 = vmul.f32 -1.442695, %v2651_v53  ;;  %v2652_v60 = vadd.f32 %v2577_v52, %v2147_v17  ;;  %v2654_v50 = vadd.f32 %v2648_v19, %v2260_v49  ;;  %v7143_v53 = vld [vmem:[#allocation25_spill] sm:$0xff] }
 0xa0b   :  { %4116 = vpow2.f32 %v3885_v33  ;;  %v3886_v47 = vmul.f32 -1.442695, %v2652_v60  ;;  %v3887_v46 = vmul.f32 -1.442695, %v2654_v50  ;;  %v7142_v50 = vld [vmem:[#allocation24_spill] sm:$0xff] }
 0xa0d   :  { %4118 = vpow2.f32 %v3886_v47 }
 0xa0e   :  { %4120 = vtanh.f32 %v2653_v12 }
 0xa0f   :  { %4122 = vpow2.f32 %v3887_v46  ;;  %v7140_v46 = vld [vmem:[#allocation59_spill] sm:$0xff] }
 0xa18   :  { %v4117_v44 = vpop.eup %4116 }
 0xa19   :  { %v2658_v48 = vadd.f32 1.0, %v4117_v44 }
 0xa1a   :  { %v4119_v21 = vpop.eup %4118 }
 0xa1b   :  { %4124 = vrcp.f32 %v2658_v48  ;;  %v2664_v52 = vadd.f32 1.0, %v4119_v21  ;;  %v4121_v60 = vpop.eup %4120  ;;  %v7145_v48 = vld [vmem:[#allocation62_spill] sm:$0xff]  ;;  %v7146_v21 = vld [vmem:[#allocation63_spill] sm:$0xff] }
 0xa1c   :  { %v4123_v33 = vpop.eup %4122 }
 0xa1d   :  { %4126 = vrcp.f32 %v2664_v52  ;;  %v2671_v13 = vadd.f32 1.0, %v4123_v33  ;;  %v7147_v52 = vld [vmem:[#allocation61_spill] sm:$0xff]  ;;  %v7149_v33 = vmov 0.0  }
 0xa1f   :  { %4128 = vrcp.f32 %v2671_v13  ;;  %v7153_v13 = vld [vmem:[#allocation42_spill] sm:$0xff] }
 0xa28   :  { %v4125_v47 = vpop.eup %4124 }
 0xa29   :  { %v2675_v17 = vmul.f32 %v4125_v47, %v4121_v60  ;;  %v7148_v60 = vld [vmem:[#allocation47_spill] sm:$0xff]  ;;  %v7150_v47 = vld [vmem:[#allocation45_spill] sm:$0xff] }
 0xa2a   :  { %v4127_v37 = vpop.eup %4126 }
 0xa2b   :  { %v2674_v49 = vmul.f32 %v4127_v37, %v5985_v15  ;;  %v7139_v15 = vld [vmem:[#allocation58_spill] sm:$0xff]  ;;  %v7152_v37 = vld [vmem:[#allocation48_spill] sm:$0xff] }
 0xa2c   :  { %v4129_v44 = vpop.eup %4128 }
 0xa2d   :  { %v6063_v19 = vadd.f32 %v2675_v17, %v2674_v49  ;;  %v7151_v17 = vld [vmem:[#allocation43_spill] sm:$0xff] }
 0xa2e   :  { %v7154_v49 = vld [vmem:[#allocation31_spill] sm:$0xff] }
 0xa2f   :  { %4130 = vtanh.f32 %v6063_v19 }
 0xa3c   :  { %v4131_v12 = vpop.eup %4130 }
 0xa3d   :  { %v2678_v20 = vmul.f32 %v4131_v12, %v4129_v44  ;;  %v2151_v44 = vadd.f32 %v7154_v49, %v7153_v13 }
 0xa3f   :  { %2749 = vmatmul.mubr.f32.vlgmr.msra.gmra.mxu0 %v2678_v20  ;;  %2820 = vmatmul.mubr.f32.vlgmr.msra.gmra.mxu1 %v2678_v20  ;;  %v7155_v20 = vld [vmem:[#allocation33_spill] sm:$0xff] }
 0xa40   :  { %2860 = vmatpush1.msra.mxu0 %v5643_v6  ;;  %2931 = vmatpush1.msra.mxu1 %v5645_v32  ;;  %v7129_v6 = vld [vmem:[#allocation50_spill] sm:$0xff]  ;;  %v7130_v32 = vld [vmem:[#allocation51_spill] sm:$0xff] }
 0xa41   :  { %2861 = vmatprep.subr.mxu0 %v5649_v30  ;;  %2932 = vmatprep.subr.mxu1 %v5651_v56  ;;  %v7131_v30 = vld [vmem:[#allocation49_spill] sm:$0xff]  ;;  %v7132_v56 = vld [vmem:[#allocation52_spill] sm:$0xff] }
 0xa42   :  { %2862 = vmatpush1.msra.mxu0 %v5655_v57  ;;  %2933 = vmatpush1.msra.mxu1 %v5657_v55  ;;  %v7133_v57 = vld [vmem:[#allocation54_spill] sm:$0xff]  ;;  %v7134_v55 = vld [vmem:[#allocation55_spill] sm:$0xff] }
 0xa43   :  { %2863 = vmatprep.subr.mxu0 %v5661_v5  ;;  %2934 = vmatprep.subr.mxu1 %v5663_v59  ;;  %v7135_v5 = vld [vmem:[#allocation53_spill] sm:$0xff] }
 0xa44   :  { %2864 = vmatpush1.msra.mxu0 %v5667_v36  ;;  %2935 = vmatpush1.msra.mxu1 %v5669_v0  ;;  %v7136_v59 = vld [vmem:[#allocation21_spill] sm:$0xff]  ;;  %v7137_v36 = vld [vmem:[#allocation22_spill] sm:$0xff]  ;;  %v7138_v0 = vld [vmem:[#allocation56_spill] sm:$0xff] }
 0xa45   :  { %2865 = vmatprep.subr.mxu0 %v5673_v45  ;;  %2936 = vmatprep.subr.mxu1 %v5675_v3 }
 0xa46   :  { %2866 = vmatpush1.msra.mxu0 %v5679_v1  ;;  %2937 = vmatpush1.msra.mxu1 %v5681_v63 }
 0xa47   :  { %2867 = vmatprep.subr.mxu0 %v5685_v62  ;;  %2938 = vmatprep.subr.mxu1 %v5687_v10 }
 0xa48   :  { %2868 = vmatpush1.msra.mxu0 %v5691_v9  ;;  %2939 = vmatpush1.msra.mxu1 %v5693_v4 }
 0xa49   :  { %2869 = vmatprep.subr.mxu0 %v5697_v2  ;;  %2940 = vmatprep.subr.mxu1 %v5699_v18 }
 0xa4a   :  { %2870 = vmatpush1.msra.mxu0 %v5703_v54  ;;  %2941 = vmatpush1.msra.mxu1 %v5705_v34 }
 0xa4b   :  { %2871 = vmatprep.subr.mxu0 %v5709_v35  ;;  %2942 = vmatprep.subr.mxu1 %v5711_v38 }
 0xa4c   :  { %2872 = vmatpush1.msra.mxu0 %v5715_v11  ;;  %2943 = vmatpush1.msra.mxu1 %v5717_v7 }
 0xa4d   :  { %2873 = vmatprep.subr.mxu0 %v5721_v58  ;;  %2944 = vmatprep.subr.mxu1 %v5723_v22 }
 0xa4e   :  { %2874 = vmatpush1.msra.mxu0 %v5727_v23  ;;  %2945 = vmatpush1.msra.mxu1 %v5729_v24 }
 0xa4f   :  { %2875 = vmatprep.subr.mxu0 %v5733_v25  ;;  %2946 = vmatprep.subr.mxu1 %v5735_v26 }
 0xa50   :  { %2876 = vmatpush1.msra.mxu0 %v5739_v28  ;;  %2947 = vmatpush1.msra.mxu1 %v5741_v29 }
 0xa51   :  { %2877 = vmatprep.subr.mxu0 %v5745_v31  ;;  %2948 = vmatprep.subr.mxu1 %v5747_v8 }
 0xa52   :  { %2878 = vmatpush1.msra.mxu0 %v5751_v39  ;;  %2949 = vmatpush1.msra.mxu1 %v5753_v40 }
 0xa53   :  { %2879 = vmatprep.subr.mxu0 %v5757_v41  ;;  %2950 = vmatprep.subr.mxu1 %v5759_v42 }
 0xa54   :  { %2880 = vmatpush1.msra.mxu0 %v5763_v43  ;;  %2951 = vmatpush1.msra.mxu1 %v7129_v6 }
 0xa55   :  { %2881 = vmatprep.subr.mxu0 %v7130_v32  ;;  %2952 = vmatprep.subr.mxu1 %v7131_v30 }
 0xa56   :  { %2882 = vmatpush1.msra.mxu0 %v7132_v56  ;;  %2953 = vmatpush1.msra.mxu1 %v7133_v57 }
 0xa57   :  { %2883 = vmatprep.subr.mxu0 %v7134_v55  ;;  %2954 = vmatprep.subr.mxu1 %v7135_v5 }
 0xa58   :  { %2884 = vmatpush1.msra.mxu0 %v7136_v59  ;;  %2955 = vmatpush1.msra.mxu1 %v7137_v36 }
 0xa59   :  { %2885 = vmatprep.subr.mxu0 %v7138_v0  ;;  %2956 = vmatprep.subr.mxu1 %v7139_v15 }
 0xa5a   :  { %2886 = vmatpush1.msra.mxu0 %v7140_v46  ;;  %2957 = vmatpush1.msra.mxu1 %v7141_v61  ;;  %v7157_v61 = vld [vmem:[#allocation32_spill] sm:$0xff] }
 0xa5b   :  { %2887 = vmatprep.subr.mxu0 %v7142_v50  ;;  %2958 = vmatprep.subr.mxu1 %v7143_v53  ;;  %v2264_v49 = vadd.f32 %v7157_v61, %v5982_v27 }
 0xa5c   :  { %2888 = vmatpush1.msra.mxu0 %v7144_v51  ;;  %2959 = vmatpush1.msra.mxu1 %v7145_v48 }
 0xa5d   :  { %2889 = vmatprep.subr.mxu0 %v7146_v21  ;;  %2960 = vmatprep.subr.mxu1 %v7147_v52  ;;  %v2153_v21 = vadd.f32 %v7155_v20, %v5965_v14 }
 0xa5e   :  { %2890 = vmatpush1.msra.mxu0 %v7148_v60  ;;  %2923 = vmatprep.mubr.f32.mxu0 %v7149_v33 }
 0xa5f   :  { %2961 = vmatpush1.msra.mxu1 %v7150_v47  ;;  %2994 = vmatprep.mubr.f32.mxu1 %v7149_v33 }
 0xa60   :  { %3034 = vmatprep.subr.mxu0 %v7151_v17  ;;  %3105 = vmatprep.subr.mxu1 %v7152_v37  ;;  %v7156_v17 = vld [vmem:[#allocation34_spill] sm:$0xff] }
 0xa61   :  { %v2266_v50 = vadd.f32 %v7156_v17, %v7126_v16  ;;  %v6150_v17 = vld [vmem:[#allocation12 + $0x1c8] sm:$0xff] }
 0xaff   :  { %v2750_v12 = vpop.f32.mrf.mxu0  ;;  %v2821_v53 = vpop.f32.mrf.mxu1 }
 0xb00   :  { %v2826_v52 = vadd.f32 %v2750_v12, %v2151_v44  ;;  %v2828_v13 = vadd.f32 %v2821_v53, %v2264_v49  ;;  %v6159_v49 = vld [vmem:[#allocation12 + $0x1d0] sm:$0xff] }
 0xb01   :  { %v2752_v48 = vpop.f32.mrf.mxu0  ;;  %v2823_v33 = vpop.f32.mrf.mxu1 }
 0xb02   :  { %v3888_v60 = vmul.f32 -1.442695, %v2826_v52  ;;  %v2827_v51 = vadd.f32 %v2752_v48, %v2153_v21  ;;  %v2829_v37 = vadd.f32 %v2823_v33, %v2266_v50 }
 0xb04   :  { %4132 = vpow2.f32 %v3888_v60  ;;  %v3889_v47 = vmul.f32 -1.442695, %v2827_v51  ;;  %v3890_v46 = vmul.f32 -1.442695, %v2829_v37  ;;  %v6156_v37 = vld [vmem:[#allocation12 + $0x1c0] sm:$0xff] }
 0xb06   :  { %4134 = vpow2.f32 %v3889_v47 }
 0xb07   :  { %4136 = vtanh.f32 %v2828_v13  ;;  %v6147_v13 = vld [vmem:[#allocation12 + $0x1f0] sm:$0xff] }
 0xb08   :  { %4138 = vpow2.f32 %v3890_v46  ;;  %v6144_v46 = vld [vmem:[#allocation12 + $0x1e0] sm:$0xff] }
 0xb11   :  { %v4133_v15 = vpop.eup %4132 }
 0xb12   :  { %v2833_v20 = vadd.f32 1.0, %v4133_v15 }
 0xb13   :  { %v4135_v44 = vpop.eup %4134 }
 0xb14   :  { %4140 = vrcp.f32 %v2833_v20  ;;  %v2839_v48 = vadd.f32 1.0, %v4135_v44  ;;  %v4137_v51 = vpop.eup %4136  ;;  %v6162_v20 = vld [vmem:[#allocation12 + $0x1a8] sm:$0xff]  ;;  %v6165_v44 = vld [vmem:[#allocation12 + $0x1b8] sm:$0xff] }
 0xb15   :  { %v4139_v21 = vpop.eup %4138 }
 0xb16   :  { %4142 = vrcp.f32 %v2839_v48  ;;  %v2846_v12 = vadd.f32 1.0, %v4139_v21  ;;  %v6168_v48 = vld [vmem:[#allocation12 + $0x1a0] sm:$0xff] }
 0xb18   :  { %4144 = vrcp.f32 %v2846_v12 }
 0xb21   :  { %v4141_v52 = vpop.eup %4140 }
 0xb22   :  { %v2850_v60 = vmul.f32 %v4141_v52, %v4137_v51  ;;  %v6171_v51 = vld [vmem:[#allocation12 + $0x1b0] sm:$0xff] }
 0xb23   :  { %v4143_v47 = vpop.eup %4142 }
 0xb24   :  { %v2849_v50 = vmul.f32 %v4143_v47, %v6063_v19  ;;  %v6153_v19 = vld [vmem:[#allocation12 + $0x1d8] sm:$0xff] }
 0xb25   :  { %v4145_v15 = vpop.eup %4144 }
 0xb26   :  { %v6141_v33 = vadd.f32 %v2850_v60, %v2849_v50 }
 0xb28   :  { %4146 = vtanh.f32 %v6141_v33 }
 0xb35   :  { %v4147_v61 = vpop.eup %4146 }
 0xb36   :  { %v2853_v53 = vmul.f32 %v4147_v61, %v4145_v15 }
 0xb38   :  { %2924 = vmatmul.mubr.f32.vlgmr.msra.gmra.mxu0 %v2853_v53  ;;  %2995 = vmatmul.mubr.f32.vlgmr.msra.gmra.mxu1 %v2853_v53  ;;  %v6259_v53 = vld [vmem:[#allocation12 + $0x198] sm:$0xff] }
 0xb39   :  { %3035 = vmatpush1.msra.mxu0 %v6144_v46  ;;  %3106 = vmatpush1.msra.mxu1 %v6147_v13 }
 0xb3a   :  { %3036 = vmatprep.subr.mxu0 %v6150_v17  ;;  %3107 = vmatprep.subr.mxu1 %v6153_v19 }
 0xb3b   :  { %3037 = vmatpush1.msra.mxu0 %v6156_v37  ;;  %3108 = vmatpush1.msra.mxu1 %v6159_v49 }
 0xb3c   :  { %3038 = vmatprep.subr.mxu0 %v6162_v20  ;;  %3109 = vmatprep.subr.mxu1 %v6165_v44 }
 0xb3d   :  { %3039 = vmatpush1.msra.mxu0 %v6168_v48  ;;  %3110 = vmatpush1.msra.mxu1 %v6171_v51 }
 0xb3e   :  { %3040 = vmatprep.subr.mxu0 %v5673_v45  ;;  %3111 = vmatprep.subr.mxu1 %v5675_v3  ;;  %v7158_v45 = vld [vmem:[#allocation58_spill] sm:$0xff]  ;;  %v7159_v3 = vld [vmem:[#allocation59_spill] sm:$0xff] }
 0xb3f   :  { %3041 = vmatpush1.msra.mxu0 %v5679_v1  ;;  %3112 = vmatpush1.msra.mxu1 %v5681_v63  ;;  %v7160_v1 = vld [vmem:[#allocation57_spill] sm:$0xff]  ;;  %v7161_v63 = vld [vmem:[#allocation24_spill] sm:$0xff] }
 0xb40   :  { %3042 = vmatprep.subr.mxu0 %v5685_v62  ;;  %3113 = vmatprep.subr.mxu1 %v5687_v10  ;;  %v7162_v62 = vld [vmem:[#allocation25_spill] sm:$0xff]  ;;  %v7163_v10 = vld [vmem:[#allocation60_spill] sm:$0xff] }
 0xb41   :  { %3043 = vmatpush1.msra.mxu0 %v5691_v9  ;;  %3114 = vmatpush1.msra.mxu1 %v5693_v4  ;;  %v7164_v9 = vld [vmem:[#allocation62_spill] sm:$0xff]  ;;  %v7165_v4 = vld [vmem:[#allocation63_spill] sm:$0xff] }
 0xb42   :  { %3044 = vmatprep.subr.mxu0 %v5697_v2  ;;  %3115 = vmatprep.subr.mxu1 %v5699_v18  ;;  %v7166_v2 = vld [vmem:[#allocation61_spill] sm:$0xff]  ;;  %v7167_v18 = vld [vmem:[#allocation47_spill] sm:$0xff] }
 0xb43   :  { %3045 = vmatpush1.msra.mxu0 %v5703_v54  ;;  %3116 = vmatpush1.msra.mxu1 %v5705_v34  ;;  %v7168_v54 = vmov 0.0   ;;  %v7169_v34 = vld [vmem:[#allocation45_spill] sm:$0xff] }
 0xb44   :  { %3046 = vmatprep.subr.mxu0 %v5709_v35  ;;  %3117 = vmatprep.subr.mxu1 %v5711_v38  ;;  %v6228_v35 = vld [vmem:[#allocation12 + $0x1e8] sm:$0xff]  ;;  %v6231_v38 = vld [vmem:[#allocation12 + $0x1f8] sm:$0xff] }
 0xb45   :  { %3047 = vmatpush1.msra.mxu0 %v5715_v11  ;;  %3118 = vmatpush1.msra.mxu1 %v5717_v7  ;;  %7170 = vst [vmem:[#allocation27_spill] sm:$0xff] %v6228_v35  ;;  %7171 = vst [vmem:[#allocation29_spill] sm:$0xff] %v6231_v38  ;;  %v7172_v11 = vld [vmem:[#allocation42_spill] sm:$0xff]  ;;  %v7173_v7 = vld [vmem:[#allocation35_spill] sm:$0xff] }
 0xb46   :  { %3048 = vmatprep.subr.mxu0 %v5721_v58  ;;  %3119 = vmatprep.subr.mxu1 %v5723_v22  ;;  %v2157_v58 = vadd.f32 %v7173_v7, %v7172_v11  ;;  %v6295_v7 = vld [vmem:[#allocation12 + $0x138] sm:$0xff] }
 0xb47   :  { %3049 = vmatpush1.msra.mxu0 %v5727_v23  ;;  %3120 = vmatpush1.msra.mxu1 %v5729_v24  ;;  %v7174_v23 = vld [vmem:[#allocation37_spill] sm:$0xff] }
 0xb48   :  { %3050 = vmatprep.subr.mxu0 %v5733_v25  ;;  %3121 = vmatprep.subr.mxu1 %v5735_v26  ;;  %v2159_v24 = vadd.f32 %v7174_v23, %v5965_v14  ;;  %v6304_v23 = vld [vmem:[#allocation12 + $0x108] sm:$0xff] }
 0xb49   :  { %3051 = vmatpush1.msra.mxu0 %v5739_v28  ;;  %3122 = vmatpush1.msra.mxu1 %v5741_v29 }
 0xb4a   :  { %3052 = vmatprep.subr.mxu0 %v5745_v31  ;;  %3123 = vmatprep.subr.mxu1 %v5747_v8 }
 0xb4b   :  { %3053 = vmatpush1.msra.mxu0 %v5751_v39  ;;  %3124 = vmatpush1.msra.mxu1 %v5753_v40  ;;  %v7175_v40 = vld [vmem:[#allocation38_spill] sm:$0xff] }
 0xb4c   :  { %3054 = vmatprep.subr.mxu0 %v5757_v41  ;;  %3125 = vmatprep.subr.mxu1 %v5759_v42  ;;  %v2272_v41 = vadd.f32 %v7175_v40, %v7126_v16  ;;  %v6331_v40 = vld [vmem:[#allocation12 + $0xd8] sm:$0xff] }
 0xb4d   :  { %3055 = vmatpush1.msra.mxu0 %v5763_v43  ;;  %3126 = vmatpush1.msra.mxu1 %v7129_v6  ;;  %v7176_v43 = vld [vmem:[#allocation36_spill] sm:$0xff] }
 0xb4e   :  { %3056 = vmatprep.subr.mxu0 %v7130_v32  ;;  %3127 = vmatprep.subr.mxu1 %v7131_v30  ;;  %v2270_v6 = vadd.f32 %v7176_v43, %v5982_v27  ;;  %v6340_v43 = vld [vmem:[#allocation12 + $0xa8] sm:$0xff] }
 0xb4f   :  { %3057 = vmatpush1.msra.mxu0 %v7132_v56  ;;  %3128 = vmatpush1.msra.mxu1 %v7133_v57 }
 0xb50   :  { %3058 = vmatprep.subr.mxu0 %v7134_v55  ;;  %3129 = vmatprep.subr.mxu1 %v7135_v5 }
 0xb51   :  { %3059 = vmatpush1.msra.mxu0 %v7136_v59  ;;  %3130 = vmatpush1.msra.mxu1 %v7137_v36 }
 0xb52   :  { %3060 = vmatprep.subr.mxu0 %v7138_v0  ;;  %3131 = vmatprep.subr.mxu1 %v7158_v45  ;;  %v6262_v45 = vld [vmem:[#allocation12 + $0x180] sm:$0xff] }
 0xb53   :  { %3061 = vmatpush1.msra.mxu0 %v7159_v3  ;;  %3132 = vmatpush1.msra.mxu1 %v7160_v1  ;;  %v6265_v3 = vld [vmem:[#allocation12 + $0x190] sm:$0xff]  ;;  %v6268_v1 = vld [vmem:[#allocation12 + $0x168] sm:$0xff] }
 0xb54   :  { %3062 = vmatprep.subr.mxu0 %v7161_v63  ;;  %3133 = vmatprep.subr.mxu1 %v7162_v62  ;;  %v6271_v63 = vld [vmem:[#allocation12 + $0x178] sm:$0xff]  ;;  %v6274_v62 = vld [vmem:[#allocation12 + $0x160] sm:$0xff] }
 0xb55   :  { %3063 = vmatpush1.msra.mxu0 %v7163_v10  ;;  %3134 = vmatpush1.msra.mxu1 %v7164_v9  ;;  %v6277_v10 = vld [vmem:[#allocation12 + $0x170] sm:$0xff]  ;;  %v6280_v9 = vld [vmem:[#allocation12 + $0x148] sm:$0xff] }
 0xb56   :  { %3064 = vmatprep.subr.mxu0 %v7165_v4  ;;  %3135 = vmatprep.subr.mxu1 %v7166_v2  ;;  %v6283_v4 = vld [vmem:[#allocation12 + $0x158] sm:$0xff]  ;;  %v6286_v2 = vld [vmem:[#allocation12 + $0x140] sm:$0xff] }
 0xb57   :  { %3065 = vmatpush1.msra.mxu0 %v7167_v18  ;;  %3098 = vmatprep.mubr.f32.mxu0 %v7168_v54  ;;  %v6289_v18 = vld [vmem:[#allocation12 + $0x150] sm:$0xff] }
 0xb58   :  { %3136 = vmatpush1.msra.mxu1 %v7169_v34  ;;  %3169 = vmatprep.mubr.f32.mxu1 %v7168_v54  ;;  %v6292_v34 = vld [vmem:[#allocation12 + $0x128] sm:$0xff] }
 0xb59   :  { %3209 = vmatprep.subr.mxu0 %v6228_v35  ;;  %3280 = vmatprep.subr.mxu1 %v6231_v38 }
 0xbf8   :  { %v2925_v22 = vpop.f32.mrf.mxu0  ;;  %v2996_v31 = vpop.f32.mrf.mxu1 }
 0xbf9   :  { %v3001_v25 = vadd.f32 %v2925_v22, %v2157_v58  ;;  %v3003_v32 = vadd.f32 %v2996_v31, %v2270_v6  ;;  %v6298_v58 = vld [vmem:[#allocation12 + $0x120] sm:$0xff]  ;;  %v6301_v22 = vld [vmem:[#allocation12 + $0x130] sm:$0xff]  ;;  %v6343_v6 = vld [vmem:[#allocation12 + $0xb8] sm:$0xff] }
 0xbfa   :  { %v2927_v26 = vpop.f32.mrf.mxu0  ;;  %v2998_v39 = vpop.f32.mrf.mxu1  ;;  %v6322_v31 = vld [vmem:[#allocation12 + $0xe0] sm:$0xff] }
 0xbfb   :  { %v3891_v28 = vmul.f32 -1.442695, %v3001_v25  ;;  %v3002_v29 = vadd.f32 %v2927_v26, %v2159_v24  ;;  %v3004_v42 = vadd.f32 %v2998_v39, %v2272_v41  ;;  %v6307_v24 = vld [vmem:[#allocation12 + $0x118] sm:$0xff]  ;;  %v6310_v25 = vld [vmem:[#allocation12 + $0x100] sm:$0xff]  ;;  %v6313_v26 = vld [vmem:[#allocation12 + $0x110] sm:$0xff] }
 0xbfc   :  { %v6328_v39 = vld [vmem:[#allocation12 + $0xc8] sm:$0xff]  ;;  %v6334_v41 = vld [vmem:[#allocation12 + $0xc0] sm:$0xff] }
 0xbfd   :  { %4148 = vpow2.f32 %v3891_v28  ;;  %v3892_v8 = vmul.f32 -1.442695, %v3002_v29  ;;  %v3893_v30 = vmul.f32 -1.442695, %v3004_v42  ;;  %v6316_v28 = vld [vmem:[#allocation12 + $0xe8] sm:$0xff]  ;;  %v6319_v29 = vld [vmem:[#allocation12 + $0xf8] sm:$0xff] }
 0xbfe   :  { %v6337_v42 = vld [vmem:[#allocation12 + $0xd0] sm:$0xff] }
 0xbff   :  { %4150 = vpow2.f32 %v3892_v8  ;;  %v6325_v8 = vld [vmem:[#allocation12 + $0xf0] sm:$0xff] }
 0xc00   :  { %4152 = vtanh.f32 %v3003_v32  ;;  %v6346_v32 = vld [vmem:[#allocation12 + $0xa0] sm:$0xff] }
 0xc01   :  { %4154 = vpow2.f32 %v3893_v30  ;;  %v6349_v30 = vld [vmem:[#allocation12 + $0xb0] sm:$0xff] }
 0xc02   :  { %7177 = vst [vmem:[#allocation73_spill] sm:$0xff] %v6349_v30 }
 0xc0a   :  { %v4149_v56 = vpop.eup %4148 }
 0xc0b   :  { %v3008_v57 = vadd.f32 1.0, %v4149_v56  ;;  %v6352_v56 = vld [vmem:[#allocation12 + $0x88] sm:$0xff] }
 0xc0c   :  { %v4151_v55 = vpop.eup %4150  ;;  %7178 = vst [vmem:[#allocation30_spill] sm:$0xff] %v6352_v56 }
 0xc0d   :  { %4156 = vrcp.f32 %v3008_v57  ;;  %v3014_v5 = vadd.f32 1.0, %v4151_v55  ;;  %v4153_v59 = vpop.eup %4152  ;;  %v6355_v57 = vld [vmem:[#allocation12 + $0x98] sm:$0xff]  ;;  %v6358_v55 = vld [vmem:[#allocation12 + $0x80] sm:$0xff] }
 0xc0e   :  { %v4155_v36 = vpop.eup %4154  ;;  %7179 = vst [vmem:[#allocation28_spill] sm:$0xff] %v6355_v57  ;;  %7180 = vst [vmem:[#allocation50_spill] sm:$0xff] %v6358_v55 }
 0xc0f   :  { %4158 = vrcp.f32 %v3014_v5  ;;  %v3021_v60 = vadd.f32 1.0, %v4155_v36  ;;  %v6361_v5 = vld [vmem:[#allocation12 + $0x90] sm:$0xff]  ;;  %v6367_v36 = vld [vmem:[#allocation12 + $0x78] sm:$0xff] }
 0xc10   :  { %7181 = vst [vmem:[#allocation51_spill] sm:$0xff] %v6361_v5  ;;  %7183 = vst [vmem:[#allocation52_spill] sm:$0xff] %v6367_v36 }
 0xc11   :  { %4160 = vrcp.f32 %v3021_v60  ;;  %v6379_v60 = vld [vmem:[#allocation12 + $0x58] sm:$0xff] }
 0xc12   :  { %7187 = vst [vmem:[#allocation21_spill] sm:$0xff] %v6379_v60 }
 0xc1a   :  { %v4157_v0 = vpop.eup %4156 }
 0xc1b   :  { %v3025_v21 = vmul.f32 %v4157_v0, %v4153_v59  ;;  %v6364_v59 = vld [vmem:[#allocation12 + $0x68] sm:$0xff]  ;;  %v6370_v0 = vld [vmem:[#allocation12 + $0x60] sm:$0xff] }
 0xc1c   :  { %v4159_v52 = vpop.eup %4158  ;;  %7182 = vst [vmem:[#allocation49_spill] sm:$0xff] %v6364_v59  ;;  %7184 = vst [vmem:[#allocation54_spill] sm:$0xff] %v6370_v0 }
 0xc1d   :  { %v3024_v47 = vmul.f32 %v4159_v52, %v6141_v33  ;;  %v6256_v33 = vld [vmem:[#allocation12 + $0x188] sm:$0xff] }
 0xc1e   :  { %v4161_v50 = vpop.eup %4160  ;;  %v6376_v52 = vld [vmem:[#allocation12 + $0x48] sm:$0xff] }
 0xc1f   :  { %v6243_v12 = vadd.f32 %v3025_v21, %v3024_v47  ;;  %v6373_v21 = vld [vmem:[#allocation12 + $0x70] sm:$0xff]  ;;  %7186 = vst [vmem:[#allocation53_spill] sm:$0xff] %v6376_v52  ;;  %v6382_v47 = vld [vmem:[#allocation12 + $0x40] sm:$0xff] }
 0xc20   :  { %7185 = vst [vmem:[#allocation55_spill] sm:$0xff] %v6373_v21  ;;  %7188 = vst [vmem:[#allocation22_spill] sm:$0xff] %v6382_v47 }
 0xc21   :  { %4162 = vtanh.f32 %v6243_v12 }
 0xc2e   :  { %v4163_v15 = vpop.eup %4162 }
 0xc2f   :  { %v3028_v61 = vmul.f32 %v4163_v15, %v4161_v50  ;;  %v6385_v50 = vld [vmem:[#allocation12 + $0x50] sm:$0xff]  ;;  %v6388_v15 = vld [vmem:[#allocation12 + $0x28] sm:$0xff] }
 0xc30   :  { %7189 = vst [vmem:[#allocation56_spill] sm:$0xff] %v6385_v50  ;;  %7190 = vst [vmem:[#allocation43_spill] sm:$0xff] %v6388_v15 }
 0xc31   :  { %3099 = vmatmul.mubr.f32.vlgmr.msra.gmra.mxu0 %v3028_v61  ;;  %3170 = vmatmul.mubr.f32.vlgmr.msra.gmra.mxu1 %v3028_v61  ;;  %v6391_v61 = vld [vmem:[#allocation12 + $0x38] sm:$0xff] }
 0xc32   :  { %3210 = vmatpush1.msra.mxu0 %v6144_v46  ;;  %3281 = vmatpush1.msra.mxu1 %v6147_v13  ;;  %7191 = vst [vmem:[#allocation48_spill] sm:$0xff] %v6391_v61 }
 0xc33   :  { %3211 = vmatprep.subr.mxu0 %v6150_v17  ;;  %3282 = vmatprep.subr.mxu1 %v6153_v19 }
 0xc34   :  { %3212 = vmatpush1.msra.mxu0 %v6156_v37  ;;  %3283 = vmatpush1.msra.mxu1 %v6159_v49 }
 0xc35   :  { %3213 = vmatprep.subr.mxu0 %v6162_v20  ;;  %3284 = vmatprep.subr.mxu1 %v6165_v44 }
 0xc36   :  { %3214 = vmatpush1.msra.mxu0 %v6168_v48  ;;  %3285 = vmatpush1.msra.mxu1 %v6171_v51 }
 0xc37   :  { %3215 = vmatprep.subr.mxu0 %v6256_v33  ;;  %3286 = vmatprep.subr.mxu1 %v6259_v53 }
 0xc38   :  { %3216 = vmatpush1.msra.mxu0 %v6262_v45  ;;  %3287 = vmatpush1.msra.mxu1 %v6265_v3 }
 0xc39   :  { %3217 = vmatprep.subr.mxu0 %v6268_v1  ;;  %3288 = vmatprep.subr.mxu1 %v6271_v63 }
 0xc3a   :  { %3218 = vmatpush1.msra.mxu0 %v6274_v62  ;;  %3289 = vmatpush1.msra.mxu1 %v6277_v10 }
 0xc3b   :  { %3219 = vmatprep.subr.mxu0 %v6280_v9  ;;  %3290 = vmatprep.subr.mxu1 %v6283_v4 }
 0xc3c   :  { %3220 = vmatpush1.msra.mxu0 %v6286_v2  ;;  %3291 = vmatpush1.msra.mxu1 %v6289_v18 }
 0xc3d   :  { %3221 = vmatprep.subr.mxu0 %v6292_v34  ;;  %3292 = vmatprep.subr.mxu1 %v6295_v7 }
 0xc3e   :  { %3222 = vmatpush1.msra.mxu0 %v6298_v58  ;;  %3293 = vmatpush1.msra.mxu1 %v6301_v22 }
 0xc3f   :  { %3223 = vmatprep.subr.mxu0 %v6304_v23  ;;  %3294 = vmatprep.subr.mxu1 %v6307_v24 }
 0xc40   :  { %3224 = vmatpush1.msra.mxu0 %v6310_v25  ;;  %3295 = vmatpush1.msra.mxu1 %v6313_v26 }
 0xc41   :  { %3225 = vmatprep.subr.mxu0 %v6316_v28  ;;  %3296 = vmatprep.subr.mxu1 %v6319_v29 }
 0xc42   :  { %3226 = vmatpush1.msra.mxu0 %v6322_v31  ;;  %3297 = vmatpush1.msra.mxu1 %v6325_v8 }
 0xc43   :  { %3227 = vmatprep.subr.mxu0 %v6328_v39  ;;  %3298 = vmatprep.subr.mxu1 %v6331_v40 }
 0xc44   :  { %3228 = vmatpush1.msra.mxu0 %v6334_v41  ;;  %3299 = vmatpush1.msra.mxu1 %v6337_v42 }
 0xc45   :  { %3229 = vmatprep.subr.mxu0 %v6340_v43  ;;  %3300 = vmatprep.subr.mxu1 %v6343_v6 }
 0xc46   :  { %3230 = vmatpush1.msra.mxu0 %v6346_v32  ;;  %3301 = vmatpush1.msra.mxu1 %v6349_v30 }
 0xc47   :  { %3231 = vmatprep.subr.mxu0 %v6352_v56  ;;  %3302 = vmatprep.subr.mxu1 %v6355_v57  ;;  %v7201_v57 = vld [vmem:[#allocation40_spill] sm:$0xff] }
 0xc48   :  { %3232 = vmatpush1.msra.mxu0 %v6358_v55  ;;  %3303 = vmatpush1.msra.mxu1 %v6361_v5 }
 0xc49   :  { %3233 = vmatprep.subr.mxu0 %v6364_v59  ;;  %3304 = vmatprep.subr.mxu1 %v6367_v36 }
 0xc4a   :  { %3234 = vmatpush1.msra.mxu0 %v6370_v0  ;;  %3305 = vmatpush1.msra.mxu1 %v6373_v21 }
 0xc4b   :  { %3235 = vmatprep.subr.mxu0 %v6376_v52  ;;  %3306 = vmatprep.subr.mxu1 %v6379_v60  ;;  %v6394_v52 = vld [vmem:[#allocation12 + $0x20] sm:$0xff]  ;;  %v6397_v60 = vld [vmem:[#allocation12 + $0x30] sm:$0xff] }
 0xc4c   :  { %3236 = vmatpush1.msra.mxu0 %v6382_v47  ;;  %3307 = vmatpush1.msra.mxu1 %v6385_v50  ;;  %7192 = vst [vmem:[#allocation31_spill] sm:$0xff] %v6394_v52  ;;  %7193 = vst [vmem:[#allocation33_spill] sm:$0xff] %v6397_v60  ;;  %v6400_v47 = vld [vmem:[#allocation12 + $0x8] sm:$0xff]  ;;  %v6403_v50 = vld [vmem:[#allocation12 + $0x18] sm:$0xff] }
 0xc4d   :  { %3237 = vmatprep.subr.mxu0 %v6388_v15  ;;  %3308 = vmatprep.subr.mxu1 %v6391_v61  ;;  %7194 = vst [vmem:[#allocation34_spill] sm:$0xff] %v6400_v47  ;;  %7195 = vst [vmem:[#allocation32_spill] sm:$0xff] %v6403_v50  ;;  %v6406_v15 = vld [vmem:[#allocation12] sm:$0xff]  ;;  %v6410_v61 = vld [vmem:[#allocation12 + $0x10] sm:$0xff] }
 0xc4e   :  { %3238 = vmatpush1.msra.mxu0 %v6394_v52  ;;  %3309 = vmatpush1.msra.mxu1 %v6397_v60  ;;  %7196 = vst [vmem:[#allocation58_spill] sm:$0xff] %v6406_v15  ;;  %7197 = vst [vmem:[#allocation59_spill] sm:$0xff] %v6410_v61  ;;  %v7199_v52 = vld [vmem:[#allocation41_spill] sm:$0xff] }
 0xc4f   :  { %3239 = vmatprep.subr.mxu0 %v6400_v47  ;;  %3310 = vmatprep.subr.mxu1 %v6403_v50  ;;  %v7198_v47 = vld [vmem:[#allocation39_spill] sm:$0xff]  ;;  %v2165_v21 = vadd.f32 %v7199_v52, %v5965_v14 }
 0xc50   :  { %3240 = vmatpush1.msra.mxu0 %v6406_v15  ;;  %3273 = vmatprep.mubr.f32.mxu0 %v7168_v54  ;;  %v2163_v60 = vadd.f32 %v7198_v47, %v7172_v11  ;;  %v2276_v47 = vadd.f32 %v7201_v57, %v5982_v27  ;;  %v7204_v57 = vld [vmem:[#allocation28_spill] sm:$0xff] }
 0xc51   :  { %3311 = vmatpush1.msra.mxu1 %v6410_v61  ;;  %3344 = vmatprep.mubr.f32.mxu1 %v7168_v54 }
 0xc52   :  { %3384 = vmatprep.subr.mxu0 %v6228_v35  ;;  %3455 = vmatprep.subr.mxu1 %v6231_v38  ;;  %v7200_v35 = vld [vmem:[#allocation64_spill] sm:$0xff] }
 0xc53   :  { %v2278_v55 = vadd.f32 %v7200_v35, %v7126_v16 }
 0xcf1   :  { %v3100_v50 = vpop.f32.mrf.mxu0  ;;  %v3171_v5 = vpop.f32.mrf.mxu1 }
 0xcf2   :  { %v3176_v15 = vadd.f32 %v3100_v50, %v2163_v60  ;;  %v3178_v11 = vadd.f32 %v3171_v5, %v2276_v47  ;;  %v7205_v5 = vld [vmem:[#allocation50_spill] sm:$0xff]  ;;  %v7207_v47 = vld [vmem:[#allocation49_spill] sm:$0xff] }
 0xcf3   :  { %v3102_v0 = vpop.f32.mrf.mxu0  ;;  %v3173_v54 = vpop.f32.mrf.mxu1 }
 0xcf4   :  { %v3894_v36 = vmul.f32 -1.442695, %v3176_v15  ;;  %v3177_v59 = vadd.f32 %v3102_v0, %v2165_v21  ;;  %v3179_v38 = vadd.f32 %v3173_v54, %v2278_v55 }
 0xcf6   :  { %4164 = vpow2.f32 %v3894_v36  ;;  %v3895_v61 = vmul.f32 -1.442695, %v3177_v59  ;;  %v3896_v56 = vmul.f32 -1.442695, %v3179_v38 }
 0xcf8   :  { %4166 = vpow2.f32 %v3895_v61  ;;  %v7206_v61 = vld [vmem:[#allocation51_spill] sm:$0xff] }
 0xcf9   :  { %4168 = vtanh.f32 %v3178_v11 }
 0xcfa   :  { %4170 = vpow2.f32 %v3896_v56  ;;  %v7203_v56 = vld [vmem:[#allocation30_spill] sm:$0xff] }
 0xd03   :  { %v4165_v30 = vpop.eup %4164 }
 0xd04   :  { %v3183_v52 = vadd.f32 1.0, %v4165_v30 }
 0xd05   :  { %v4167_v60 = vpop.eup %4166 }
 0xd06   :  { %4172 = vrcp.f32 %v3183_v52  ;;  %v3189_v36 = vadd.f32 1.0, %v4167_v60  ;;  %v4169_v59 = vpop.eup %4168  ;;  %v7208_v52 = vld [vmem:[#allocation52_spill] sm:$0xff]  ;;  %v7209_v60 = vld [vmem:[#allocation54_spill] sm:$0xff] }
 0xd07   :  { %v4171_v0 = vpop.eup %4170 }
 0xd08   :  { %4174 = vrcp.f32 %v3189_v36  ;;  %v3196_v35 = vadd.f32 1.0, %v4171_v0  ;;  %v7210_v36 = vld [vmem:[#allocation55_spill] sm:$0xff]  ;;  %v7212_v0 = vld [vmem:[#allocation21_spill] sm:$0xff] }
 0xd0a   :  { %4176 = vrcp.f32 %v3196_v35  ;;  %v7216_v35 = vld [vmem:[#allocation48_spill] sm:$0xff] }
 0xd13   :  { %v4173_v21 = vpop.eup %4172 }
 0xd14   :  { %v3200_v50 = vmul.f32 %v4173_v21, %v4169_v59  ;;  %v7211_v59 = vld [vmem:[#allocation53_spill] sm:$0xff]  ;;  %v7213_v21 = vld [vmem:[#allocation22_spill] sm:$0xff] }
 0xd15   :  { %v4175_v15 = vpop.eup %4174 }
 0xd16   :  { %v3199_v54 = vmul.f32 %v4175_v15, %v6243_v12  ;;  %v7202_v12 = vld [vmem:[#allocation73_spill] sm:$0xff]  ;;  %v7215_v15 = vld [vmem:[#allocation43_spill] sm:$0xff] }
 0xd17   :  { %v4177_v38 = vpop.eup %4176 }
 0xd18   :  { %v6425_v55 = vadd.f32 %v3200_v50, %v3199_v54  ;;  %v7214_v50 = vld [vmem:[#allocation56_spill] sm:$0xff]  ;;  %v7217_v54 = vld [vmem:[#allocation31_spill] sm:$0xff] }
 0xd1a   :  { %4178 = vtanh.f32 %v6425_v55 }
 0xd27   :  { %v4179_v11 = vpop.eup %4178 }
 0xd28   :  { %v3203_v30 = vmul.f32 %v4179_v11, %v4177_v38  ;;  %v7218_v38 = vld [vmem:[#allocation33_spill] sm:$0xff]  ;;  %v7219_v11 = vld [vmem:[#allocation34_spill] sm:$0xff] }
 0xd2a   :  { %3274 = vmatmul.mubr.f32.vlgmr.msra.gmra.mxu0 %v3203_v30  ;;  %3345 = vmatmul.mubr.f32.vlgmr.msra.gmra.mxu1 %v3203_v30  ;;  %v7220_v30 = vld [vmem:[#allocation32_spill] sm:$0xff] }
 0xd2b   :  { %3385 = vmatpush1.msra.mxu0 %v6144_v46  ;;  %3456 = vmatpush1.msra.mxu1 %v6147_v13 }
 0xd2c   :  { %3386 = vmatprep.subr.mxu0 %v6150_v17  ;;  %3457 = vmatprep.subr.mxu1 %v6153_v19 }
 0xd2d   :  { %3387 = vmatpush1.msra.mxu0 %v6156_v37  ;;  %3458 = vmatpush1.msra.mxu1 %v6159_v49 }
 0xd2e   :  { %3388 = vmatprep.subr.mxu0 %v6162_v20  ;;  %3459 = vmatprep.subr.mxu1 %v6165_v44 }
 0xd2f   :  { %3389 = vmatpush1.msra.mxu0 %v6168_v48  ;;  %3460 = vmatpush1.msra.mxu1 %v6171_v51 }
 0xd30   :  { %3390 = vmatprep.subr.mxu0 %v6256_v33  ;;  %3461 = vmatprep.subr.mxu1 %v6259_v53 }
 0xd31   :  { %3391 = vmatpush1.msra.mxu0 %v6262_v45  ;;  %3462 = vmatpush1.msra.mxu1 %v6265_v3 }
 0xd32   :  { %3392 = vmatprep.subr.mxu0 %v6268_v1  ;;  %3463 = vmatprep.subr.mxu1 %v6271_v63 }
 0xd33   :  { %3393 = vmatpush1.msra.mxu0 %v6274_v62  ;;  %3464 = vmatpush1.msra.mxu1 %v6277_v10 }
 0xd34   :  { %3394 = vmatprep.subr.mxu0 %v6280_v9  ;;  %3465 = vmatprep.subr.mxu1 %v6283_v4 }
 0xd35   :  { %3395 = vmatpush1.msra.mxu0 %v6286_v2  ;;  %3466 = vmatpush1.msra.mxu1 %v6289_v18 }
 0xd36   :  { %3396 = vmatprep.subr.mxu0 %v6292_v34  ;;  %3467 = vmatprep.subr.mxu1 %v6295_v7 }
 0xd37   :  { %3397 = vmatpush1.msra.mxu0 %v6298_v58  ;;  %3468 = vmatpush1.msra.mxu1 %v6301_v22 }
 0xd38   :  { %3398 = vmatprep.subr.mxu0 %v6304_v23  ;;  %3469 = vmatprep.subr.mxu1 %v6307_v24 }
 0xd39   :  { %3399 = vmatpush1.msra.mxu0 %v6310_v25  ;;  %3470 = vmatpush1.msra.mxu1 %v6313_v26 }
 0xd3a   :  { %3400 = vmatprep.subr.mxu0 %v6316_v28  ;;  %3471 = vmatprep.subr.mxu1 %v6319_v29 }
 0xd3b   :  { %3401 = vmatpush1.msra.mxu0 %v6322_v31  ;;  %3472 = vmatpush1.msra.mxu1 %v6325_v8 }
 0xd3c   :  { %3402 = vmatprep.subr.mxu0 %v6328_v39  ;;  %3473 = vmatprep.subr.mxu1 %v6331_v40 }
 0xd3d   :  { %3403 = vmatpush1.msra.mxu0 %v6334_v41  ;;  %3474 = vmatpush1.msra.mxu1 %v6337_v42 }
 0xd3e   :  { %3404 = vmatprep.subr.mxu0 %v6340_v43  ;;  %3475 = vmatprep.subr.mxu1 %v6343_v6 }
 0xd3f   :  { %3405 = vmatpush1.msra.mxu0 %v6346_v32  ;;  %3476 = vmatpush1.msra.mxu1 %v7202_v12 }
 0xd40   :  { %3406 = vmatprep.subr.mxu0 %v7203_v56  ;;  %3477 = vmatprep.subr.mxu1 %v7204_v57  ;;  %v7230_v57 = vld [vmem:[#allocation67_spill] sm:$0xff] }
 0xd41   :  { %3407 = vmatpush1.msra.mxu0 %v7205_v5  ;;  %3478 = vmatpush1.msra.mxu1 %v7206_v61 }
 0xd42   :  { %3408 = vmatprep.subr.mxu0 %v7207_v47  ;;  %3479 = vmatprep.subr.mxu1 %v7208_v52 }
 0xd43   :  { %3409 = vmatpush1.msra.mxu0 %v7209_v60  ;;  %3480 = vmatpush1.msra.mxu1 %v7210_v36  ;;  %v7221_v36 = vld [vmem:[#allocation58_spill] sm:$0xff] }
 0xd44   :  { %3410 = vmatprep.subr.mxu0 %v7211_v59  ;;  %3481 = vmatprep.subr.mxu1 %v7212_v0  ;;  %v7222_v59 = vmov 0.0   ;;  %v7223_v0 = vld [vmem:[#allocation59_spill] sm:$0xff] }
 0xd45   :  { %3411 = vmatpush1.msra.mxu0 %v7213_v21  ;;  %3482 = vmatpush1.msra.mxu1 %v7214_v50  ;;  %v7224_v50 = vld [vmem:[#allocation27_spill] sm:$0xff] }
 0xd46   :  { %3412 = vmatprep.subr.mxu0 %v7215_v15  ;;  %3483 = vmatprep.subr.mxu1 %v7216_v35  ;;  %v7225_v15 = vld [vmem:[#allocation29_spill] sm:$0xff]  ;;  %v7226_v35 = vld [vmem:[#allocation42_spill] sm:$0xff] }
 0xd47   :  { %3413 = vmatpush1.msra.mxu0 %v7217_v54  ;;  %3484 = vmatpush1.msra.mxu1 %v7218_v38  ;;  %v7227_v54 = vld [vmem:[#allocation66_spill] sm:$0xff] }
 0xd48   :  { %3414 = vmatprep.subr.mxu0 %v7219_v11  ;;  %3485 = vmatprep.subr.mxu1 %v7220_v30  ;;  %v2169_v21 = vadd.f32 %v7227_v54, %v7226_v35  ;;  %v7228_v11 = vld [vmem:[#allocation65_spill] sm:$0xff]  ;;  %v2282_v54 = vadd.f32 %v7230_v57, %v5982_v27 }
 0xd49   :  { %3415 = vmatpush1.msra.mxu0 %v7221_v36  ;;  %3448 = vmatprep.mubr.f32.mxu0 %v7222_v59  ;;  %v2171_v60 = vadd.f32 %v7228_v11, %v5965_v14 }
 0xd4a   :  { %3486 = vmatpush1.msra.mxu1 %v7223_v0  ;;  %3519 = vmatprep.mubr.f32.mxu1 %v7222_v59 }
 0xd4b   :  { %3559 = vmatprep.subr.mxu0 %v7224_v50  ;;  %3630 = vmatprep.subr.mxu1 %v7225_v15  ;;  %v7229_v50 = vld [vmem:[#allocation72_spill] sm:$0xff] }
 0xd4c   :  { %v2284_v5 = vadd.f32 %v7229_v50, %v7126_v16 }
 0xdea   :  { %v3275_v38 = vpop.f32.mrf.mxu0  ;;  %v3346_v61 = vpop.f32.mrf.mxu1 }
 0xdeb   :  { %v3351_v30 = vadd.f32 %v3275_v38, %v2169_v21  ;;  %v3353_v35 = vadd.f32 %v3346_v61, %v2282_v54 }
 0xdec   :  { %v3277_v52 = vpop.f32.mrf.mxu0  ;;  %v3348_v59 = vpop.f32.mrf.mxu1 }
 0xded   :  { %v3897_v36 = vmul.f32 -1.442695, %v3351_v30  ;;  %v3352_v47 = vadd.f32 %v3277_v52, %v2171_v60  ;;  %v3354_v15 = vadd.f32 %v3348_v59, %v2284_v5 }
 0xdef   :  { %4180 = vpow2.f32 %v3897_v36  ;;  %v3898_v0 = vmul.f32 -1.442695, %v3352_v47  ;;  %v3899_v56 = vmul.f32 -1.442695, %v3354_v15 }
 0xdf1   :  { %4182 = vpow2.f32 %v3898_v0 }
 0xdf2   :  { %4184 = vtanh.f32 %v3353_v35 }
 0xdf3   :  { %4186 = vpow2.f32 %v3899_v56 }
 0xdfc   :  { %v4181_v12 = vpop.eup %4180 }
 0xdfd   :  { %v3358_v11 = vadd.f32 1.0, %v4181_v12 }
 0xdfe   :  { %v4183_v21 = vpop.eup %4182 }
 0xdff   :  { %4188 = vrcp.f32 %v3358_v11  ;;  %v3364_v52 = vadd.f32 1.0, %v4183_v21  ;;  %v4185_v47 = vpop.eup %4184 }
 0xe00   :  { %v4187_v60 = vpop.eup %4186 }
 0xe01   :  { %4190 = vrcp.f32 %v3364_v52  ;;  %v3371_v30 = vadd.f32 1.0, %v4187_v60 }
 0xe03   :  { %4192 = vrcp.f32 %v3371_v30 }
 0xe0c   :  { %v4189_v36 = vpop.eup %4188 }
 0xe0d   :  { %v3375_v0 = vmul.f32 %v4189_v36, %v4185_v47 }
 0xe0e   :  { %v4191_v38 = vpop.eup %4190 }
 0xe0f   :  { %v3374_v5 = vmul.f32 %v4191_v38, %v6425_v55 }
 0xe10   :  { %v4193_v12 = vpop.eup %4192 }
 0xe11   :  { %v6503_v59 = vadd.f32 %v3375_v0, %v3374_v5 }
 0xe13   :  { %4194 = vtanh.f32 %v6503_v59 }
 0xe20   :  { %v4195_v57 = vpop.eup %4194 }
 0xe21   :  { %v3378_v61 = vmul.f32 %v4195_v57, %v4193_v12  ;;  %v3745_v12 = vld [vmem:[#allocation13 + $0x78] sm:$0xff]  ;;  %v3744_v57 = vld [vmem:[#allocation13 + $0x70] sm:$0xff] }
 0xe23   :  { %3449 = vmatmul.mubr.f32.vlgmr.msra.gmra.mxu0 %v3378_v61  ;;  %3520 = vmatmul.mubr.f32.vlgmr.msra.gmra.mxu1 %v3378_v61  ;;  %v3743_v61 = vld [vmem:[#allocation13 + $0x68] sm:$0xff] }
 0xe24   :  { %3560 = vmatpush1.msra.mxu0 %v6144_v46  ;;  %3631 = vmatpush1.msra.mxu1 %v6147_v13  ;;  %v7231_v46 = vld [vmem:[#allocation73_spill] sm:$0xff]  ;;  %v7232_v13 = vld [vmem:[#allocation30_spill] sm:$0xff] }
 0xe25   :  { %3561 = vmatprep.subr.mxu0 %v6150_v17  ;;  %3632 = vmatprep.subr.mxu1 %v6153_v19  ;;  %v7233_v17 = vld [vmem:[#allocation28_spill] sm:$0xff]  ;;  %v7234_v19 = vld [vmem:[#allocation50_spill] sm:$0xff] }
 0xe26   :  { %3562 = vmatpush1.msra.mxu0 %v6156_v37  ;;  %3633 = vmatpush1.msra.mxu1 %v6159_v49  ;;  %v7235_v37 = vld [vmem:[#allocation51_spill] sm:$0xff]  ;;  %v7236_v49 = vld [vmem:[#allocation49_spill] sm:$0xff] }
 0xe27   :  { %3563 = vmatprep.subr.mxu0 %v6162_v20  ;;  %3634 = vmatprep.subr.mxu1 %v6165_v44  ;;  %v7237_v20 = vld [vmem:[#allocation52_spill] sm:$0xff]  ;;  %v7238_v44 = vld [vmem:[#allocation54_spill] sm:$0xff] }
 0xe28   :  { %3564 = vmatpush1.msra.mxu0 %v6168_v48  ;;  %3635 = vmatpush1.msra.mxu1 %v6171_v51  ;;  %v7239_v48 = vld [vmem:[#allocation55_spill] sm:$0xff]  ;;  %v7240_v51 = vld [vmem:[#allocation53_spill] sm:$0xff] }
 0xe29   :  { %3565 = vmatprep.subr.mxu0 %v6256_v33  ;;  %3636 = vmatprep.subr.mxu1 %v6259_v53  ;;  %v7241_v33 = vld [vmem:[#allocation21_spill] sm:$0xff]  ;;  %v7242_v53 = vld [vmem:[#allocation22_spill] sm:$0xff] }
 0xe2a   :  { %3566 = vmatpush1.msra.mxu0 %v6262_v45  ;;  %3637 = vmatpush1.msra.mxu1 %v6265_v3  ;;  %v7243_v45 = vld [vmem:[#allocation56_spill] sm:$0xff]  ;;  %v7244_v3 = vld [vmem:[#allocation43_spill] sm:$0xff] }
 0xe2b   :  { %3567 = vmatprep.subr.mxu0 %v6268_v1  ;;  %3638 = vmatprep.subr.mxu1 %v6271_v63  ;;  %v7245_v1 = vld [vmem:[#allocation48_spill] sm:$0xff]  ;;  %v7246_v63 = vld [vmem:[#allocation31_spill] sm:$0xff] }
 0xe2c   :  { %3568 = vmatpush1.msra.mxu0 %v6274_v62  ;;  %3639 = vmatpush1.msra.mxu1 %v6277_v10  ;;  %v7247_v62 = vld [vmem:[#allocation33_spill] sm:$0xff]  ;;  %v7248_v10 = vld [vmem:[#allocation34_spill] sm:$0xff] }
 0xe2d   :  { %3569 = vmatprep.subr.mxu0 %v6280_v9  ;;  %3640 = vmatprep.subr.mxu1 %v6283_v4  ;;  %v7249_v9 = vld [vmem:[#allocation32_spill] sm:$0xff]  ;;  %v7250_v4 = vld [vmem:[#allocation58_spill] sm:$0xff] }
 0xe2e   :  { %3570 = vmatpush1.msra.mxu0 %v6286_v2  ;;  %3641 = vmatpush1.msra.mxu1 %v6289_v18  ;;  %v7251_v2 = vmov 0.0   ;;  %v7252_v18 = vld [vmem:[#allocation59_spill] sm:$0xff] }
 0xe2f   :  { %3571 = vmatprep.subr.mxu0 %v6292_v34  ;;  %3642 = vmatprep.subr.mxu1 %v6295_v7  ;;  %v7253_v34 = vld [vmem:[#allocation42_spill] sm:$0xff]  ;;  %v7254_v7 = vld [vmem:[#allocation23_spill] sm:$0xff] }
 0xe30   :  { %3572 = vmatpush1.msra.mxu0 %v6298_v58  ;;  %3643 = vmatpush1.msra.mxu1 %v6301_v22  ;;  %v2175_v58 = vadd.f32 %v7254_v7, %v7253_v34 }
 0xe31   :  { %3573 = vmatprep.subr.mxu0 %v6304_v23  ;;  %3644 = vmatprep.subr.mxu1 %v6307_v24  ;;  %v7255_v23 = vld [vmem:[#allocation46_spill] sm:$0xff] }
 0xe32   :  { %3574 = vmatpush1.msra.mxu0 %v6310_v25  ;;  %3645 = vmatpush1.msra.mxu1 %v6313_v26  ;;  %v2177_v24 = vadd.f32 %v7255_v23, %v5965_v14  ;;  %v7260_v23 = vld [vmem:[#allocation44_spill] sm:$0xff] }
 0xe33   :  { %3575 = vmatprep.subr.mxu0 %v6316_v28  ;;  %3646 = vmatprep.subr.mxu1 %v6319_v29 }
 0xe34   :  { %3576 = vmatpush1.msra.mxu0 %v6322_v31  ;;  %3647 = vmatpush1.msra.mxu1 %v6325_v8 }
 0xe35   :  { %3577 = vmatprep.subr.mxu0 %v6328_v39  ;;  %3648 = vmatprep.subr.mxu1 %v6331_v40  ;;  %v7256_v40 = vld [vmem:[#allocation68_spill] sm:$0xff] }
 0xe36   :  { %3578 = vmatpush1.msra.mxu0 %v6334_v41  ;;  %3649 = vmatpush1.msra.mxu1 %v6337_v42  ;;  %v2290_v41 = vadd.f32 %v7256_v40, %v7126_v16 }
 0xe37   :  { %3579 = vmatprep.subr.mxu0 %v6340_v43  ;;  %3650 = vmatprep.subr.mxu1 %v6343_v6  ;;  %v7257_v43 = vld [vmem:[#allocation26_spill] sm:$0xff] }
 0xe38   :  { %3580 = vmatpush1.msra.mxu0 %v6346_v32  ;;  %3651 = vmatpush1.msra.mxu1 %v7231_v46  ;;  %v2288_v6 = vadd.f32 %v7257_v43, %v5982_v27  ;;  %v3741_v46 = vld [vmem:[#allocation13 + $0x58] sm:$0xff] }
 0xe39   :  { %3581 = vmatprep.subr.mxu0 %v7232_v13  ;;  %3652 = vmatprep.subr.mxu1 %v7233_v17  ;;  %v3740_v13 = vld [vmem:[#allocation13 + $0x50] sm:$0xff]  ;;  %v3739_v17 = vld [vmem:[#allocation13 + $0x48] sm:$0xff] }
 0xe3a   :  { %3582 = vmatpush1.msra.mxu0 %v7234_v19  ;;  %3653 = vmatpush1.msra.mxu1 %v7235_v37  ;;  %v3738_v19 = vld [vmem:[#allocation13 + $0x40] sm:$0xff]  ;;  %v3737_v37 = vld [vmem:[#allocation13 + $0x38] sm:$0xff] }
 0xe3b   :  { %3583 = vmatprep.subr.mxu0 %v7236_v49  ;;  %3654 = vmatprep.subr.mxu1 %v7237_v20  ;;  %v3736_v49 = vld [vmem:[#allocation13 + $0x30] sm:$0xff]  ;;  %v3735_v20 = vld [vmem:[#allocation13 + $0x28] sm:$0xff] }
 0xe3c   :  { %3584 = vmatpush1.msra.mxu0 %v7238_v44  ;;  %3655 = vmatpush1.msra.mxu1 %v7239_v48  ;;  %v3734_v44 = vld [vmem:[#allocation13 + $0x20] sm:$0xff]  ;;  %v3733_v48 = vld [vmem:[#allocation13 + $0x18] sm:$0xff] }
 0xe3d   :  { %3585 = vmatprep.subr.mxu0 %v7240_v51  ;;  %3656 = vmatprep.subr.mxu1 %v7241_v33  ;;  %v3732_v51 = vld [vmem:[#allocation13 + $0x10] sm:$0xff]  ;;  %v3731_v33 = vld [vmem:[#allocation13 + $0x8] sm:$0xff] }
 0xe3e   :  { %3586 = vmatpush1.msra.mxu0 %v7242_v53  ;;  %3657 = vmatpush1.msra.mxu1 %v7243_v45  ;;  %v3730_v53 = vld [vmem:[#allocation13] sm:$0xff]  ;;  %v7258_v45 = vld [vmem:[#allocation70_spill] sm:$0xff] }
 0xe3f   :  { %3587 = vmatprep.subr.mxu0 %v7244_v3  ;;  %3658 = vmatprep.subr.mxu1 %v7245_v1  ;;  %v2181_v3 = vadd.f32 %v7258_v45, %v7253_v34 }
 0xe40   :  { %3588 = vmatpush1.msra.mxu0 %v7246_v63  ;;  %3659 = vmatpush1.msra.mxu1 %v7247_v62  ;;  %v7259_v63 = vld [vmem:[#allocation69_spill] sm:$0xff] }
 0xe41   :  { %3589 = vmatprep.subr.mxu0 %v7248_v10  ;;  %3660 = vmatprep.subr.mxu1 %v7249_v9  ;;  %v2183_v62 = vadd.f32 %v7259_v63, %v5965_v14 }
 0xe42   :  { %3590 = vmatpush1.msra.mxu0 %v7250_v4  ;;  %3623 = vmatprep.mubr.f32.mxu0 %v7251_v2 }
 0xe43   :  { %3661 = vmatpush1.msra.mxu1 %v7252_v18  ;;  %3694 = vmatprep.mubr.f32.mxu1 %v7251_v2 }
 0xe44   :  { %3924 = vmatprep.subr.mxu0 %v7251_v2 }
 0xee3   :  { %v3450_v22 = vpop.f32.mrf.mxu0  ;;  %v3521_v31 = vpop.f32.mrf.mxu1 }
 0xee4   :  { %v3526_v25 = vadd.f32 %v3450_v22, %v2175_v58  ;;  %v3528_v32 = vadd.f32 %v3521_v31, %v2288_v6 }
 0xee5   :  { %v3452_v26 = vpop.f32.mrf.mxu0  ;;  %v3523_v39 = vpop.f32.mrf.mxu1 }
 0xee6   :  { %v3900_v28 = vmul.f32 -1.442695, %v3526_v25  ;;  %v3527_v29 = vadd.f32 %v3452_v26, %v2177_v24  ;;  %v3529_v42 = vadd.f32 %v3523_v39, %v2290_v41  ;;  %v7261_v25 = vld [vmem:[#allocation71_spill] sm:$0xff] }
 0xee7   :  { %v2294_v34 = vadd.f32 %v7261_v25, %v5982_v27 }
 0xee8   :  { %4196 = vpow2.f32 %v3900_v28  ;;  %v3901_v8 = vmul.f32 -1.442695, %v3527_v29  ;;  %v3902_v55 = vmul.f32 -1.442695, %v3529_v42 }
 0xeea   :  { %4198 = vpow2.f32 %v3901_v8 }
 0xeeb   :  { %4200 = vtanh.f32 %v3528_v32 }
 0xeec   :  { %4202 = vpow2.f32 %v3902_v55 }
 0xef5   :  { %v4197_v56 = vpop.eup %4196 }
 0xef6   :  { %v3533_v35 = vadd.f32 1.0, %v4197_v56 }
 0xef7   :  { %v4199_v50 = vpop.eup %4198 }
 0xef8   :  { %4204 = vrcp.f32 %v3533_v35  ;;  %v3539_v15 = vadd.f32 1.0, %v4199_v50  ;;  %v4201_v54 = vpop.eup %4200  ;;  %v3906_v35 = vld [vmem:[%s6622_s8] ss:$0 sm:$0xff] }
 0xef9   :  { %v4203_v11 = vpop.eup %4202 }
 0xefa   :  { %4206 = vrcp.f32 %v3539_v15  ;;  %v3546_v60 = vadd.f32 1.0, %v4203_v11 }
 0xefc   :  { %4208 = vrcp.f32 %v3546_v60 }
 0xf05   :  { %v4205_v21 = vpop.eup %4204 }
 0xf06   :  { %v3550_v52 = vmul.f32 %v4205_v21, %v4201_v54 }
 0xf07   :  { %v4207_v47 = vpop.eup %4206 }
 0xf08   :  { %v3549_v36 = vmul.f32 %v4207_v47, %v6503_v59  ;;  %v3742_v59 = vld [vmem:[#allocation13 + $0x60] sm:$0xff] }
 0xf09   :  { %v4209_v38 = vpop.eup %4208 }
 0xf0a   :  { %v6580_v0 = vadd.f32 %v3550_v52, %v3549_v36 }
 0xf0c   :  { %4210 = vtanh.f32 %v6580_v0 }
 0xf19   :  { %v4211_v30 = vpop.eup %4210 }
 0xf1a   :  { %v3553_v5 = vmul.f32 %v4211_v30, %v4209_v38 }
 0xf1c   :  { %3624 = vmatmul.mubr.f32.vlgmr.msra.gmra.mxu0 %v3553_v5  ;;  %3695 = vmatmul.mubr.f32.vlgmr.msra.gmra.mxu1 %v3553_v5 }
 0xf1d   :  { %3925 = vmatpush3.msra.mxu0 %v3745_v12  ;;  %3956 = vmatprep.mubr.msk.f32.mxu0 %vm4517_vm1, %v7251_v2 }
 0xf1e   :  { %3926 = vmatprep.subr.mxu0 %v7251_v2 }
 0xf1f   :  { %3927 = vmatpush3.msra.mxu0 %v3744_v57 }
 0xf20   :  { %3928 = vmatprep.subr.mxu0 %v7251_v2 }
 0xf21   :  { %3929 = vmatpush3.msra.mxu0 %v3743_v61 }
 0xf22   :  { %3930 = vmatprep.subr.mxu0 %v7251_v2 }
 0xf23   :  { %3931 = vmatpush3.msra.mxu0 %v3742_v59 }
 0xf24   :  { %3932 = vmatprep.subr.mxu0 %v7251_v2 }
 0xf25   :  { %3933 = vmatpush3.msra.mxu0 %v3741_v46 }
 0xf26   :  { %3934 = vmatprep.subr.mxu0 %v7251_v2 }
 0xf27   :  { %3935 = vmatpush3.msra.mxu0 %v3740_v13 }
 0xf28   :  { %3936 = vmatprep.subr.mxu0 %v7251_v2 }
 0xf29   :  { %3937 = vmatpush3.msra.mxu0 %v3739_v17 }
 0xf2a   :  { %3938 = vmatprep.subr.mxu0 %v7251_v2 }
 0xf2b   :  { %3939 = vmatpush3.msra.mxu0 %v3738_v19 }
 0xf2c   :  { %3940 = vmatprep.subr.mxu0 %v7251_v2 }
 0xf2d   :  { %3941 = vmatpush3.msra.mxu0 %v3737_v37 }
 0xf2e   :  { %3942 = vmatprep.subr.mxu0 %v7251_v2 }
 0xf2f   :  { %3943 = vmatpush3.msra.mxu0 %v3736_v49 }
 0xf30   :  { %3944 = vmatprep.subr.mxu0 %v7251_v2 }
 0xf31   :  { %3945 = vmatpush3.msra.mxu0 %v3735_v20 }
 0xf32   :  { %3946 = vmatprep.subr.mxu0 %v7251_v2 }
 0xf33   :  { %3947 = vmatpush3.msra.mxu0 %v3734_v44 }
 0xf34   :  { %3948 = vmatprep.subr.mxu0 %v7251_v2 }
 0xf35   :  { %3949 = vmatpush3.msra.mxu0 %v3733_v48 }
 0xf36   :  { %3950 = vmatprep.subr.mxu0 %v7251_v2 }
 0xf37   :  { %3951 = vmatpush3.msra.mxu0 %v3732_v51 }
 0xf38   :  { %3952 = vmatprep.subr.mxu0 %v7251_v2 }
 0xf39   :  { %3953 = vmatpush3.msra.mxu0 %v3731_v33 }
 0xf3a   :  { %3954 = vmatprep.subr.mxu0 %v7251_v2  ;;  %v2296_v2 = vadd.f32 %v7260_v23, %v7126_v16 }
 0xf3b   :  { %3955 = vmatpush3.msra.mxu0 %v3730_v53 }
 0xfdc   :  { %v3625_v1 = vpop.f32.mrf.mxu0  ;;  %v3696_v7 = vpop.f32.mrf.mxu1 }
 0xfdd   :  { %v3701_v10 = vadd.f32 %v3625_v1, %v2181_v3  ;;  %v3703_v26 = vadd.f32 %v3696_v7, %v2294_v34 }
 0xfde   :  { %v3627_v9 = vpop.f32.mrf.mxu0  ;;  %v3698_v22 = vpop.f32.mrf.mxu1 }
 0xfdf   :  { %v3903_v4 = vmul.f32 -1.442695, %v3701_v10  ;;  %v3702_v18 = vadd.f32 %v3627_v9, %v2183_v62  ;;  %v3704_v24 = vadd.f32 %v3698_v22, %v2296_v2 }
 0xfe1   :  { %4212 = vpow2.f32 %v3903_v4  ;;  %v3904_v58 = vmul.f32 -1.442695, %v3702_v18  ;;  %v3905_v28 = vmul.f32 -1.442695, %v3704_v24 }
 0xfe3   :  { %4214 = vpow2.f32 %v3904_v58 }
 0xfe4   :  { %4216 = vtanh.f32 %v3703_v26 }
 0xfe5   :  { %4218 = vpow2.f32 %v3905_v28 }
 0xfee   :  { %v4213_v29 = vpop.eup %4212 }
 0xfef   :  { %v3708_v14 = vadd.f32 1.0, %v4213_v29 }
 0xff0   :  { %v4215_v31 = vpop.eup %4214 }
 0xff1   :  { %4220 = vrcp.f32 %v3708_v14  ;;  %v3714_v8 = vadd.f32 1.0, %v4215_v31  ;;  %v4217_v39 = vpop.eup %4216 }
 0xff2   :  { %v4219_v40 = vpop.eup %4218 }
 0xff3   :  { %4222 = vrcp.f32 %v3714_v8  ;;  %v3721_v16 = vadd.f32 1.0, %v4219_v40 }
 0xff5   :  { %4224 = vrcp.f32 %v3721_v16 }
 0xffe   :  { %v4221_v41 = vpop.eup %4220 }
 0xfff   :  { %v3725_v42 = vmul.f32 %v4221_v41, %v4217_v39 }
0x1000   :  { %v4223_v43 = vpop.eup %4222 }
0x1001   :  { %v3724_v6 = vmul.f32 %v4223_v43, %v6580_v0 }
0x1002   :  { %v4225_v27 = vpop.eup %4224 }
0x1003   :  { %v3726_v32 = vadd.f32 %v3725_v42, %v3724_v6 }
0x1005   :  { %4226 = vtanh.f32 %v3726_v32 }
0x1012   :  { %v4227_v55 = vpop.eup %4226 }
0x1013   :  { %v3728_v56 = vmul.f32 %v4227_v55, %v4225_v27 }
0x1015   :  { %3957 = vmatmul.mubr.f32.vlgmr.msra.gmra.mxu0 %v3728_v56 }
0x10d5   :  { %v3819_v50 = vpop.f32.mrf.mxu0 }
0x10d6   :  { %v3820_v15 = vadd.f32 %v3906_v35, %v3819_v50 }
0x10d7   :  { %v3958_v54 = vpop.f32.mrf.mxu0 }
0x10d8   :  { %3823 = vst [vmem:[#allocation15] sm:$0xff] %v3820_v15 }
0x10d9   :  { %4487 = shalt.err (!%p4484_p6)
}
0x10da   :  { %3833 = dma.vmem_to_hbm [thread:$0]  %s3831_s21, 128, %s6623_s9, [#allocation6]  }
0x10db   :  { %4504 = dma.done.wait [#allocation6], 128  }
0x10dc   :  { %4505 = vsyncadd [#allocation6], 4294967168 }
0x10dd   :  { %3837 = vsyncpa [#allocation5], 1 }
0x10de   :  { %3838 = vsyncpa [#allocation8], 1 }
0x10df   :  { %3839 = vsyncpa [#allocation11], 1 }
0x10e0   :  { %3840 = vsyncpa [#allocation14], 1 }
0x10e1   :  { %3841 = vsyncpa [#allocation6], 1 }

</bundles_post_ra>
